<compile_context>
chip_gen: v7x
topology: tpu7x:2x2x1
jax: 0.10.0
libtpu: 0.0.40
codegen_flags: <defaults>
</compile_context>

<pallas_src>
import functools
import math

import jax
import jax.numpy as jnp
from jax.experimental import pallas as pl
from jax.experimental.pallas import tpu as pltpu

LANE = 128
_TARGET_TILE_ROWS = 1024          # target th*Wo rows per conv GEMM tile


def _round_up(x, m):
    return (x + m - 1) // m * m


def _pick_row_tile(Ho, Wo):
    """Pick rows-per-tile `th` (th*Wo a multiple of 8, ~_TARGET_TILE_ROWS rows)
    and the padded height Ho_pad = th * n_tiles (extra rows handled by masks)."""
    g = 8 // math.gcd(Wo, 8)                   # smallest t with (t*Wo) % 8 == 0
    th = max(1, _TARGET_TILE_ROWS // max(1, Wo))
    th = min(th, _round_up(Ho, g))
    th = max(g, th // g * g)
    n = -(-Ho // th)                           # number of row tiles
    th = _round_up(-(-Ho // n), g)             # rebalance: minimize padded rows
    return th, th * n, n


def _conv_tile(x_ref, w_ref, patch_ref, r, *, K, dil, th, Wo, Cin):
    """One conv row tile: build the (th*Wo, K*K*Cin) patch matrix directly in
    VMEM scratch (fused taps, single write) and run one MXU GEMM against the
    pre-flattened (K*K*Cin, Cout_p) weights.  Returns f32 (th*Wo, Cout_p)."""
    tm = th * Wo
    row0 = pl.multiple_of(r * th, th)
    for t in range(K * K):
        kh, kw = divmod(t, K)
        win = x_ref[0, pl.ds(row0 + kh * dil, th), pl.ds(kw * dil, Wo), :]
        patch_ref[:, pl.ds(t * Cin, Cin)] = win.reshape(tm, Cin)
    return jnp.dot(patch_ref[...], w_ref[...],
                   preferred_element_type=jnp.float32)


# ---------------------------------------------------------------------------
# Pass 1: conv (recomputed in pass 2) -> per-sample channel mean / M2
# ---------------------------------------------------------------------------
def _conv_stats_kernel(x_ref, w_ref, mean_ref, m2_ref, patch_ref, *,
                       K, dil, th, Wo, Cin, Ho):
    r = pl.program_id(1)
    tm = th * Wo
    acc = _conv_tile(x_ref, w_ref, patch_ref, r,
                     K=K, dil=dil, th=th, Wo=Wo, Cin=Cin)

    # Rows past the true output height (only possible in the last tile) are
    # excluded from the statistics.
    valid_rows = jnp.minimum(th, Ho - r * th)
    valid_pix_i = valid_rows * Wo
    valid_pix = valid_pix_i.astype(jnp.float32)
    rows = jax.lax.broadcasted_iota(jnp.int32, (tm, 1), 0)
    msk = (rows < valid_pix_i).astype(jnp.float32)

    # Per-tile centered statistics (avoids E[x^2] - E[x]^2 cancellation).
    t_sum = jnp.sum(acc * msk, axis=0, keepdims=True)          # (1, Cout_p)
    t_mean = t_sum / valid_pix
    d = (acc - t_mean) * msk
    t_m2 = jnp.sum(d * d, axis=0, keepdims=True)

    @pl.when(r == 0)
    def _():
        mean_ref[0] = t_mean
        m2_ref[0] = t_m2

    @pl.when(r > 0)
    def _():
        # Chan/Welford merge; the output block stays VMEM-resident across the
        # sequential row-tile axis, so it doubles as the accumulator.
        n_a = (r * tm).astype(jnp.float32)      # all previous tiles are full
        tot = n_a + valid_pix
        delta = t_mean - mean_ref[0]
        mean_ref[0] = mean_ref[0] + delta * (valid_pix / tot)
        m2_ref[0] = m2_ref[0] + t_m2 + delta * delta * (n_a * valid_pix / tot)


# ---------------------------------------------------------------------------
# Pass 2: recompute conv tile, apply folded BN affine + ReLU, store final out
# ---------------------------------------------------------------------------
def _conv_bn_relu_kernel(x_ref, w_ref, scale_ref, bias_ref, o_ref, patch_ref, *,
                         K, dil, th, Wo, Cin, Cout):
    r = pl.program_id(1)
    acc = _conv_tile(x_ref, w_ref, patch_ref, r,
                     K=K, dil=dil, th=th, Wo=Wo, Cin=Cin)
    y = jnp.maximum(acc * scale_ref[...] + bias_ref[...], 0.0)
    o_ref[0] = y[:, :Cout].astype(o_ref.dtype)      # drop channel padding here


def conv_bnr(x_nchw, weight_oihw, gamma, beta,
             kernel_size=3, stride=1, dilation=1, eps=1e-5):
    """ConvBNR forward. x: (N, Cin, H, W) NCHW; weight: (Cout, Cin, K, K)."""
    if stride != 1:
        raise NotImplementedError("this Pallas ConvBNR kernel supports stride=1")
    N, Cin, H, W = x_nchw.shape
    Cout = weight_oihw.shape[0]
    K = kernel_size
    pad = dilation                        # padding = dilation, as in the module
    Ho = H + 2 * pad - dilation * (K - 1)
    Wo = W + 2 * pad - dilation * (K - 1)
    Wp = W + 2 * pad
    # Channel padding only inside the kernels (256 for the v6e/v7x MXU once
    # Cout itself exceeds 128); the stored output is unpadded.
    Cout_p = _round_up(Cout, 256 if Cout > LANE else LANE)

    th, Ho_pad, R = _pick_row_tile(Ho, Wo)
    tm = th * Wo
    Hp = H + 2 * pad + (Ho_pad - Ho)      # extra bottom rows feed padded tiles

    # ---- layout plumbing (bf16 MXU operands) ----
    xb = jnp.transpose(x_nchw, (0, 2, 3, 1)).astype(jnp.bfloat16)       # NHWC
    xp = jnp.pad(xb, ((0, 0), (pad, pad + Ho_pad - Ho), (pad, pad), (0, 0)))
    # weights: (Cout, Cin, K, K) -> (K*K*Cin, Cout_p), tap-major rows matching
    # the in-kernel patch layout; reshape done here, not in the kernel.
    w2 = jnp.transpose(weight_oihw, (2, 3, 1, 0)).reshape(K * K * Cin, Cout)
    w2 = jnp.pad(w2.astype(jnp.bfloat16), ((0, 0), (0, Cout_p - Cout)))

    # ---- explicit VMEM budget ----
    def _lane(c):
        return _round_up(c, LANE)
    img_b = Hp * Wp * _lane(Cin) * 2
    w_b = _round_up(K * K * Cin, 8) * Cout_p * 2
    patch_b = tm * _lane(K * K * Cin) * 2
    acc_b = tm * Cout_p * 4
    out_b = tm * _lane(Cout) * 4
    need = 2 * img_b + 2 * w_b + patch_b + 3 * acc_b + 2 * out_b
    try:
        vmem_cap = pltpu.get_tpu_info().vmem_capacity_bytes
    except Exception:                       # best-effort hardware query
        vmem_cap = 64 * 2 ** 20
    vmem_limit = int(min(int(0.75 * vmem_cap), max(32 * 2 ** 20, 2 * need)))
    cparams = pltpu.CompilerParams(
        dimension_semantics=("parallel", "arbitrary"),   # batch across cores,
        vmem_limit_bytes=vmem_limit)                     # row tiles sequential

    x_spec = pl.BlockSpec((1, Hp, Wp, Cin), lambda n, r: (n, 0, 0, 0))
    w_spec = pl.BlockSpec((K * K * Cin, Cout_p), lambda n, r: (0, 0))
    patch_scratch = pltpu.VMEM((tm, K * K * Cin), jnp.bfloat16)

    # ---- pass 1: per-sample channel mean / M2 (no conv output writeback) ----
    mean_t, m2_t = pl.pallas_call(
        functools.partial(_conv_stats_kernel, K=K, dil=dilation, th=th,
                          Wo=Wo, Cin=Cin, Ho=Ho),
        grid=(N, R),
        in_specs=[x_spec, w_spec],
        out_specs=(pl.BlockSpec((1, 1, Cout_p), lambda n, r: (n, 0, 0)),
                   pl.BlockSpec((1, 1, Cout_p), lambda n, r: (n, 0, 0))),
        out_shape=(jax.ShapeDtypeStruct((N, 1, Cout_p), jnp.float32),
                   jax.ShapeDtypeStruct((N, 1, Cout_p), jnp.float32)),
        scratch_shapes=[patch_scratch],
        compiler_params=cparams,
    )(xp, w2)

    # ---- finish BatchNorm statistics (tiny per-channel math, plain JAX) ----
    cnt = float(Ho * Wo)                         # per-sample pixel count
    means = mean_t[:, 0, :]                      # (N, Cout_p)
    m2s = m2_t[:, 0, :]
    mean = jnp.mean(means, axis=0)
    m2 = jnp.sum(m2s, axis=0) + cnt * jnp.sum((means - mean) ** 2, axis=0)
    var = m2 / (N * cnt)                         # biased var (train-mode BN)
    g = jnp.pad(gamma.astype(jnp.float32), (0, Cout_p - Cout))
    b = jnp.pad(beta.astype(jnp.float32), (0, Cout_p - Cout))
    scale = g * jax.lax.rsqrt(var + eps)
    bias = b - mean * scale

    # ---- pass 2: recompute conv, apply scale/bias + ReLU, store final out ----
    out_flat = pl.pallas_call(
        functools.partial(_conv_bn_relu_kernel, K=K, dil=dilation, th=th,
                          Wo=Wo, Cin=Cin, Cout=Cout),
        grid=(N, R),
        in_specs=[x_spec, w_spec,
                  pl.BlockSpec((1, Cout_p), lambda n, r: (0, 0)),
                  pl.BlockSpec((1, Cout_p), lambda n, r: (0, 0))],
        out_specs=pl.BlockSpec((1, tm, Cout), lambda n, r: (n, r, 0)),
        out_shape=jax.ShapeDtypeStruct((N, Ho_pad * Wo, Cout), x_nchw.dtype),
        scratch_shapes=[patch_scratch],
        compiler_params=cparams,
    )(xp, w2, scale.reshape(1, Cout_p), bias.reshape(1, Cout_p))

    out = out_flat.reshape(N, Ho_pad, Wo, Cout)[:, :Ho]
    return jnp.transpose(out, (0, 3, 1, 2))                 # NHWC -> NCHW


# ---------------------------------------------------------------------------
# Reference (matching precision: bf16 conv operands, f32 accumulation)
# ---------------------------------------------------------------------------
def _reference(x_nchw, weight_oihw, gamma, beta, dilation=1, eps=1e-5):
    y = jax.lax.conv_general_dilated(
        x_nchw.astype(jnp.bfloat16), weight_oihw.astype(jnp.bfloat16),
        window_strides=(1, 1),
        padding=((dilation, dilation), (dilation, dilation)),
        rhs_dilation=(dilation, dilation),
        dimension_numbers=("NCHW", "OIHW", "NCHW"),
        preferred_element_type=jnp.float32)
    mean = jnp.mean(y, axis=(0, 2, 3), keepdims=True)
    var = jnp.mean((y - mean) ** 2, axis=(0, 2, 3), keepdims=True)
    yn = (y - mean) * jax.lax.rsqrt(var + eps)
    yn = yn * gamma.reshape(1, -1, 1, 1) + beta.reshape(1, -1, 1, 1)
    return jnp.maximum(yn, 0.0)


def _run_case(key, N, Cin, H, W, Cout, dilation, random_affine):
    kx, kw, kg, kb = jax.random.split(key, 4)
    x = jax.random.normal(kx, (N, Cin, H, W), dtype=jnp.float32)
    bound = 1.0 / (Cin * 9) ** 0.5                     # PyTorch-style conv init
    w = jax.random.uniform(kw, (Cout, Cin, 3, 3),
                           minval=-bound, maxval=bound, dtype=jnp.float32)
    if random_affine:
        gamma = jax.random.uniform(kg, (Cout,), minval=0.5, maxval=1.5,
                                   dtype=jnp.float32)
        beta = 0.1 * jax.random.normal(kb, (Cout,), dtype=jnp.float32)
    else:
        gamma = jnp.ones((Cout,), jnp.float32)
        beta = jnp.zeros((Cout,), jnp.float32)

    out = jax.block_until_ready(conv_bnr(x, w, gamma, beta, dilation=dilation))
    ref = _reference(x, w, gamma, beta, dilation=dilation)
    assert out.shape == (N, Cout, H, W), out.shape
    err = float(jnp.max(jnp.abs(out - ref)))
    assert err < 2e-3, f"max abs err {err}"


if __name__ == "__main__":
    key = jax.random.PRNGKey(0)
    k1, k2, k3, k4 = jax.random.split(key, 4)

    # primary small case matching the module spec defaults
    _run_case(k1, N=2, Cin=4, H=16, W=16, Cout=8, dilation=1, random_affine=False)
    # bigger tile (1024-row GEMM), different channel counts, random affine
    _run_case(k2, N=2, Cin=8, H=32, W=32, Cout=16, dilation=1, random_affine=True)
    # exercises dilation (padding = dilation = 2)
    _run_case(k3, N=2, Cin=4, H=16, W=16, Cout=8, dilation=2, random_affine=True)
    # awkward height: multiple row tiles, padded last tile (mask + Chan merge)
    _run_case(k4, N=2, Cin=4, H=34, W=34, Cout=8, dilation=1, random_affine=True)

    print("KERNEL_OK")
</pallas_src>

<mosaic_0001>
module attributes {stable_mosaic.version = 11 : i64} {
  func.func @_conv_stats_kernel(%arg0: i32, %arg1: i32, %arg2: memref<1x18x18x4xbf16, #tpu.memory_space<vmem>>, %arg3: memref<36x128xbf16, #tpu.memory_space<vmem>>, %arg4: memref<1x1x128xf32, #tpu.memory_space<vmem>>, %arg5: memref<1x1x128xf32, #tpu.memory_space<vmem>>, %arg6: memref<256x36xbf16, #tpu.memory_space<vmem>>) attributes {dimension_semantics = [#tpu.dimension_semantics<parallel>, #tpu.dimension_semantics<arbitrary>], iteration_bounds = array<i64: 2, 1>, scalar_prefetch = 0 : i64, scratch_operands = 1 : i64, tpu.core_type = #tpu.core_type<tc>, window_params = [{transform_indices = @transform_0, window_bounds = array<i64: 1, 18, 18, 4>}, {pipeline_mode = #tpu.pipeline_mode<synchronous>, transform_indices = @transform_1, window_bounds = array<i64: 36, 128>}, {transform_indices = @transform_2, window_bounds = array<i64: 1, 1, 128>}, {transform_indices = @transform_3, window_bounds = array<i64: 1, 1, 128>}]} {
    %c16_i32 = arith.constant 16 : i32
    %0 = arith.muli %arg1, %c16_i32 : i32
    %1 = tpu.assume_multiple %0, 16 : i32
    %c0_i32 = arith.constant 0 : i32
    %2 = arith.addi %1, %c0_i32 : i32
    %c0 = arith.constant 0 : index
    %3 = arith.index_cast %2 : i32 to index
    %c0_0 = arith.constant 0 : index
    %c0_1 = arith.constant 0 : index
    %4 = vector.load %arg2[%c0, %3, %c0_0, %c0_1] : memref<1x18x18x4xbf16, #tpu.memory_space<vmem>>, vector<1x16x16x4xbf16>
    %5 = vector.shape_cast %4 : vector<1x16x16x4xbf16> to vector<16x16x4xbf16>
    %6 = vector.shape_cast %5 : vector<16x16x4xbf16> to vector<256x4xbf16>
    %c0_2 = arith.constant 0 : index
    %c0_3 = arith.constant 0 : index
    %7 = vector.load %arg6[%c0_2, %c0_3] : memref<256x36xbf16, #tpu.memory_space<vmem>>, vector<256x4xbf16>
    tpu.vector_store %arg6[%c0_2, %c0_3], %6 {strides = array<i32>} : memref<256x36xbf16, #tpu.memory_space<vmem>>, vector<256x4xbf16>,
    %c0_i32_4 = arith.constant 0 : i32
    %8 = arith.addi %1, %c0_i32_4 : i32
    %c0_5 = arith.constant 0 : index
    %9 = arith.index_cast %8 : i32 to index
    %c1 = arith.constant 1 : index
    %c0_6 = arith.constant 0 : index
    %10 = vector.load %arg2[%c0_5, %9, %c1, %c0_6] : memref<1x18x18x4xbf16, #tpu.memory_space<vmem>>, vector<1x16x16x4xbf16>
    %11 = vector.shape_cast %10 : vector<1x16x16x4xbf16> to vector<16x16x4xbf16>
    %12 = vector.shape_cast %11 : vector<16x16x4xbf16> to vector<256x4xbf16>
    %c0_7 = arith.constant 0 : index
    %c4 = arith.constant 4 : index
    %13 = vector.load %arg6[%c0_7, %c4] : memref<256x36xbf16, #tpu.memory_space<vmem>>, vector<256x4xbf16>
    tpu.vector_store %arg6[%c0_7, %c4], %12 {strides = array<i32>} : memref<256x36xbf16, #tpu.memory_space<vmem>>, vector<256x4xbf16>,
    %c0_i32_8 = arith.constant 0 : i32
    %14 = arith.addi %1, %c0_i32_8 : i32
    %c0_9 = arith.constant 0 : index
    %15 = arith.index_cast %14 : i32 to index
    %c2 = arith.constant 2 : index
    %c0_10 = arith.constant 0 : index
    %16 = vector.load %arg2[%c0_9, %15, %c2, %c0_10] : memref<1x18x18x4xbf16, #tpu.memory_space<vmem>>, vector<1x16x16x4xbf16>
    %17 = vector.shape_cast %16 : vector<1x16x16x4xbf16> to vector<16x16x4xbf16>
    %18 = vector.shape_cast %17 : vector<16x16x4xbf16> to vector<256x4xbf16>
    %c0_11 = arith.constant 0 : index
    %c8 = arith.constant 8 : index
    %19 = vector.load %arg6[%c0_11, %c8] : memref<256x36xbf16, #tpu.memory_space<vmem>>, vector<256x4xbf16>
    tpu.vector_store %arg6[%c0_11, %c8], %18 {strides = array<i32>} : memref<256x36xbf16, #tpu.memory_space<vmem>>, vector<256x4xbf16>,
    %c1_i32 = arith.constant 1 : i32
    %20 = arith.addi %1, %c1_i32 : i32
    %c0_12 = arith.constant 0 : index
    %21 = arith.index_cast %20 : i32 to index
    %c0_13 = arith.constant 0 : index
    %c0_14 = arith.constant 0 : index
    %22 = vector.load %arg2[%c0_12, %21, %c0_13, %c0_14] : memref<1x18x18x4xbf16, #tpu.memory_space<vmem>>, vector<1x16x16x4xbf16>
    %23 = vector.shape_cast %22 : vector<1x16x16x4xbf16> to vector<16x16x4xbf16>
    %24 = vector.shape_cast %23 : vector<16x16x4xbf16> to vector<256x4xbf16>
    %c0_15 = arith.constant 0 : index
    %c12 = arith.constant 12 : index
    %25 = vector.load %arg6[%c0_15, %c12] : memref<256x36xbf16, #tpu.memory_space<vmem>>, vector<256x4xbf16>
    tpu.vector_store %arg6[%c0_15, %c12], %24 {strides = array<i32>} : memref<256x36xbf16, #tpu.memory_space<vmem>>, vector<256x4xbf16>,
    %c1_i32_16 = arith.constant 1 : i32
    %26 = arith.addi %1, %c1_i32_16 : i32
    %c0_17 = arith.constant 0 : index
    %27 = arith.index_cast %26 : i32 to index
    %c1_18 = arith.constant 1 : index
    %c0_19 = arith.constant 0 : index
    %28 = vector.load %arg2[%c0_17, %27, %c1_18, %c0_19] : memref<1x18x18x4xbf16, #tpu.memory_space<vmem>>, vector<1x16x16x4xbf16>
    %29 = vector.shape_cast %28 : vector<1x16x16x4xbf16> to vector<16x16x4xbf16>
    %30 = vector.shape_cast %29 : vector<16x16x4xbf16> to vector<256x4xbf16>
    %c0_20 = arith.constant 0 : index
    %c16 = arith.constant 16 : index
    %31 = vector.load %arg6[%c0_20, %c16] : memref<256x36xbf16, #tpu.memory_space<vmem>>, vector<256x4xbf16>
    tpu.vector_store %arg6[%c0_20, %c16], %30 {strides = array<i32>} : memref<256x36xbf16, #tpu.memory_space<vmem>>, vector<256x4xbf16>,
    %c1_i32_21 = arith.constant 1 : i32
    %32 = arith.addi %1, %c1_i32_21 : i32
    %c0_22 = arith.constant 0 : index
    %33 = arith.index_cast %32 : i32 to index
    %c2_23 = arith.constant 2 : index
    %c0_24 = arith.constant 0 : index
    %34 = vector.load %arg2[%c0_22, %33, %c2_23, %c0_24] : memref<1x18x18x4xbf16, #tpu.memory_space<vmem>>, vector<1x16x16x4xbf16>
    %35 = vector.shape_cast %34 : vector<1x16x16x4xbf16> to vector<16x16x4xbf16>
    %36 = vector.shape_cast %35 : vector<16x16x4xbf16> to vector<256x4xbf16>
    %c0_25 = arith.constant 0 : index
    %c20 = arith.constant 20 : index
    %37 = vector.load %arg6[%c0_25, %c20] : memref<256x36xbf16, #tpu.memory_space<vmem>>, vector<256x4xbf16>
    tpu.vector_store %arg6[%c0_25, %c20], %36 {strides = array<i32>} : memref<256x36xbf16, #tpu.memory_space<vmem>>, vector<256x4xbf16>,
    %c2_i32 = arith.constant 2 : i32
    %38 = arith.addi %1, %c2_i32 : i32
    %c0_26 = arith.constant 0 : index
    %39 = arith.index_cast %38 : i32 to index
    %c0_27 = arith.constant 0 : index
    %c0_28 = arith.constant 0 : index
    %40 = vector.load %arg2[%c0_26, %39, %c0_27, %c0_28] : memref<1x18x18x4xbf16, #tpu.memory_space<vmem>>, vector<1x16x16x4xbf16>
    %41 = vector.shape_cast %40 : vector<1x16x16x4xbf16> to vector<16x16x4xbf16>
    %42 = vector.shape_cast %41 : vector<16x16x4xbf16> to vector<256x4xbf16>
    %c0_29 = arith.constant 0 : index
    %c24 = arith.constant 24 : index
    %43 = vector.load %arg6[%c0_29, %c24] : memref<256x36xbf16, #tpu.memory_space<vmem>>, vector<256x4xbf16>
    tpu.vector_store %arg6[%c0_29, %c24], %42 {strides = array<i32>} : memref<256x36xbf16, #tpu.memory_space<vmem>>, vector<256x4xbf16>,
    %c2_i32_30 = arith.constant 2 : i32
    %44 = arith.addi %1, %c2_i32_30 : i32
    %c0_31 = arith.constant 0 : index
    %45 = arith.index_cast %44 : i32 to index
    %c1_32 = arith.constant 1 : index
    %c0_33 = arith.constant 0 : index
    %46 = vector.load %arg2[%c0_31, %45, %c1_32, %c0_33] : memref<1x18x18x4xbf16, #tpu.memory_space<vmem>>, vector<1x16x16x4xbf16>
    %47 = vector.shape_cast %46 : vector<1x16x16x4xbf16> to vector<16x16x4xbf16>
    %48 = vector.shape_cast %47 : vector<16x16x4xbf16> to vector<256x4xbf16>
    %c0_34 = arith.constant 0 : index
    %c28 = arith.constant 28 : index
    %49 = vector.load %arg6[%c0_34, %c28] : memref<256x36xbf16, #tpu.memory_space<vmem>>, vector<256x4xbf16>
    tpu.vector_store %arg6[%c0_34, %c28], %48 {strides = array<i32>} : memref<256x36xbf16, #tpu.memory_space<vmem>>, vector<256x4xbf16>,
    %c2_i32_35 = arith.constant 2 : i32
    %50 = arith.addi %1, %c2_i32_35 : i32
    %c0_36 = arith.constant 0 : index
    %51 = arith.index_cast %50 : i32 to index
    %c2_37 = arith.constant 2 : index
    %c0_38 = arith.constant 0 : index
    %52 = vector.load %arg2[%c0_36, %51, %c2_37, %c0_38] : memref<1x18x18x4xbf16, #tpu.memory_space<vmem>>, vector<1x16x16x4xbf16>
    %53 = vector.shape_cast %52 : vector<1x16x16x4xbf16> to vector<16x16x4xbf16>
    %54 = vector.shape_cast %53 : vector<16x16x4xbf16> to vector<256x4xbf16>
    %c0_39 = arith.constant 0 : index
    %c32 = arith.constant 32 : index
    %55 = vector.load %arg6[%c0_39, %c32] : memref<256x36xbf16, #tpu.memory_space<vmem>>, vector<256x4xbf16>
    tpu.vector_store %arg6[%c0_39, %c32], %54 {strides = array<i32>} : memref<256x36xbf16, #tpu.memory_space<vmem>>, vector<256x4xbf16>,
    %c0_40 = arith.constant 0 : index
    %c0_41 = arith.constant 0 : index
    %56 = vector.load %arg6[%c0_40, %c0_41] : memref<256x36xbf16, #tpu.memory_space<vmem>>, vector<256x36xbf16>
    %c0_42 = arith.constant 0 : index
    %c0_43 = arith.constant 0 : index
    %57 = vector.load %arg3[%c0_42, %c0_43] : memref<36x128xbf16, #tpu.memory_space<vmem>>, vector<36x128xbf16>
    %cst = arith.constant dense<0.000000e+00> : vector<256x128xf32>
    %58 = tpu.matmul %56, %57, %cst {dimension_numbers = #tpu.dot_dimension_numbers<[1], [0], [0], [1], [0, 0, 1, 1], [], []>} : vector<256x36xbf16>, vector<36x128xbf16>, vector<256x128xf32> -> vector<256x128xf32>
    %c16_i32_44 = arith.constant 16 : i32
    %59 = arith.muli %arg1, %c16_i32_44 : i32
    %c16_i32_45 = arith.constant 16 : i32
    %60 = arith.subi %c16_i32_45, %59 : i32
    %c16_i32_46 = arith.constant 16 : i32
    %61 = arith.minsi %c16_i32_46, %60 : i32
    %c16_i32_47 = arith.constant 16 : i32
    %62 = arith.muli %61, %c16_i32_47 : i32
    %63 = arith.sitofp %62 : i32 to f32
    %64 = tpu.iota {dimensions = array<i32: 0>} : vector<256x1xi32>
    %65 = vector.broadcast %62 : i32 to vector<256x1xi32>
    %66 = arith.cmpi slt, %64, %65 : vector<256x1xi32>
    %67 = arith.extui %66 : vector<256x1xi1> to vector<256x1xi32>
    %68 = arith.sitofp %67 : vector<256x1xi32> to vector<256x1xf32>
    %69 = vector.broadcast %68 : vector<256x1xf32> to vector<256x128xf32>
    %70 = arith.mulf %58, %69 : vector<256x128xf32>
    %cst_48 = arith.constant dense<0.000000e+00> : vector<128xf32>
    %71 = vector.multi_reduction <add>, %70, %cst_48 [0] : vector<256x128xf32> to vector<128xf32>
    %72 = vector.shape_cast %71 : vector<128xf32> to vector<1x128xf32>
    %73 = vector.broadcast %63 : f32 to vector<1x128xf32>
    %74 = arith.divf %72, %73 : vector<1x128xf32>
    %75 = vector.broadcast %74 : vector<1x128xf32> to vector<256x128xf32>
    %76 = arith.subf %58, %75 : vector<256x128xf32>
    %77 = vector.broadcast %68 : vector<256x1xf32> to vector<256x128xf32>
    %78 = arith.mulf %76, %77 : vector<256x128xf32>
    %79 = arith.mulf %78, %78 : vector<256x128xf32>
    %cst_49 = arith.constant dense<0.000000e+00> : vector<128xf32>
    %80 = vector.multi_reduction <add>, %79, %cst_49 [0] : vector<256x128xf32> to vector<128xf32>
    %81 = vector.shape_cast %80 : vector<128xf32> to vector<1x128xf32>
    %c0_i32_50 = arith.constant 0 : i32
    %82 = arith.cmpi eq, %arg1, %c0_i32_50 : i32
    %83 = arith.extui %82 : i1 to i32
    %c0_i32_51 = arith.constant 0 : i32
    %84 = arith.cmpi ne, %83, %c0_i32_51 : i32
    scf.if %84 {
      %c0_54 = arith.constant 0 : index
      %c0_55 = arith.constant 0 : index
      %c0_56 = arith.constant 0 : index
      %88 = vector.load %arg4[%c0_54, %c0_55, %c0_56] : memref<1x1x128xf32, #tpu.memory_space<vmem>>, vector<1x1x128xf32>
      %89 = vector.shape_cast %88 : vector<1x1x128xf32> to vector<1x128xf32>
      %90 = vector.shape_cast %74 : vector<1x128xf32> to vector<1x1x128xf32>
      tpu.vector_store %arg4[%c0_54, %c0_55, %c0_56], %90 {strides = array<i32>} : memref<1x1x128xf32, #tpu.memory_space<vmem>>, vector<1x1x128xf32>,
      %c0_57 = arith.constant 0 : index
      %c0_58 = arith.constant 0 : index
      %c0_59 = arith.constant 0 : index
      %91 = vector.load %arg5[%c0_57, %c0_58, %c0_59] : memref<1x1x128xf32, #tpu.memory_space<vmem>>, vector<1x1x128xf32>
      %92 = vector.shape_cast %91 : vector<1x1x128xf32> to vector<1x128xf32>
      %93 = vector.shape_cast %81 : vector<1x128xf32> to vector<1x1x128xf32>
      tpu.vector_store %arg5[%c0_57, %c0_58, %c0_59], %93 {strides = array<i32>} : memref<1x1x128xf32, #tpu.memory_space<vmem>>, vector<1x1x128xf32>,
    } else {
    }
    %c0_i32_52 = arith.constant 0 : i32
    %85 = arith.cmpi sgt, %arg1, %c0_i32_52 : i32
    %86 = arith.extui %85 : i1 to i32
    %c0_i32_53 = arith.constant 0 : i32
    %87 = arith.cmpi ne, %86, %c0_i32_53 : i32
    scf.if %87 {
      %c256_i32 = arith.constant 256 : i32
      %88 = arith.muli %arg1, %c256_i32 : i32
      %89 = arith.sitofp %88 : i32 to f32
      %90 = arith.addf %89, %63 : f32
      %c0_54 = arith.constant 0 : index
      %c0_55 = arith.constant 0 : index
      %c0_56 = arith.constant 0 : index
      %91 = vector.load %arg4[%c0_54, %c0_55, %c0_56] : memref<1x1x128xf32, #tpu.memory_space<vmem>>, vector<1x1x128xf32>
      %92 = vector.shape_cast %91 : vector<1x1x128xf32> to vector<1x128xf32>
      %93 = arith.subf %74, %92 : vector<1x128xf32>
      %c0_57 = arith.constant 0 : index
      %c0_58 = arith.constant 0 : index
      %c0_59 = arith.constant 0 : index
      %94 = vector.load %arg4[%c0_57, %c0_58, %c0_59] : memref<1x1x128xf32, #tpu.memory_space<vmem>>, vector<1x1x128xf32>
      %95 = vector.shape_cast %94 : vector<1x1x128xf32> to vector<1x128xf32>
      %96 = arith.divf %63, %90 : f32
      %97 = vector.broadcast %96 : f32 to vector<1x128xf32>
      %98 = arith.mulf %93, %97 : vector<1x128xf32>
      %99 = arith.addf %95, %98 : vector<1x128xf32>
      %c0_60 = arith.constant 0 : index
      %c0_61 = arith.constant 0 : index
      %c0_62 = arith.constant 0 : index
      %100 = vector.load %arg4[%c0_60, %c0_61, %c0_62] : memref<1x1x128xf32, #tpu.memory_space<vmem>>, vector<1x1x128xf32>
      %101 = vector.shape_cast %100 : vector<1x1x128xf32> to vector<1x128xf32>
      %102 = vector.shape_cast %99 : vector<1x128xf32> to vector<1x1x128xf32>
      tpu.vector_store %arg4[%c0_60, %c0_61, %c0_62], %102 {strides = array<i32>} : memref<1x1x128xf32, #tpu.memory_space<vmem>>, vector<1x1x128xf32>,
      %c0_63 = arith.constant 0 : index
      %c0_64 = arith.constant 0 : index
      %c0_65 = arith.constant 0 : index
      %103 = vector.load %arg5[%c0_63, %c0_64, %c0_65] : memref<1x1x128xf32, #tpu.memory_space<vmem>>, vector<1x1x128xf32>
      %104 = vector.shape_cast %103 : vector<1x1x128xf32> to vector<1x128xf32>
      %105 = arith.addf %104, %81 : vector<1x128xf32>
      %106 = arith.mulf %93, %93 : vector<1x128xf32>
      %107 = arith.mulf %89, %63 : f32
      %108 = arith.divf %107, %90 : f32
      %109 = vector.broadcast %108 : f32 to vector<1x128xf32>
      %110 = arith.mulf %106, %109 : vector<1x128xf32>
      %111 = arith.addf %105, %110 : vector<1x128xf32>
      %c0_66 = arith.constant 0 : index
      %c0_67 = arith.constant 0 : index
      %c0_68 = arith.constant 0 : index
      %112 = vector.load %arg5[%c0_66, %c0_67, %c0_68] : memref<1x1x128xf32, #tpu.memory_space<vmem>>, vector<1x1x128xf32>
      %113 = vector.shape_cast %112 : vector<1x1x128xf32> to vector<1x128xf32>
      %114 = vector.shape_cast %111 : vector<1x128xf32> to vector<1x1x128xf32>
      tpu.vector_store %arg5[%c0_66, %c0_67, %c0_68], %114 {strides = array<i32>} : memref<1x1x128xf32, #tpu.memory_space<vmem>>, vector<1x1x128xf32>,
    } else {
    }
    return
  }
  func.func @transform_0(%arg0: i32, %arg1: i32) -> (i32, i32, i32, i32) {
    %c0_i32 = arith.constant 0 : i32
    %c0_i32_0 = arith.constant 0 : i32
    %c0_i32_1 = arith.constant 0 : i32
    %c0_i32_2 = arith.constant 0 : i32
    return %arg0, %c0_i32, %c0_i32_0, %c0_i32_1 : i32, i32, i32, i32
  }
  func.func @transform_1(%arg0: i32, %arg1: i32) -> (i32, i32) {
    %c0_i32 = arith.constant 0 : i32
    %c0_i32_0 = arith.constant 0 : i32
    %c0_i32_1 = arith.constant 0 : i32
    return %c0_i32, %c0_i32_0 : i32, i32
  }
  func.func @transform_2(%arg0: i32, %arg1: i32) -> (i32, i32, i32) {
    %c0_i32 = arith.constant 0 : i32
    %c0_i32_0 = arith.constant 0 : i32
    %c0_i32_1 = arith.constant 0 : i32
    return %arg0, %c0_i32, %c0_i32_0 : i32, i32, i32
  }
  func.func @transform_3(%arg0: i32, %arg1: i32) -> (i32, i32, i32) {
    %c0_i32 = arith.constant 0 : i32
    %c0_i32_0 = arith.constant 0 : i32
    %c0_i32_1 = arith.constant 0 : i32
    return %arg0, %c0_i32, %c0_i32_0 : i32, i32, i32
  }
}

</mosaic_0001>

<bundles_post_ra>
// kernel: tpu_custom_call.1
= control target key start
LH: loop header
LB: loop body
LE: loop exit
PB: predicated region body
PF: predicated region fallthrough
CT: control target
= control target key end

     0   :  { %9 = vsyncpa [#allocation4], 0  ;;  %s6224_s0 = inlined_call_operand.vmem [shape: bf16[2,18,18,4], index: 0, kind: input, shape index: {}]   ;;  %s6225_s1 = inlined_call_operand.vmem [shape: bf16[36,128], index: 1, kind: input, shape index: {}]   ;;  %s6226_s2 = inlined_call_operand.hbm [shape: f32[2,1,128], index: 2, kind: output, shape index: {0}]   ;;  %s6227_s3 = inlined_call_operand.hbm [shape: f32[2,1,128], index: 3, kind: output, shape index: {1}]  }
   0x1   :  { %11 = vsyncpa [#allocation4 + $0x1], 0 }
   0x2   :  { %12 = vsyncpa [#allocation6], 0 }
   0x3   :  { %14 = vsyncpa [#allocation6 + $0x1], 0  ;;  %s4866_s12 = smov 0   ;;  %s4868_s13 = smov 0  }
   0x4   :  { %s4870_s14 = smov 0   ;;  %s4872_s15 = smov 0  }
   0x5   :  { %s4874_s16 = smov 0   ;;  %s4876_s17 = smov 0  }
   0x6 LB: > { %s4062_s18 = sadd.s32 4294967295, %s4834_s17   ;;  %s4063_s19 = sadd.s32 4294967294, %s4834_s17   ;;  %s4834_s17 = sphi %s4876_s17, %s20_s17   ;;  %s4830_s16 = sphi %s4874_s16, %s6238_s16   ;;  %s4826_s15 = sphi %s4872_s15, %s6237_s15   ;;  %s4822_s14 = sphi %s4870_s14, %s6236_s14   ;;  %s4818_s13 = sphi %s4868_s13, %s6235_s13   ;;  %s4814_s12 = sphi %s4866_s12, %s6234_s12  }
   0x7   : > { %s32_s20 = sadd.s32 1, %s4830_s16  ;;  %s86_s21 = sadd.s32 1, %s4822_s14 }
   0x8   : > { %p34_p0 = scmp.ge.s32.totalorder %s32_s20, 2  ;;  %p96_p1 = scmp.ne.s32.totalorder %s4822_s14, %s4818_s13 }
   0x9   : > { %p97_p2 = scmp.eq.s32.totalorder %s4062_s18, 1  ;;  %p102_p3 = scmp.ne.s32.totalorder %s4818_s13, %s4814_s12 }
   0xa   : > { %s6240_s20 = smov (%p34_p0, %s32_s20), 0  ;;  %p103_p5 = scmp.eq.s32.totalorder %s4063_s19, 1 }
   0xb   : > { %p4906_p4 = por %p97_p2, %p96_p1  ;;  %s83_s23 = ssub.s32 %s4830_s16, %s6240_s20 }
   0xc   : > { %p4066_p6 = scmp.ge.s32.totalorder %s4834_s17, 1  ;;  %p84_p7 = scmp.eq.s32.totalorder %s83_s23, 0 }
   0xd   : > { %p4913_p8 = por %p103_p5, %p102_p3  ;;  %p158_p9 = scmp.lt.s32.totalorder %s4834_s17, 3 }
   0xe   : > { %s4919_s25 = scalar_select %p84_p7, %s4822_s14, %s86_s21  }
   0xf   : > { %p159_p10 = pnand %p4066_p6, %p158_p9 }
  0x10   : > { %p185_p11 = scmp.lt.s32.totalorder (!%p159_p10), %s4826_s15, 1  ;;  %vm984_vm0 = vcmask (!%p159_p10), 1042432   ;;  %vm985_vm1 = vcmask (!%p159_p10), 1046532   ;;  %s4836_s4 = smov (!%p159_p10), 12   ;;  %vm388_vm3 = vsmask.f32 (!%p159_p10), 3328 }
  0x11   : > { %162 = sbr.rel (%p159_p10) target bundleno = 795 (0x31b), region = 28  ;;  %vm4928_vm2 = vmor (!%p159_p10), %vm984_vm0, %vm985_vm1  ;;  %vm389_vm4 = vsmask.f32 (!%p159_p10), 7440  ;;  %s4837_s5 = smov (!%p159_p10), 20   ;;  %vm323_vm6 = vcmask (!%p159_p10), 31744   ;;  %vm871_vm7 = vcmask (!%p159_p10), 64544  }
  0x12   : > { %s4838_s6 = smov (!%p159_p10), 8   ;;  %vm4969_vm5 = vmor (!%p159_p10), %vm388_vm3, %vm389_vm4  ;;  %s4839_s7 = smov (!%p159_p10), 4   ;;  %vm1195_vm8 = vcmask (!%p159_p10), 97344   ;;  %vm1376_vm9 = vcmask (!%p159_p10), 130144   ;;  %vm1921_vm10 = vcmask (!%p159_p10), 162944   ;;  %vm2242_vm11 = vcmask (!%p159_p10), 195744  }
  0x13   : > { %s4840_s8 = smov (!%p159_p10), 16   ;;  %s4841_s9 = smov (!%p159_p10), 24   ;;  %vm2423_vm12 = vcmask (!%p159_p10), 228544   ;;  %vm2968_vm13 = vcmask (!%p159_p10), 261344   ;;  %vm3289_vm14 = vcmask (!%p159_p10), 294144   ;;  %vm3391_vm15 = vcmask (!%p159_p10), 1041408  }
  0x14   : > { %s4842_s10 = smov (!%p159_p10), 28   ;;  %s4843_s11 = smov (!%p159_p10), 32   ;;  %vm3342_vm0 = vcmask (!%p159_p10), 293888  }
  0x15   : > { %s6095_s28 = sand.u32 (!%p159_p10), 1, %s4818_s13   ;;  %s4535_s29 = sshll.u32 (!%p159_p10), %s4826_s15, 4 }
  0x18   : > { %s186_s26 = scalar_select %p185_p11, %s4826_s15, 1 }
  0x1a   : > { %s4604_s27 = smul.u32 216, %s186_s26 }
  0x1c   : > { %s4926_s30 = scalar_lea.vmem %s6224_s0, %s4604_s27 }
  0x1d   : > { %v4673_v1 = vld [vmem:[%s4926_s30 + $0x18] sm:$0xff]   ;;  %v4674_v2 = vld [vmem:[%s4926_s30 + $0xc] sm:$0xff]   ;;  %v4246_v5 = vld [vmem:[%s4926_s30 + $0x14] sm:$0x1] }
  0x1e   : > { %1330 = vrot.lane.b32.xlu1 %v4673_v1, %s4836_s4  ;;  %v4244_v3 = vld [vmem:[%s4926_s30 + $0xc] sm:$0xe]  ;;  %v4245_v4 = vld [vmem:[%s4926_s30 + $0x10] sm:$0xf]  ;;  %1328 = vrot.lane.b32.xlu0 %v4674_v2, %s4836_s4  ;;  %v2039_v8 = vrot.slane %v4246_v5, 5 }
  0x1f   : > { %v4292_v6 = vrot.slane %v4244_v3, 9  ;;  %v2036_v7 = vrot.slane %v4245_v4, 5  ;;  %v888_v9 = vld [vmem:[%s4926_s30] sm:$0xe]  ;;  %v889_v10 = vld [vmem:[%s4926_s30 + $0x4] sm:$0xf] }
  0x20   : > { %v890_v11 = vld [vmem:[%s4926_s30 + $0x8] sm:$0x1]  ;;  %v4100_v12 = vrot.slane %v888_v9, 9  ;;  %v989_v15 = vrot.slane %v889_v10, 5  ;;  %v891_v17 = vld [vmem:[%s4926_s30 + $0xc] sm:$0xe] }
  0x21   : > { %v2037_v13 = vsel %vm4928_vm2, %v4292_v6, %v2036_v7  ;;  %v2038_v14 = vrot.slane %v2036_v7, 4  ;;  %v992_v16 = vrot.slane %v890_v11, 5  ;;  %v892_v18 = vld [vmem:[%s4926_s30 + $0x10] sm:$0xf]  ;;  %v893_v19 = vld [vmem:[%s4926_s30 + $0x14] sm:$0x1] }
  0x22   : > { %v4101_v20 = vrot.slane %v891_v17, 9  ;;  %v990_v22 = vsel %vm4928_vm2, %v4100_v12, %v989_v15  ;;  %v991_v23 = vrot.slane %v989_v15, 4  ;;  %v996_v24 = vrot.slane %v892_v18, 5  ;;  %v340_v25 = vld [vmem:[%s4926_s30] sm:$0xf] }
  0x23   : > { %v2040_v21 = vsel %vm4928_vm2, %v2038_v14, %v2039_v8  ;;  %v341_v26 = vld [vmem:[%s4926_s30 + $0x4] sm:$0xf]  ;;  %v999_v28 = vrot.slane %v893_v19, 5  ;;  %v342_v29 = vld [vmem:[%s4926_s30 + $0x8] sm:$0x1]  ;;  %v392_v30 = vshrl.u32 %v340_v25, 16 }
  0x24   : > { %v4308_v27 = vcombine.low %v2037_v13, %v2040_v21  ;;  %v395_v31 = vshll.u32 %v340_v25, 16  ;;  %v993_v32 = vsel %vm4928_vm2, %v991_v23, %v992_v16  ;;  %v997_v33 = vsel %vm4928_vm2, %v4101_v20, %v996_v24  ;;  %v4247_v36 = vld [vmem:[%s4926_s30 + $0x18] sm:$0xe]  ;;  %v4248_v37 = vld [vmem:[%s4926_s30 + $0x1c] sm:$0xf] }
  0x25   : > { %v998_v34 = vrot.slane %v996_v24, 4  ;;  %v401_v35 = vshll.u32 %v341_v26, 16  ;;  %v4116_v38 = vcombine.low %v990_v22, %v993_v32  ;;  %v394_v39 = vrot.slane %v392_v30, 4  ;;  %v4249_v42 = vld [vmem:[%s4926_s30 + $0x20] sm:$0x1] }
  0x26   : > { %2194 = vrot.lane.b32.xlu0 %v4308_v27, %s4837_s5  ;;  %v397_v40 = vrot.slane %v395_v31, 5  ;;  %v405_v41 = vshrl.u32 %v341_v26, 16  ;;  %v411_v45 = vshll.u32 %v342_v29, 16  ;;  %v4293_v46 = vrot.slane %v4247_v36, 9  ;;  %v343_v47 = vld [vmem:[%s4926_s30 + $0xc] sm:$0xf] }
  0x27   : > { %v1000_v43 = vsel %vm4928_vm2, %v998_v34, %v999_v28  ;;  %v403_v44 = vrot.slane %v401_v35, 5  ;;  %1147 = vrot.lane.b32.xlu1 %v4116_v38, %s4838_s6  ;;  %v2043_v51 = vrot.slane %v4248_v37, 5  ;;  %v344_v52 = vld [vmem:[%s4926_s30 + $0x10] sm:$0xf]  ;;  %v2046_v55 = vrot.slane %v4249_v42, 5 }
  0x28   : > { %v4117_v48 = vcombine.low %v997_v33, %v1000_v43  ;;  %v398_v49 = vor.u32 %v397_v40, %v394_v39  ;;  %v407_v50 = vrot.slane %v405_v41, 4  ;;  %v413_v54 = vrot.slane %v411_v45, 5  ;;  %v345_v56 = vld [vmem:[%s4926_s30 + $0x14] sm:$0x1]  ;;  %v4183_v63 = vld [vmem:[%s4926_s30 + $0x18] sm:$0xf] }
  0x29   : > { %v416_v57 = vshrl.u32 %v343_v47, 16  ;;  %v419_v58 = vshll.u32 %v343_v47, 16  ;;  %v2044_v61 = vsel %vm4928_vm2, %v4293_v46, %v2043_v51  ;;  %v2045_v62 = vrot.slane %v2043_v51, 4  ;;  %v4184_v5 = vld [vmem:[%s4926_s30 + $0x1c] sm:$0xf] }
  0x2a   : > { %v399_v59 = vrot.slane %v398_v49, 4  ;;  %v408_v60 = vor.u32 %v407_v50, %v403_v44  ;;  %v425_v3 = vshll.u32 %v344_v52, 16  ;;  %v429_v4 = vshrl.u32 %v344_v52, 16  ;;  %v4185_v10 = vld [vmem:[%s4926_s30 + $0x20] sm:$0x1] }
  0x2b   : > { %v418_v1 = vrot.slane %v416_v57, 4  ;;  %v421_v2 = vrot.slane %v419_v58, 5  ;;  %1149 = vrot.lane.b32.xlu1 %v4117_v48, %s4838_s6  ;;  %v2047_v8 = vsel %vm4928_vm2, %v2045_v62, %v2046_v55  ;;  %v435_v9 = vshll.u32 %v345_v56, 16  ;;  %v4180_v11 = vld [vmem:[%s4926_s30 + $0xc] sm:$0xf] }
  0x2c   : > { %v404_v6 = vsel %vm4969_vm5, %v399_v59, %v403_v44  ;;  %v409_v7 = vrot.slane %v408_v60, 4  ;;  %v4309_v12 = vcombine.low %v2044_v61, %v2047_v8  ;;  %v427_v14 = vrot.slane %v425_v3, 5  ;;  %v4181_v28 = vld [vmem:[%s4926_s30 + $0x10] sm:$0xf]  ;;  %v4182_v32 = vld [vmem:[%s4926_s30 + $0x14] sm:$0x1] }
  0x2d   : > { %v422_v13 = vor.u32 %v421_v2, %v418_v1  ;;  %v431_v15 = vrot.slane %v429_v4, 4  ;;  %v437_v17 = vrot.slane %v435_v9, 5  ;;  %v1466_v18 = vshrl.u32 %v4183_v63, 16  ;;  %v4372_v38 = vld [vmem:[%s4926_s30 + $0x18] sm:$0xf] }
  0x2e   : > { %v414_v16 = vsel %vm4969_vm5, %v409_v7, %v413_v54  ;;  %v1469_v19 = vshll.u32 %v4183_v63, 16  ;;  %v1475_v23 = vshll.u32 %v4184_v5, 16  ;;  %v1479_v26 = vshrl.u32 %v4184_v5, 16  ;;  %v4373_v47 = vld [vmem:[%s4926_s30 + $0x1c] sm:$0xf] }
  0x2f   : > { %v4084_v20 = vcombine.low %v404_v6, %v414_v16  ;;  %v423_v21 = vrot.slane %v422_v13, 4  ;;  %v432_v22 = vor.u32 %v431_v15, %v427_v14  ;;  %2196 = vrot.lane.b32.xlu1 %v4309_v12, %s4837_s5  ;;  %v1468_v24 = vrot.slane %v1466_v18, 4  ;;  %v4374_v56 = vld [vmem:[%s4926_s30 + $0x20] sm:$0x1]  ;;  %v4375_v62 = vld [vmem:[%s4926_s30 + $0x24] sm:$0xf] }
  0x30   : > { %v1471_v25 = vrot.slane %v1469_v19, 5  ;;  %v1485_v27 = vshll.u32 %v4185_v10, 16  ;;  %v1477_v31 = vrot.slane %v1475_v23, 5  ;;  %v1442_v33 = vshrl.u32 %v4180_v11, 16  ;;  %v4376_v4 = vld [vmem:[%s4926_s30 + $0x28] sm:$0xf] }
  0x31   : > { %823 = vrot.lane.b32.xlu0 %v4084_v20, %s4839_s7  ;;  %v428_v29 = vsel %vm4969_vm5, %v423_v21, %v427_v14  ;;  %v433_v30 = vrot.slane %v432_v22, 4  ;;  %v1481_v35 = vrot.slane %v1479_v26, 4  ;;  %v1445_v37 = vshll.u32 %v4180_v11, 16  ;;  %v4377_v12 = vld [vmem:[%s4926_s30 + $0x2c] sm:$0x1]  ;;  %v4676_v16 = vld [vmem:[%s4926_s30 + $0x24] sm:$0xff]  }
  0x32   : > { %v1472_v34 = vor.u32 %v1471_v25, %v1468_v24  ;;  %v1487_v36 = vrot.slane %v1485_v27, 5  ;;  %v1444_v40 = vrot.slane %v1442_v33, 4  ;;  %v1451_v41 = vshll.u32 %v4181_v28, 16  ;;  %v4436_v14 = vld [vmem:[%s4926_s30 + $0x18] sm:$0xe] }
  0x33   : > { %v438_v39 = vsel %vm4969_vm5, %v433_v30, %v437_v17  ;;  %v1455_v42 = vshrl.u32 %v4181_v28, 16  ;;  %v1482_v45 = vor.u32 %v1481_v35, %v1477_v31  ;;  %v1447_v46 = vrot.slane %v1445_v37, 5  ;;  %v4437_v20 = vld [vmem:[%s4926_s30 + $0x1c] sm:$0xf]  ;;  %v4438_v25 = vld [vmem:[%s4926_s30 + $0x20] sm:$0x1] }
  0x34   : > { %v4085_v43 = vcombine.low %v428_v29, %v438_v39  ;;  %v1473_v44 = vrot.slane %v1472_v34, 4  ;;  %v1453_v48 = vrot.slane %v1451_v41, 5  ;;  %v1461_v50 = vshll.u32 %v4182_v32, 16  ;;  %v346_v30 = vld [vmem:[%s4926_s30 + $0x18] sm:$0xf] }
  0x35   : > { %v1457_v49 = vrot.slane %v1455_v42, 4  ;;  %v2489_v51 = vshrl.u32 %v4372_v38, 16  ;;  %v1483_v54 = vrot.slane %v1482_v45, 4  ;;  %v1448_v55 = vor.u32 %v1447_v46, %v1444_v40  ;;  %v348_v41 = vld [vmem:[%s4926_s30 + $0x20] sm:$0x1] }
  0x36   : > { %825 = vrot.lane.b32.xlu0 %v4085_v43, %s4839_s7  ;;  %v1478_v52 = vsel %vm4969_vm5, %v1473_v44, %v1477_v31  ;;  %v2492_v57 = vshll.u32 %v4372_v38, 16  ;;  %v1463_v59 = vrot.slane %v1461_v50, 5  ;;  %v2498_v61 = vshll.u32 %v4373_v47, 16  ;;  %v4675_v31 = vld [vmem:[%s4926_s30 + $0x18] sm:$0xff]   ;;  %v4439_v42 = vld [vmem:[%s4926_s30 + $0x24] sm:$0xe] }
  0x37   : > { %v1458_v58 = vor.u32 %v1457_v49, %v1453_v48  ;;  %v2491_v60 = vrot.slane %v2489_v51, 4  ;;  %v1488_v63 = vsel %vm4969_vm5, %v1483_v54, %v1487_v36  ;;  %v1449_v1 = vrot.slane %v1448_v55, 4  ;;  %v347_v36 = vld [vmem:[%s4926_s30 + $0x1c] sm:$0xf]  ;;  %v349_v54 = vld [vmem:[%s4926_s30 + $0x24] sm:$0xf] }
  0x38   : > { %v2494_v2 = vrot.slane %v2492_v57, 5  ;;  %v2502_v3 = vshrl.u32 %v4373_v47, 16  ;;  %v4229_v5 = vcombine.low %v1478_v52, %v1488_v63  ;;  %v2500_v7 = vrot.slane %v2498_v61, 5  ;;  %v4440_v47 = vld [vmem:[%s4926_s30 + $0x28] sm:$0xf] }
  0x39   : > { %v1459_v6 = vrot.slane %v1458_v58, 4  ;;  %v2508_v8 = vshll.u32 %v4374_v56, 16  ;;  %v1454_v9 = vsel %vm4969_vm5, %v1449_v1, %v1453_v48  ;;  %v2513_v13 = vshrl.u32 %v4375_v62, 16  ;;  %v4441_v48 = vld [vmem:[%s4926_s30 + $0x2c] sm:$0x1] }
  0x3a   : > { %v2495_v10 = vor.u32 %v2494_v2, %v2491_v60  ;;  %v2504_v11 = vrot.slane %v2502_v3, 4  ;;  %1875 = vrot.lane.b32.xlu1 %v4229_v5, %s4840_s8  ;;  %v2516_v18 = vshll.u32 %v4375_v62, 16  ;;  %v2522_v19 = vshll.u32 %v4376_v4, 16 }
  0x3b   : > { %v1464_v15 = vsel %vm4969_vm5, %v1459_v6, %v1463_v59  ;;  %v2510_v17 = vrot.slane %v2508_v8, 5  ;;  %v2515_v24 = vrot.slane %v2513_v13, 4  ;;  %v2526_v28 = vshrl.u32 %v4376_v4, 16  ;;  %v350_v8 = vld [vmem:[%s4926_s30 + $0x28] sm:$0xf] }
  0x3c   : > { %v4228_v21 = vcombine.low %v1454_v9, %v1464_v15  ;;  %v2496_v22 = vrot.slane %v2495_v10, 4  ;;  %v2505_v23 = vor.u32 %v2504_v11, %v2500_v7  ;;  %v2518_v26 = vrot.slane %v2516_v18, 5 }
  0x3d   : > { %v2524_v27 = vrot.slane %v2522_v19, 5  ;;  %v2532_v29 = vshll.u32 %v4377_v12, 16  ;;  %v4484_v34 = vrot.slane %v4436_v14, 9  ;;  %v3083_v35 = vrot.slane %v4437_v20, 5  ;;  %v351_v12 = vld [vmem:[%s4926_s30 + $0x2c] sm:$0x1] }
  0x3e   : > { %1873 = vrot.lane.b32.xlu0 %v4228_v21, %s4840_s8  ;;  %v2501_v32 = vsel %vm4969_vm5, %v2496_v22, %v2500_v7  ;;  %v2506_v33 = vrot.slane %v2505_v23, 4  ;;  %2377 = vrot.lane.b32.xlu1 %v4676_v16, %s4841_s9  ;;  %v2519_v37 = vor.u32 %v2518_v26, %v2515_v24  ;;  %v2528_v38 = vrot.slane %v2526_v28, 4  ;;  %v894_v14 = vld [vmem:[%s4926_s30 + $0x18] sm:$0xe]  ;;  %v895_v19 = vld [vmem:[%s4926_s30 + $0x1c] sm:$0xf] }
  0x3f   : > { %v2534_v39 = vrot.slane %v2532_v29, 5  ;;  %v3086_v40 = vrot.slane %v4438_v25, 5  ;;  %v3084_v44 = vsel %vm4928_vm2, %v4484_v34, %v3083_v35  ;;  %v3085_v45 = vrot.slane %v3083_v35, 4  ;;  %v896_v24 = vld [vmem:[%s4926_s30 + $0x20] sm:$0x1] }
  0x40   : > { %v2511_v43 = vsel %vm4969_vm5, %v2506_v33, %v2510_v17  ;;  %v440_v46 = vshrl.u32 %v346_v30, 16  ;;  %v2520_v50 = vrot.slane %v2519_v37, 4  ;;  %v2529_v51 = vor.u32 %v2528_v38, %v2524_v27  ;;  %v897_v29 = vld [vmem:[%s4926_s30 + $0x24] sm:$0xe]  ;;  %v899_v35 = vld [vmem:[%s4926_s30 + $0x2c] sm:$0x1] }
  0x41   : > { %v4420_v49 = vcombine.low %v2501_v32, %v2511_v43  ;;  %v443_v52 = vshll.u32 %v346_v30, 16  ;;  %v3087_v55 = vsel %vm4928_vm2, %v3085_v45, %v3086_v40  ;;  %v449_v57 = vshll.u32 %v347_v36, 16  ;;  %v898_v30 = vld [vmem:[%s4926_s30 + $0x28] sm:$0xf] }
  0x42   : > { %2375 = vrot.lane.b32.xlu0 %v4675_v31, %s4841_s9  ;;  %v442_v56 = vrot.slane %v440_v46, 4  ;;  %v453_v58 = vshrl.u32 %v347_v36, 16  ;;  %v2525_v59 = vsel %vm4969_vm5, %v2520_v50, %v2524_v27  ;;  %v2530_v60 = vrot.slane %v2529_v51, 4  ;;  %v4186_v36 = vld [vmem:[%s4926_s30 + $0x24] sm:$0xf] }
  0x43   : > { %v4500_v61 = vcombine.low %v3084_v44, %v3087_v55  ;;  %v445_v62 = vrot.slane %v443_v52, 5  ;;  %v451_v63 = vrot.slane %v449_v57, 5  ;;  %v459_v2 = vshll.u32 %v348_v41, 16  ;;  %v4187_v41 = vld [vmem:[%s4926_s30 + $0x28] sm:$0xf]  ;;  %v4693_v55 = vld [vmem:[%s6225_s1] sm:$0xff]  }
  0x44   : > { %v455_v1 = vrot.slane %v453_v58, 4  ;;  %v4485_v3 = vrot.slane %v4439_v42, 9  ;;  %v2535_v4 = vsel %vm4969_vm5, %v2530_v60, %v2534_v39  ;;  %v3090_v6 = vrot.slane %v4440_v47, 5  ;;  %4558 = vmatprep.subr.bf16.mxu0 %v4693_v55  ;;  %4596 = vmatprep.subr.bf16.mxu1 %v4693_v55 }
  0x45   : > { %v446_v5 = vor.u32 %v445_v62, %v442_v56  ;;  %v3093_v7 = vrot.slane %v4441_v48, 5  ;;  %v4421_v9 = vcombine.low %v2525_v59, %v2535_v4  ;;  %v461_v11 = vrot.slane %v459_v2, 5  ;;  %v4188_v59 = vld [vmem:[%s4926_s30 + $0x2c] sm:$0x1]  ;;  %v4189_v2 = vld [vmem:[%s4926_s30 + $0x30] sm:$0xf]  ;;  %4559 = vmatpush3.bf16.msra.mxu0 %v4693_v55  ;;  %4599 = vmatpush3.bf16.msra.mxu1 %v4693_v55 }
  0x46   : > { %2920 = vrot.lane.b32.xlu0 %v4420_v49, %s4842_s10  ;;  %v456_v10 = vor.u32 %v455_v1, %v451_v63  ;;  %v464_v13 = vshrl.u32 %v349_v54, 16  ;;  %v3091_v16 = vsel %vm4928_vm2, %v4485_v3, %v3090_v6  ;;  %v3092_v17 = vrot.slane %v3090_v6, 4  ;;  %v4190_v3 = vld [vmem:[%s4926_s30 + $0x34] sm:$0xf] }
  0x47   : > { %v447_v15 = vrot.slane %v446_v5, 4  ;;  %v467_v18 = vshll.u32 %v349_v54, 16  ;;  %2922 = vrot.lane.b32.xlu1 %v4421_v9, %s4842_s10  ;;  %v473_v22 = vshll.u32 %v350_v8, 16  ;;  %v477_v23 = vshrl.u32 %v350_v8, 16  ;;  %v4191_v9 = vld [vmem:[%s4926_s30 + $0x38] sm:$0x1] }
  0x48   : > { %v457_v20 = vrot.slane %v456_v10, 4  ;;  %v466_v21 = vrot.slane %v464_v13, 4  ;;  %v3094_v26 = vsel %vm4928_vm2, %v3092_v17, %v3093_v7  ;;  %v483_v28 = vshll.u32 %v351_v12, 16  ;;  %v4677_v7 = vld [vmem:[%s4926_s30 + $0x24] sm:$0xff]  }
  0x49   : > { %v452_v25 = vsel %vm4969_vm5, %v447_v15, %v451_v63  ;;  %v469_v27 = vrot.slane %v467_v18, 5  ;;  %v4501_v32 = vcombine.low %v3091_v16, %v3094_v26  ;;  %v475_v33 = vrot.slane %v473_v22, 5  ;;  %v4250_v10 = vld [vmem:[%s4926_s30 + $0x24] sm:$0xe]  ;;  %v4251_v15 = vld [vmem:[%s4926_s30 + $0x28] sm:$0xf] }
  0x4a   : > { %3241 = vrot.lane.b32.xlu0 %v4500_v61, %s4843_s11  ;;  %v462_v31 = vsel %vm4969_vm5, %v457_v20, %v461_v11  ;;  %v479_v34 = vrot.slane %v477_v23, 4  ;;  %v485_v39 = vrot.slane %v483_v28, 5  ;;  %v4102_v40 = vrot.slane %v894_v14, 9  ;;  %v4252_v16 = vld [vmem:[%s4926_s30 + $0x2c] sm:$0x1] }
  0x4b   : > { %v4086_v37 = vcombine.low %v452_v25, %v462_v31  ;;  %v470_v38 = vor.u32 %v469_v27, %v466_v21  ;;  %v1003_v43 = vrot.slane %v895_v19, 5  ;;  %v1006_v44 = vrot.slane %v896_v24, 5  ;;  %v4253_v21 = vld [vmem:[%s4926_s30 + $0x30] sm:$0xe]  ;;  %v4254_v26 = vld [vmem:[%s4926_s30 + $0x34] sm:$0xf] }
  0x4c   : > { %v480_v42 = vor.u32 %v479_v34, %v475_v33  ;;  %v4103_v45 = vrot.slane %v897_v29, 9  ;;  %v1010_v47 = vrot.slane %v898_v30, 5  ;;  %v1013_v48 = vrot.slane %v899_v35, 5  ;;  %v4255_v31 = vld [vmem:[%s4926_s30 + $0x38] sm:$0x1] }
  0x4d   : > { %827 = vrot.lane.b32.xlu1 %v4086_v37, %s4839_s7  ;;  %v471_v46 = vrot.slane %v470_v38, 4  ;;  %v1490_v49 = vshrl.u32 %v4186_v36, 16  ;;  %v1004_v51 = vsel %vm4928_vm2, %v4102_v40, %v1003_v43  ;;  %v1005_v52 = vrot.slane %v1003_v43, 4  ;;  %v4678_v37 = vld [vmem:[%s4926_s30 + $0x30] sm:$0xff]  }
  0x4e   : > { %3243 = vrot.lane.b32.xlu0 %v4501_v32, %s4843_s11  ;;  %v481_v50 = vrot.slane %v480_v42, 4  ;;  %v1493_v54 = vshll.u32 %v4186_v36, 16  ;;  %v1011_v57 = vsel %vm4928_vm2, %v4103_v45, %v1010_v47  ;;  %v1012_v58 = vrot.slane %v1010_v47, 4  ;;  %v4695_v32 = vld [vmem:[%s6225_s1 + $0x8] sm:$0xff]  }
  0x4f   : > { %v476_v56 = vsel %vm4969_vm5, %v471_v46, %v475_v33  ;;  %v1492_v60 = vrot.slane %v1490_v49, 4  ;;  %v1007_v62 = vsel %vm4928_vm2, %v1005_v52, %v1006_v44  ;;  %v1499_v1 = vshll.u32 %v4187_v41, 16  ;;  %v4378_v46 = vld [vmem:[%s4926_s30 + $0x30] sm:$0xf]  ;;  %4560 = vmatprep.subr.bf16.mxu0 %v4695_v32  ;;  %4597 = vmatprep.subr.bf16.mxu1 %v4695_v32 }
  0x50   : > { %v486_v61 = vsel %vm4969_vm5, %v481_v50, %v485_v39  ;;  %v1495_v63 = vrot.slane %v1493_v54, 5  ;;  %v4118_v5 = vcombine.low %v1004_v51, %v1007_v62  ;;  %v1014_v6 = vsel %vm4928_vm2, %v1012_v58, %v1013_v48  ;;  %v4379_v51 = vld [vmem:[%s4926_s30 + $0x34] sm:$0xf]  ;;  %4561 = vmatpush3.bf16.msra.mxu0 %v4695_v32  ;;  %4600 = vmatpush3.bf16.msra.mxu1 %v4695_v32  ;;  %v4381_v62 = vld [vmem:[%s4926_s30 + $0x3c] sm:$0xf] }
  0x51   : > { %v4087_v4 = vcombine.low %v476_v56, %v486_v61  ;;  %v1503_v8 = vshrl.u32 %v4187_v41, 16  ;;  %v4119_v11 = vcombine.low %v1011_v57, %v1014_v6  ;;  %v1501_v13 = vrot.slane %v1499_v1, 5 }
  0x52   : > { %v1496_v12 = vor.u32 %v1495_v63, %v1492_v60  ;;  %v1509_v14 = vshll.u32 %v4188_v59, 16  ;;  %1151 = vrot.lane.b32.xlu0 %v4118_v5, %s4838_s6  ;;  %v1514_v18 = vshrl.u32 %v4189_v2, 16  ;;  %v1517_v19 = vshll.u32 %v4189_v2, 16  ;;  %v4380_v59 = vld [vmem:[%s4926_s30 + $0x38] sm:$0x1] }
  0x53   : > { %829 = vrot.lane.b32.xlu1 %v4087_v4, %s4839_s7  ;;  %v1505_v17 = vrot.slane %v1503_v8, 4  ;;  %v1523_v20 = vshll.u32 %v4190_v3, 16  ;;  %v1527_v24 = vshrl.u32 %v4190_v3, 16  ;;  %v1533_v25 = vshll.u32 %v4191_v9, 16  ;;  %v4382_v4 = vld [vmem:[%s4926_s30 + $0x40] sm:$0xf] }
  0x54   : > { %v1497_v22 = vrot.slane %v1496_v12, 4  ;;  %v1511_v23 = vrot.slane %v1509_v14, 5  ;;  %v1516_v28 = vrot.slane %v1514_v18, 4  ;;  %v1519_v29 = vrot.slane %v1517_v19, 5  ;;  %v4383_v5 = vld [vmem:[%s4926_s30 + $0x44] sm:$0x1] }
  0x55   : > { %v1506_v27 = vor.u32 %v1505_v17, %v1501_v13  ;;  %v1525_v30 = vrot.slane %v1523_v20, 5  ;;  %v1529_v34 = vrot.slane %v1527_v24, 4  ;;  %v1535_v35 = vrot.slane %v1533_v25, 5  ;;  %v4679_v17 = vld [vmem:[%s4926_s30 + $0x30] sm:$0xff]  }
  0x56   : > { %v1502_v33 = vsel %vm4969_vm5, %v1497_v22, %v1501_v13  ;;  %v4294_v36 = vrot.slane %v4250_v10, 9  ;;  %1332 = vrot.lane.b32.xlu0 %v4677_v7, %s4836_s4  ;;  %v1520_v39 = vor.u32 %v1519_v29, %v1516_v28  ;;  %v2050_v40 = vrot.slane %v4251_v15, 5  ;;  %v4442_v10 = vld [vmem:[%s4926_s30 + $0x30] sm:$0xe] }
  0x57   : > { %1153 = vrot.lane.b32.xlu1 %v4119_v11, %s4838_s6  ;;  %v1507_v38 = vrot.slane %v1506_v27, 4  ;;  %v2053_v41 = vrot.slane %v4252_v16, 5  ;;  %v1530_v42 = vor.u32 %v1529_v34, %v1525_v30  ;;  %v4295_v43 = vrot.slane %v4253_v21, 9  ;;  %v4443_v11 = vld [vmem:[%s4926_s30 + $0x34] sm:$0xf] }
  0x58   : > { %v2057_v44 = vrot.slane %v4254_v26, 5  ;;  %v2060_v45 = vrot.slane %v4255_v31, 5  ;;  %v1521_v48 = vrot.slane %v1520_v39, 4  ;;  %v2051_v49 = vsel %vm4928_vm2, %v4294_v36, %v2050_v40  ;;  %v4444_v16 = vld [vmem:[%s4926_s30 + $0x38] sm:$0x1]  ;;  %v4680_v36 = vld [vmem:[%s4926_s30 + $0x3c] sm:$0xff]  }
  0x59   : > { %v1512_v47 = vsel %vm4969_vm5, %v1507_v38, %v1511_v23  ;;  %v2052_v50 = vrot.slane %v2050_v40, 4  ;;  %v1531_v54 = vrot.slane %v1530_v42, 4  ;;  %v2537_v60 = vshrl.u32 %v4378_v46, 16  ;;  %v352_v22 = vld [vmem:[%s4926_s30 + $0x30] sm:$0xf] }
  0x5a   : > { %v4230_v52 = vcombine.low %v1502_v33, %v1512_v47  ;;  %v2058_v55 = vsel %vm4928_vm2, %v4295_v43, %v2057_v44  ;;  %v2059_v56 = vrot.slane %v2057_v44, 4  ;;  %v1526_v57 = vsel %vm4969_vm5, %v1521_v48, %v1525_v30  ;;  %v354_v44 = vld [vmem:[%s4926_s30 + $0x38] sm:$0x1] }
  0x5b   : > { %1334 = vrot.lane.b32.xlu1 %v4678_v37, %s4836_s4  ;;  %v2054_v58 = vsel %vm4928_vm2, %v2052_v50, %v2053_v41  ;;  %v2540_v61 = vshll.u32 %v4378_v46, 16  ;;  %v1536_v63 = vsel %vm4969_vm5, %v1531_v54, %v1535_v35  ;;  %v2546_v3 = vshll.u32 %v4379_v51, 16  ;;  %v353_v35 = vld [vmem:[%s4926_s30 + $0x34] sm:$0xf]  ;;  %v4445_v50 = vld [vmem:[%s4926_s30 + $0x3c] sm:$0xe] }
  0x5c   : > { %1877 = vrot.lane.b32.xlu0 %v4230_v52, %s4840_s8  ;;  %v4310_v1 = vcombine.low %v2051_v49, %v2054_v58  ;;  %v2061_v2 = vsel %vm4928_vm2, %v2059_v56, %v2060_v45  ;;  %v4231_v6 = vcombine.low %v1526_v57, %v1536_v63  ;;  %v2539_v8 = vrot.slane %v2537_v60, 4  ;;  %v4446_v56 = vld [vmem:[%s4926_s30 + $0x40] sm:$0xf]  ;;  %v4447_v57 = vld [vmem:[%s4926_s30 + $0x44] sm:$0x1] }
  0x5d   : > { %v4311_v7 = vcombine.low %v2058_v55, %v2061_v2  ;;  %v2542_v9 = vrot.slane %v2540_v61, 5  ;;  %v2548_v12 = vrot.slane %v2546_v3, 5  ;;  %v2550_v13 = vshrl.u32 %v4379_v51, 16 }
  0x5e   : > { %v2556_v14 = vshll.u32 %v4380_v59, 16  ;;  %v2561_v15 = vshrl.u32 %v4381_v62, 16  ;;  %v2564_v19 = vshll.u32 %v4381_v62, 16  ;;  %v2570_v20 = vshll.u32 %v4382_v4, 16  ;;  %v355_v62 = vld [vmem:[%s4926_s30 + $0x3c] sm:$0xf] }
  0x5f   : > { %1879 = vrot.lane.b32.xlu1 %v4231_v6, %s4840_s8  ;;  %v2543_v18 = vor.u32 %v2542_v9, %v2539_v8  ;;  %v2574_v21 = vshrl.u32 %v4382_v4, 16  ;;  %v2552_v23 = vrot.slane %v2550_v13, 4  ;;  %v2580_v26 = vshll.u32 %v4383_v5, 16  ;;  %v356_v4 = vld [vmem:[%s4926_s30 + $0x40] sm:$0xf] }
  0x60   : > { %2198 = vrot.lane.b32.xlu0 %v4310_v1, %s4837_s5  ;;  %v2558_v24 = vrot.slane %v2556_v14, 5  ;;  %v2563_v25 = vrot.slane %v2561_v15, 4  ;;  %v2566_v28 = vrot.slane %v2564_v19, 5  ;;  %v2572_v29 = vrot.slane %v2570_v20, 5  ;;  %v357_v9 = vld [vmem:[%s4926_s30 + $0x44] sm:$0x1] }
  0x61   : > { %v2544_v27 = vrot.slane %v2543_v18, 4  ;;  %v2576_v30 = vrot.slane %v2574_v21, 4  ;;  %v2553_v31 = vor.u32 %v2552_v23, %v2548_v12  ;;  %v2582_v32 = vrot.slane %v2580_v26, 5  ;;  %v900_v14 = vld [vmem:[%s4926_s30 + $0x30] sm:$0xe] }
  0x62   : > { %v4486_v33 = vrot.slane %v4442_v10, 9  ;;  %v3097_v34 = vrot.slane %v4443_v11, 5  ;;  %v2567_v38 = vor.u32 %v2566_v28, %v2563_v25  ;;  %v3100_v40 = vrot.slane %v4444_v16, 5  ;;  %v901_v19 = vld [vmem:[%s4926_s30 + $0x34] sm:$0xf] }
  0x63   : > { %2200 = vrot.lane.b32.xlu1 %v4311_v7, %s4837_s5  ;;  %v2549_v37 = vsel %vm4969_vm5, %v2544_v27, %v2548_v12  ;;  %v2577_v39 = vor.u32 %v2576_v30, %v2572_v29  ;;  %v2554_v41 = vrot.slane %v2553_v31, 4  ;;  %v488_v45 = vshrl.u32 %v352_v22, 16  ;;  %v902_v20 = vld [vmem:[%s4926_s30 + $0x38] sm:$0x1] }
  0x64   : > { %2379 = vrot.lane.b32.xlu0 %v4679_v17, %s4841_s9  ;;  %v3098_v42 = vsel %vm4928_vm2, %v4486_v33, %v3097_v34  ;;  %v3099_v43 = vrot.slane %v3097_v34, 4  ;;  %v2568_v46 = vrot.slane %v2567_v38, 4  ;;  %v491_v48 = vshll.u32 %v352_v22, 16  ;;  %v904_v34 = vld [vmem:[%s4926_s30 + $0x40] sm:$0xf] }
  0x65   : > { %v2578_v47 = vrot.slane %v2577_v39, 4  ;;  %v497_v49 = vshll.u32 %v353_v35, 16  ;;  %v2559_v51 = vsel %vm4969_vm5, %v2554_v41, %v2558_v24  ;;  %v490_v54 = vrot.slane %v488_v45, 4 }
  0x66   : > { %v3101_v52 = vsel %vm4928_vm2, %v3099_v43, %v3100_v40  ;;  %v501_v55 = vshrl.u32 %v353_v35, 16  ;;  %v4422_v58 = vcombine.low %v2549_v37, %v2559_v51  ;;  %v2573_v59 = vsel %vm4969_vm5, %v2568_v46, %v2572_v29  ;;  %v903_v29 = vld [vmem:[%s4926_s30 + $0x3c] sm:$0xe]  ;;  %v905_v35 = vld [vmem:[%s4926_s30 + $0x44] sm:$0x1] }
  0x67   : > { %2381 = vrot.lane.b32.xlu1 %v4680_v36, %s4841_s9  ;;  %v2583_v60 = vsel %vm4969_vm5, %v2578_v47, %v2582_v32  ;;  %v4502_v61 = vcombine.low %v3098_v42, %v3101_v52  ;;  %v493_v1 = vrot.slane %v491_v48, 5  ;;  %v499_v2 = vrot.slane %v497_v49, 5  ;;  %v4192_v36 = vld [vmem:[%s4926_s30 + $0x3c] sm:$0xf]  ;;  %v4193_v48 = vld [vmem:[%s4926_s30 + $0x40] sm:$0xf] }
  0x68   : > { %v4423_v63 = vcombine.low %v2573_v59, %v2583_v60  ;;  %v503_v3 = vrot.slane %v501_v55, 4  ;;  %2924 = vrot.lane.b32.xlu0 %v4422_v58, %s4842_s10  ;;  %v507_v5 = vshll.u32 %v354_v44, 16  ;;  %v4487_v6 = vrot.slane %v4445_v50, 9  ;;  %v4195_v60 = vld [vmem:[%s4926_s30 + $0x48] sm:$0xf] }
  0x69   : > { %v3104_v7 = vrot.slane %v4446_v56, 5  ;;  %v3107_v8 = vrot.slane %v4447_v57, 5  ;;  %v494_v10 = vor.u32 %v493_v1, %v490_v54  ;;  %v512_v12 = vshrl.u32 %v355_v62, 16  ;;  %v4194_v54 = vld [vmem:[%s4926_s30 + $0x44] sm:$0x1] }
  0x6a   : > { %v504_v11 = vor.u32 %v503_v3, %v499_v2  ;;  %v515_v13 = vshll.u32 %v355_v62, 16  ;;  %v509_v15 = vrot.slane %v507_v5, 5  ;;  %v521_v18 = vshll.u32 %v356_v4, 16 }
  0x6b   : > { %2926 = vrot.lane.b32.xlu1 %v4423_v63, %s4842_s10  ;;  %v3105_v16 = vsel %vm4928_vm2, %v4487_v6, %v3104_v7  ;;  %v3106_v17 = vrot.slane %v3104_v7, 4  ;;  %v495_v21 = vrot.slane %v494_v10, 4  ;;  %v514_v23 = vrot.slane %v512_v12, 4  ;;  %v4197_v7 = vld [vmem:[%s4926_s30 + $0x50] sm:$0x1] }
  0x6c   : > { %v505_v22 = vrot.slane %v504_v11, 4  ;;  %v517_v24 = vrot.slane %v515_v13, 5  ;;  %3245 = vrot.lane.b32.xlu0 %v4502_v61, %s4843_s11  ;;  %v523_v26 = vrot.slane %v521_v18, 5  ;;  %v525_v27 = vshrl.u32 %v356_v4, 16  ;;  %v4681_v11 = vld [vmem:[%s4926_s30 + $0x3c] sm:$0xff]  }
  0x6d   : > { %v3108_v25 = vsel %vm4928_vm2, %v3106_v17, %v3107_v8  ;;  %v531_v28 = vshll.u32 %v357_v9, 16  ;;  %v500_v30 = vsel %vm4969_vm5, %v495_v21, %v499_v2  ;;  %v4104_v40 = vrot.slane %v900_v14, 9  ;;  %v4196_v2 = vld [vmem:[%s4926_s30 + $0x4c] sm:$0xf]  ;;  %v4256_v8 = vld [vmem:[%s4926_s30 + $0x3c] sm:$0xe] }
  0x6e   : > { %v510_v31 = vsel %vm4969_vm5, %v505_v22, %v509_v15  ;;  %v4503_v32 = vcombine.low %v3105_v16, %v3108_v25  ;;  %v518_v33 = vor.u32 %v517_v24, %v514_v23  ;;  %v527_v38 = vrot.slane %v525_v27, 4  ;;  %v4257_v14 = vld [vmem:[%s4926_s30 + $0x40] sm:$0xf]  ;;  %v4258_v15 = vld [vmem:[%s4926_s30 + $0x44] sm:$0x1] }
  0x6f   : > { %v4088_v37 = vcombine.low %v500_v30, %v510_v31  ;;  %v533_v39 = vrot.slane %v531_v28, 5  ;;  %v1017_v42 = vrot.slane %v901_v19, 5  ;;  %v1020_v43 = vrot.slane %v902_v20, 5  ;;  %v4259_v20 = vld [vmem:[%s4926_s30 + $0x48] sm:$0xe] }
  0x70   : > { %v519_v41 = vrot.slane %v518_v33, 4  ;;  %v4105_v44 = vrot.slane %v903_v29, 9  ;;  %3247 = vrot.lane.b32.xlu0 %v4503_v32, %s4843_s11  ;;  %v528_v45 = vor.u32 %v527_v38, %v523_v26  ;;  %v1024_v46 = vrot.slane %v904_v34, 5  ;;  %v4260_v25 = vld [vmem:[%s4926_s30 + $0x4c] sm:$0xf] }
  0x71   : > { %831 = vrot.lane.b32.xlu1 %v4088_v37, %s4839_s7  ;;  %v1027_v47 = vrot.slane %v905_v35, 5  ;;  %v1538_v49 = vshrl.u32 %v4192_v36, 16  ;;  %v1018_v51 = vsel %vm4928_vm2, %v4104_v40, %v1017_v42  ;;  %v1019_v52 = vrot.slane %v1017_v42, 4  ;;  %v4261_v30 = vld [vmem:[%s4926_s30 + $0x50] sm:$0x1] }
  0x72   : > { %v524_v50 = vsel %vm4969_vm5, %v519_v41, %v523_v26  ;;  %v1541_v55 = vshll.u32 %v4192_v36, 16  ;;  %v529_v56 = vrot.slane %v528_v45, 4  ;;  %v1025_v57 = vsel %vm4928_vm2, %v4105_v44, %v1024_v46  ;;  %v4384_v44 = vld [vmem:[%s4926_s30 + $0x48] sm:$0xf] }
  0x73   : > { %v1026_v58 = vrot.slane %v1024_v46, 4  ;;  %v1540_v59 = vrot.slane %v1538_v49, 4  ;;  %v1021_v61 = vsel %vm4928_vm2, %v1019_v52, %v1020_v43  ;;  %v1547_v63 = vshll.u32 %v4193_v48, 16  ;;  %v4385_v49 = vld [vmem:[%s4926_s30 + $0x4c] sm:$0xf] }
  0x74   : > { %v1543_v62 = vrot.slane %v1541_v55, 5  ;;  %v1551_v1 = vshrl.u32 %v4193_v48, 16  ;;  %v534_v3 = vsel %vm4969_vm5, %v529_v56, %v533_v39  ;;  %v4120_v4 = vcombine.low %v1018_v51, %v1021_v61  ;;  %v4682_v39 = vld [vmem:[%s4926_s30 + $0x48] sm:$0xff]   ;;  %v4387_v56 = vld [vmem:[%s4926_s30 + $0x54] sm:$0xf] }
  0x75   : > { %v1028_v5 = vsel %vm4928_vm2, %v1026_v58, %v1027_v47  ;;  %v1557_v6 = vshll.u32 %v4194_v54, 16  ;;  %v4089_v9 = vcombine.low %v524_v50, %v534_v3  ;;  %v1549_v13 = vrot.slane %v1547_v63, 5  ;;  %v4386_v50 = vld [vmem:[%s4926_s30 + $0x50] sm:$0x1] }
  0x76   : > { %v4121_v10 = vcombine.low %v1025_v57, %v1028_v5  ;;  %v1544_v12 = vor.u32 %v1543_v62, %v1540_v59  ;;  %1155 = vrot.lane.b32.xlu0 %v4120_v4, %s4838_s6  ;;  %v1553_v16 = vrot.slane %v1551_v1, 4  ;;  %v1562_v18 = vshrl.u32 %v4195_v60, 16 }
  0x77   : > { %v1559_v17 = vrot.slane %v1557_v6, 5  ;;  %v1565_v19 = vshll.u32 %v4195_v60, 16  ;;  %833 = vrot.lane.b32.xlu1 %v4089_v9, %s4839_s7  ;;  %v1571_v22 = vshll.u32 %v4196_v2, 16  ;;  %v1575_v23 = vshrl.u32 %v4196_v2, 16  ;;  %v4388_v2 = vld [vmem:[%s4926_s30 + $0x58] sm:$0xf] }
  0x78   : > { %v1545_v21 = vrot.slane %v1544_v12, 4  ;;  %v1581_v24 = vshll.u32 %v4197_v7, 16  ;;  %v1554_v26 = vor.u32 %v1553_v16, %v1549_v13  ;;  %v1564_v27 = vrot.slane %v1562_v18, 4  ;;  %v4389_v7 = vld [vmem:[%s4926_s30 + $0x5c] sm:$0x1] }
  0x79   : > { %v1567_v28 = vrot.slane %v1565_v19, 5  ;;  %v4296_v29 = vrot.slane %v4256_v8, 9  ;;  %v1573_v32 = vrot.slane %v1571_v22, 5  ;;  %v1577_v33 = vrot.slane %v1575_v23, 4  ;;  %v4448_v12 = vld [vmem:[%s4926_s30 + $0x48] sm:$0xe] }
  0x7a   : > { %v1550_v31 = vsel %vm4969_vm5, %v1545_v21, %v1549_v13  ;;  %v1583_v34 = vrot.slane %v1581_v24, 5  ;;  %1336 = vrot.lane.b32.xlu0 %v4681_v11, %s4836_s4  ;;  %v1555_v35 = vrot.slane %v1554_v26, 4  ;;  %v2064_v37 = vrot.slane %v4257_v14, 5  ;;  %v4683_v13 = vld [vmem:[%s4926_s30 + $0x48] sm:$0xff]   ;;  %v4450_v23 = vld [vmem:[%s4926_s30 + $0x50] sm:$0x1] }
  0x7b   : > { %v1568_v36 = vor.u32 %v1567_v28, %v1564_v27  ;;  %v2067_v38 = vrot.slane %v4258_v15, 5  ;;  %1157 = vrot.lane.b32.xlu1 %v4121_v10, %s4838_s6  ;;  %v1578_v40 = vor.u32 %v1577_v33, %v1573_v32  ;;  %v4297_v41 = vrot.slane %v4259_v20, 9  ;;  %v4449_v18 = vld [vmem:[%s4926_s30 + $0x4c] sm:$0xf]  ;;  %v358_v28 = vld [vmem:[%s4926_s30 + $0x48] sm:$0xf] }
  0x7c   : > { %v2071_v42 = vrot.slane %v4260_v25, 5  ;;  %v2074_v43 = vrot.slane %v4261_v30, 5  ;;  %v1560_v45 = vsel %vm4969_vm5, %v1555_v35, %v1559_v17  ;;  %v2065_v47 = vsel %vm4928_vm2, %v4296_v29, %v2064_v37  ;;  %v359_v33 = vld [vmem:[%s4926_s30 + $0x4c] sm:$0xf] }
  0x7d   : > { %v1569_v46 = vrot.slane %v1568_v36, 4  ;;  %v2066_v48 = vrot.slane %v2064_v37, 4  ;;  %v4232_v51 = vcombine.low %v1550_v31, %v1560_v45  ;;  %v1579_v52 = vrot.slane %v1578_v40, 4  ;;  %v4452_v45 = vld [vmem:[%s4926_s30 + $0x58] sm:$0xf] }
  0x7e   : > { %v2072_v54 = vsel %vm4928_vm2, %v4297_v41, %v2071_v42  ;;  %v2073_v55 = vrot.slane %v2071_v42, 4  ;;  %v2585_v59 = vshrl.u32 %v4384_v44, 16  ;;  %v2588_v60 = vshll.u32 %v4384_v44, 16  ;;  %v360_v42 = vld [vmem:[%s4926_s30 + $0x50] sm:$0x1] }
  0x7f   : > { %v1574_v57 = vsel %vm4969_vm5, %v1569_v46, %v1573_v32  ;;  %v2068_v58 = vsel %vm4928_vm2, %v2066_v48, %v2067_v38  ;;  %1338 = vrot.lane.b32.xlu1 %v4682_v39, %s4836_s4  ;;  %1881 = vrot.lane.b32.xlu0 %v4232_v51, %s4840_s8  ;;  %v1584_v61 = vsel %vm4969_vm5, %v1579_v52, %v1583_v34  ;;  %v2594_v1 = vshll.u32 %v4385_v49, 16  ;;  %v4684_v38 = vld [vmem:[%s4926_s30 + $0x54] sm:$0xff]  }
  0x80   : > { %v4312_v62 = vcombine.low %v2065_v47, %v2068_v58  ;;  %v2075_v63 = vsel %vm4928_vm2, %v2073_v55, %v2074_v43  ;;  %v4233_v3 = vcombine.low %v1574_v57, %v1584_v61  ;;  %v2587_v5 = vrot.slane %v2585_v59, 4  ;;  %v4451_v44 = vld [vmem:[%s4926_s30 + $0x54] sm:$0xe] }
  0x81   : > { %v4313_v4 = vcombine.low %v2072_v54, %v2075_v63  ;;  %v2590_v6 = vrot.slane %v2588_v60, 5  ;;  %v2596_v8 = vrot.slane %v2594_v1, 5  ;;  %v2598_v9 = vshrl.u32 %v4385_v49, 16  ;;  %v361_v60 = vld [vmem:[%s4926_s30 + $0x54] sm:$0xf] }
  0x82   : > { %v2604_v10 = vshll.u32 %v4386_v50, 16  ;;  %v2609_v11 = vshrl.u32 %v4387_v56, 16  ;;  %v2612_v15 = vshll.u32 %v4387_v56, 16  ;;  %v2618_v16 = vshll.u32 %v4388_v2, 16  ;;  %v4453_v50 = vld [vmem:[%s4926_s30 + $0x5c] sm:$0x1] }
  0x83   : > { %v2591_v14 = vor.u32 %v2590_v6, %v2587_v5  ;;  %v2622_v17 = vshrl.u32 %v4388_v2, 16  ;;  %1883 = vrot.lane.b32.xlu1 %v4233_v3, %s4840_s8  ;;  %2202 = vrot.lane.b32.xlu0 %v4312_v62, %s4837_s5  ;;  %v2600_v19 = vrot.slane %v2598_v9, 4  ;;  %v2628_v22 = vshll.u32 %v4389_v7, 16  ;;  %v362_v2 = vld [vmem:[%s4926_s30 + $0x58] sm:$0xf] }
  0x84   : > { %v2606_v20 = vrot.slane %v2604_v10, 5  ;;  %v2611_v21 = vrot.slane %v2609_v11, 4  ;;  %v2614_v25 = vrot.slane %v2612_v15, 5  ;;  %v2620_v26 = vrot.slane %v2618_v16, 5  ;;  %v363_v9 = vld [vmem:[%s4926_s30 + $0x5c] sm:$0x1] }
  0x85   : > { %v2592_v24 = vrot.slane %v2591_v14, 4  ;;  %v2624_v27 = vrot.slane %v2622_v17, 4  ;;  %v2601_v29 = vor.u32 %v2600_v19, %v2596_v8  ;;  %v2630_v30 = vrot.slane %v2628_v22, 5  ;;  %v907_v17 = vld [vmem:[%s4926_s30 + $0x4c] sm:$0xf] }
  0x86   : > { %v4488_v31 = vrot.slane %v4448_v12, 9  ;;  %v3111_v32 = vrot.slane %v4449_v18, 5  ;;  %v2615_v35 = vor.u32 %v2614_v25, %v2611_v21  ;;  %v3114_v37 = vrot.slane %v4450_v23, 5  ;;  %v906_v12 = vld [vmem:[%s4926_s30 + $0x48] sm:$0xe] }
  0x87   : > { %v2597_v34 = vsel %vm4969_vm5, %v2592_v24, %v2596_v8  ;;  %v2625_v36 = vor.u32 %v2624_v27, %v2620_v26  ;;  %2204 = vrot.lane.b32.xlu1 %v4313_v4, %s4837_s5  ;;  %2383 = vrot.lane.b32.xlu0 %v4683_v13, %s4841_s9  ;;  %v2602_v39 = vrot.slane %v2601_v29, 4  ;;  %v536_v43 = vshrl.u32 %v358_v28, 16  ;;  %v908_v18 = vld [vmem:[%s4926_s30 + $0x50] sm:$0x1]  ;;  %v909_v19 = vld [vmem:[%s4926_s30 + $0x54] sm:$0xe] }
  0x88   : > { %v3112_v40 = vsel %vm4928_vm2, %v4488_v31, %v3111_v32  ;;  %v3113_v41 = vrot.slane %v3111_v32, 4  ;;  %v2616_v46 = vrot.slane %v2615_v35, 4  ;;  %v539_v48 = vshll.u32 %v358_v28, 16  ;;  %v910_v32 = vld [vmem:[%s4926_s30 + $0x58] sm:$0xf] }
  0x89   : > { %v2626_v47 = vrot.slane %v2625_v36, 4  ;;  %v545_v49 = vshll.u32 %v359_v33, 16  ;;  %v2607_v51 = vsel %vm4969_vm5, %v2602_v39, %v2606_v20  ;;  %v538_v54 = vrot.slane %v536_v43, 4  ;;  %v4199_v43 = vld [vmem:[%s4926_s30 + $0x58] sm:$0xf] }
  0x8a   : > { %v3115_v52 = vsel %vm4928_vm2, %v3113_v41, %v3114_v37  ;;  %v549_v55 = vshrl.u32 %v359_v33, 16  ;;  %v4424_v56 = vcombine.low %v2597_v34, %v2607_v51  ;;  %v2621_v57 = vsel %vm4969_vm5, %v2616_v46, %v2620_v26  ;;  %v911_v33 = vld [vmem:[%s4926_s30 + $0x5c] sm:$0x1]  ;;  %v4198_v34 = vld [vmem:[%s4926_s30 + $0x54] sm:$0xf] }
  0x8b   : > { %v2631_v58 = vsel %vm4969_vm5, %v2626_v47, %v2630_v30  ;;  %v4504_v59 = vcombine.low %v3112_v40, %v3115_v52  ;;  %2385 = vrot.lane.b32.xlu1 %v4684_v38, %s4841_s9  ;;  %v541_v62 = vrot.slane %v539_v48, 5  ;;  %v547_v63 = vrot.slane %v545_v49, 5  ;;  %v4200_v47 = vld [vmem:[%s4926_s30 + $0x5c] sm:$0x1] }
  0x8c   : > { %v4425_v61 = vcombine.low %v2621_v57, %v2631_v58  ;;  %v551_v1 = vrot.slane %v549_v55, 4  ;;  %2928 = vrot.lane.b32.xlu0 %v4424_v56, %s4842_s10  ;;  %v555_v3 = vshll.u32 %v360_v42, 16  ;;  %v4489_v4 = vrot.slane %v4451_v44, 9 }
  0x8d   : > { %v3118_v5 = vrot.slane %v4452_v45, 5  ;;  %v3121_v6 = vrot.slane %v4453_v50, 5  ;;  %v542_v7 = vor.u32 %v541_v62, %v538_v54  ;;  %v560_v10 = vshrl.u32 %v361_v60, 16 }
  0x8e   : > { %v552_v8 = vor.u32 %v551_v1, %v547_v63  ;;  %v563_v11 = vshll.u32 %v361_v60, 16  ;;  %v557_v13 = vrot.slane %v555_v3, 5  ;;  %v569_v16 = vshll.u32 %v362_v2, 16 }
  0x8f   : > { %v3119_v14 = vsel %vm4928_vm2, %v4489_v4, %v3118_v5  ;;  %v3120_v15 = vrot.slane %v3118_v5, 4  ;;  %2930 = vrot.lane.b32.xlu1 %v4425_v61, %s4842_s10  ;;  %v543_v20 = vrot.slane %v542_v7, 4  ;;  %v562_v22 = vrot.slane %v560_v10, 4  ;;  %v4203_v7 = vld [vmem:[%s4926_s30 + $0x68] sm:$0x1] }
  0x90   : > { %v553_v21 = vrot.slane %v552_v8, 4  ;;  %v565_v23 = vrot.slane %v563_v11, 5  ;;  %3249 = vrot.lane.b32.xlu0 %v4504_v59, %s4843_s11  ;;  %v571_v25 = vrot.slane %v569_v16, 5  ;;  %v573_v26 = vshrl.u32 %v362_v2, 16  ;;  %v5280_v54 = vpop.permute.xlu1 %1330  ;;  %v4201_v59 = vld [vmem:[%s4926_s30 + $0x60] sm:$0xf]  ;;  %v5285_v60 = vpop.permute.xlu0 %1328 }
  0x91   : > { %v3122_v24 = vsel %vm4928_vm2, %v3120_v15, %v3121_v6  ;;  %v579_v27 = vshll.u32 %v363_v9, 16  ;;  %v548_v28 = vsel %vm4969_vm5, %v543_v20, %v547_v63  ;;  %v4106_v38 = vrot.slane %v906_v12, 9  ;;  %v4202_v2 = vld [vmem:[%s4926_s30 + $0x64] sm:$0xf]  ;;  %v4262_v8 = vld [vmem:[%s4926_s30 + $0x54] sm:$0xe] }
  0x92   : > { %v558_v29 = vsel %vm4969_vm5, %v553_v21, %v557_v13  ;;  %v4505_v30 = vcombine.low %v3119_v14, %v3122_v24  ;;  %v566_v31 = vor.u32 %v565_v23, %v562_v22  ;;  %v575_v36 = vrot.slane %v573_v26, 4  ;;  %v4685_v11 = vld [vmem:[%s4926_s30 + $0x54] sm:$0xff]   ;;  %v4264_v15 = vld [vmem:[%s4926_s30 + $0x5c] sm:$0x1]  ;;  %v4265_v20 = vld [vmem:[%s4926_s30 + $0x60] sm:$0xe] }
  0x93   : > { %v4090_v35 = vcombine.low %v548_v28, %v558_v29  ;;  %v581_v37 = vrot.slane %v579_v27, 5  ;;  %v1031_v40 = vrot.slane %v907_v17, 5  ;;  %v1034_v41 = vrot.slane %v908_v18, 5  ;;  %v4263_v14 = vld [vmem:[%s4926_s30 + $0x58] sm:$0xf] }
  0x94   : > { %v567_v39 = vrot.slane %v566_v31, 4  ;;  %v4107_v42 = vrot.slane %v909_v19, 9  ;;  %3251 = vrot.lane.b32.xlu0 %v4505_v30, %s4843_s11  ;;  %v576_v44 = vor.u32 %v575_v36, %v571_v25  ;;  %v1038_v45 = vrot.slane %v910_v32, 5  ;;  %v4267_v31 = vld [vmem:[%s4926_s30 + $0x68] sm:$0x1] }
  0x95   : > { %835 = vrot.lane.b32.xlu1 %v4090_v35, %s4839_s7  ;;  %v1041_v46 = vrot.slane %v911_v33, 5  ;;  %v1586_v48 = vshrl.u32 %v4198_v34, 16  ;;  %v1032_v50 = vsel %vm4928_vm2, %v4106_v38, %v1031_v40  ;;  %v1033_v51 = vrot.slane %v1031_v40, 4 }
  0x96   : > { %v572_v49 = vsel %vm4969_vm5, %v567_v39, %v571_v25  ;;  %v1589_v52 = vshll.u32 %v4198_v34, 16  ;;  %v577_v55 = vrot.slane %v576_v44, 4  ;;  %v1039_v56 = vsel %vm4928_vm2, %v4107_v42, %v1038_v45  ;;  %v4266_v25 = vld [vmem:[%s4926_s30 + $0x64] sm:$0xf] }
  0x97   : > { %v1040_v57 = vrot.slane %v1038_v45, 4  ;;  %v1588_v58 = vrot.slane %v1586_v48, 4  ;;  %v1035_v61 = vsel %vm4928_vm2, %v1033_v51, %v1034_v41  ;;  %v1595_v63 = vshll.u32 %v4199_v43, 16  ;;  %v4390_v41 = vld [vmem:[%s4926_s30 + $0x60] sm:$0xf] }
  0x98   : > { %v1591_v62 = vrot.slane %v1589_v52, 5  ;;  %v1599_v1 = vshrl.u32 %v4199_v43, 16  ;;  %v582_v3 = vsel %vm4969_vm5, %v577_v55, %v581_v37  ;;  %v4122_v4 = vcombine.low %v1032_v50, %v1035_v61  ;;  %v5306_v32 = vpop.permute.xlu0 %2194  ;;  %v4686_v42 = vld [vmem:[%s4926_s30 + $0x60] sm:$0xff]  }
  0x99   : > { %v1042_v5 = vsel %vm4928_vm2, %v1040_v57, %v1041_v46  ;;  %v1605_v6 = vshll.u32 %v4200_v47, 16  ;;  %v4091_v9 = vcombine.low %v572_v49, %v582_v3  ;;  %v1597_v13 = vrot.slane %v1595_v63, 5  ;;  %v5303_v26 = vpop.permute.xlu1 %1147  ;;  %v4391_v47 = vld [vmem:[%s4926_s30 + $0x64] sm:$0xf] }
  0x9a   : > { %v4123_v10 = vcombine.low %v1039_v56, %v1042_v5  ;;  %v1592_v12 = vor.u32 %v1591_v62, %v1588_v58  ;;  %1159 = vrot.lane.b32.xlu0 %v4122_v4, %s4838_s6  ;;  %v1601_v16 = vrot.slane %v1599_v1, 4  ;;  %v1610_v18 = vshrl.u32 %v4201_v59, 16  ;;  %v4392_v62 = vld [vmem:[%s4926_s30 + $0x68] sm:$0x1] }
  0x9b   : > { %v1607_v17 = vrot.slane %v1605_v6, 5  ;;  %v1613_v19 = vshll.u32 %v4201_v59, 16  ;;  %837 = vrot.lane.b32.xlu1 %v4091_v9, %s4839_s7  ;;  %v1619_v22 = vshll.u32 %v4202_v2, 16  ;;  %v1623_v23 = vshrl.u32 %v4202_v2, 16  ;;  %v4393_v2 = vld [vmem:[%s4926_s30 + $0x6c] sm:$0xf] }
  0x9c   : > { %v1593_v21 = vrot.slane %v1592_v12, 4  ;;  %v1629_v24 = vshll.u32 %v4203_v7, 16  ;;  %v1602_v27 = vor.u32 %v1601_v16, %v1597_v13  ;;  %v1612_v28 = vrot.slane %v1610_v18, 4  ;;  %v4694_v16 = vld [vmem:[%s4926_s30 + $0x18] sm:$0xff]   ;;  %v4702_v18 = vld [vmem:[%s4926_s30 + $0x30] sm:$0xff]  }
  0x9d   : > { %v1615_v29 = vrot.slane %v1613_v19, 5  ;;  %v4298_v30 = vrot.slane %v4262_v8, 9  ;;  %v1621_v34 = vrot.slane %v1619_v22, 5  ;;  %v1625_v35 = vrot.slane %v1623_v23, 4  ;;  %v5323_v58 = vpop.permute.xlu1 %1149  ;;  %v4394_v8 = vld [vmem:[%s4926_s30 + $0x70] sm:$0xf] }
  0x9e   : > { %v1598_v33 = vsel %vm4969_vm5, %v1593_v21, %v1597_v13  ;;  %v1631_v36 = vrot.slane %v1629_v24, 5  ;;  %1340 = vrot.lane.b32.xlu0 %v4685_v11, %s4836_s4  ;;  %v1603_v37 = vrot.slane %v1602_v27, 4  ;;  %v2078_v39 = vrot.slane %v4263_v14, 5  ;;  %v4395_v13 = vld [vmem:[%s4926_s30 + $0x74] sm:$0x1]  ;;  %v4689_v14 = vld [vmem:[%s4926_s30] sm:$0xff]  }
  0x9f   : > { %v1616_v38 = vor.u32 %v1615_v29, %v1612_v28  ;;  %v2081_v40 = vrot.slane %v4264_v15, 5  ;;  %1161 = vrot.lane.b32.xlu1 %v4123_v10, %s4838_s6  ;;  %v1626_v43 = vor.u32 %v1625_v35, %v1621_v34  ;;  %v4299_v44 = vrot.slane %v4265_v20, 9  ;;  %v4690_v15 = vld [vmem:[%s4926_s30 + $0xc] sm:$0xff]   ;;  %v4703_v19 = vld [vmem:[%s4926_s30 + $0x3c] sm:$0xff]   ;;  %324 = vst.msk [vmem:[#allocation2] sm:$0xff] %vm323_vm6, %v4689_v14  ;;  %326 = vst.msk [vmem:[#allocation2 + $0x10] sm:$0xff] %vm323_vm6, %v4694_v16 }
  0xa0   : > { %v2085_v45 = vrot.slane %v4266_v25, 5  ;;  %v2088_v46 = vrot.slane %v4267_v31, 5  ;;  %v1608_v48 = vsel %vm4969_vm5, %v1603_v37, %v1607_v17  ;;  %v2079_v50 = vsel %vm4928_vm2, %v4298_v30, %v2078_v39  ;;  %v4696_v17 = vld [vmem:[%s4926_s30 + $0x24] sm:$0xff]   ;;  %v4454_v31 = vld [vmem:[%s4926_s30 + $0x60] sm:$0xe]  ;;  %325 = vst.msk [vmem:[#allocation2 + $0x8] sm:$0xff] %vm323_vm6, %v4690_v15 }
  0xa1   : > { %v1617_v49 = vrot.slane %v1616_v38, 4  ;;  %v2080_v51 = vrot.slane %v2078_v39, 4  ;;  %v4234_v52 = vcombine.low %v1598_v33, %v1608_v48  ;;  %v1627_v55 = vrot.slane %v1626_v43, 4  ;;  %v4708_v20 = vld [vmem:[%s4926_s30 + $0x48] sm:$0xff]   ;;  %v4687_v21 = vld [vmem:[%s4926_s30 + $0x60] sm:$0xff]   ;;  %v4709_v33 = vld [vmem:[%s4926_s30 + $0x54] sm:$0xff]   ;;  %v5357_v39 = vpop.permute.xlu1 %2196 }
  0xa2   : > { %v5321_v56 = vsel %vm4928_vm2, %v4299_v44, %v2085_v45  ;;  %v2087_v57 = vrot.slane %v2085_v45, 4  ;;  %v2633_v63 = vshrl.u32 %v4390_v41, 16  ;;  %v2636_v1 = vshll.u32 %v4390_v41, 16  ;;  %v4455_v38 = vld [vmem:[%s4926_s30 + $0x64] sm:$0xf]  ;;  %327 = vst.msk [vmem:[#allocation2 + $0x18] sm:$0xff] %vm323_vm6, %v4696_v17 }
  0xa3   : > { %v1622_v59 = vsel %vm4969_vm5, %v1617_v49, %v1621_v34  ;;  %v2082_v61 = vsel %vm4928_vm2, %v2080_v51, %v2081_v40  ;;  %v5331_v3 = vpop.permute.xlu0 %823  ;;  %1342 = vrot.lane.b32.xlu1 %v4686_v42, %s4836_s4  ;;  %1885 = vrot.lane.b32.xlu0 %v4234_v52, %s4840_s8  ;;  %v1632_v4 = vsel %vm4969_vm5, %v1627_v55, %v1631_v36  ;;  %v2642_v7 = vshll.u32 %v4391_v47, 16  ;;  %v4456_v44 = vld [vmem:[%s4926_s30 + $0x68] sm:$0x1]  ;;  %v364_v48 = vld [vmem:[%s4926_s30 + $0x60] sm:$0xf] }
  0xa4   : > { %v4314_v5 = vcombine.low %v2079_v50, %v2082_v61  ;;  %v2089_v6 = vsel %vm4928_vm2, %v2087_v57, %v2088_v46  ;;  %v4235_v9 = vcombine.low %v1622_v59, %v1632_v4  ;;  %v2635_v11 = vrot.slane %v2633_v63, 4  ;;  %v4688_v49 = vld [vmem:[%s4926_s30 + $0x6c] sm:$0xff]   ;;  %v365_v55 = vld [vmem:[%s4926_s30 + $0x64] sm:$0xf]  ;;  %328 = vst.msk [vmem:[#allocation2 + $0x20] sm:$0xff] %vm323_vm6, %v4702_v18  ;;  %329 = vst.msk [vmem:[#allocation2 + $0x28] sm:$0xff] %vm323_vm6, %v4703_v19 }
  0xa5   : > { %v4315_v10 = vcombine.low %v5321_v56, %v2089_v6  ;;  %v2638_v12 = vrot.slane %v2636_v1, 5  ;;  %v5350_v22 = vrot.slane %v2642_v7, 5  ;;  %v2646_v23 = vshrl.u32 %v4391_v47, 16  ;;  %330 = vst.msk [vmem:[#allocation2 + $0x30] sm:$0xff] %vm323_vm6, %v4708_v20  ;;  %331 = vst.msk [vmem:[#allocation2 + $0x38] sm:$0xff] %vm323_vm6, %v4709_v33 }
  0xa6   : > { %v2652_v24 = vshll.u32 %v4392_v62, 16  ;;  %v2657_v25 = vshrl.u32 %v4393_v2, 16  ;;  %v2660_v28 = vshll.u32 %v4393_v2, 16  ;;  %v2666_v29 = vshll.u32 %v4394_v8, 16  ;;  %872 = vst.msk [vmem:[#allocation2] sm:$0xff] %vm871_vm7, %v5331_v3 }
  0xa7   : > { %v2639_v27 = vor.u32 %v2638_v12, %v2635_v11  ;;  %v2670_v30 = vshrl.u32 %v4394_v8, 16  ;;  %1887 = vrot.lane.b32.xlu1 %v4235_v9, %s4840_s8  ;;  %2206 = vrot.lane.b32.xlu0 %v4314_v5, %s4837_s5  ;;  %v2648_v34 = vrot.slane %v2646_v23, 4  ;;  %v2676_v37 = vshll.u32 %v4395_v13, 16  ;;  %v366_v62 = vld [vmem:[%s4926_s30 + $0x68] sm:$0x1]  ;;  %1196 = vst.msk [vmem:[#allocation2] sm:$0xff] %vm1195_vm8, %v5303_v26 }
  0xa8   : > { %v2654_v35 = vrot.slane %v2652_v24, 5  ;;  %v2659_v36 = vrot.slane %v2657_v25, 4  ;;  %v2662_v41 = vrot.slane %v2660_v28, 5  ;;  %v2668_v42 = vrot.slane %v2666_v29, 5  ;;  %v826_v45 = vpop.permute.xlu0 %825  ;;  %v4457_v63 = vld [vmem:[%s4926_s30 + $0x6c] sm:$0xe] }
  0xa9   : > { %v2640_v40 = vrot.slane %v2639_v27, 4  ;;  %v2672_v43 = vrot.slane %v2670_v30, 4  ;;  %v2649_v46 = vor.u32 %v2648_v34, %v5350_v22  ;;  %v2678_v47 = vrot.slane %v2676_v37, 5  ;;  %873 = vst.msk [vmem:[#allocation2 + $0x8] sm:$0xff] %vm871_vm7, %v826_v45  ;;  %v4458_v6 = vld [vmem:[%s4926_s30 + $0x70] sm:$0xf] }
  0xaa   : > { %v2663_v51 = vor.u32 %v2662_v41, %v2659_v36  ;;  %v4490_v57 = vrot.slane %v4454_v31, 9  ;;  %v3125_v59 = vrot.slane %v4455_v38, 5  ;;  %v3128_v61 = vrot.slane %v4456_v44, 5  ;;  %1197 = vst.msk [vmem:[#allocation2 + $0x8] sm:$0xff] %vm1195_vm8, %v5323_v58  ;;  %v4459_v7 = vld [vmem:[%s4926_s30 + $0x74] sm:$0x1] }
  0xab   : > { %v2645_v50 = vsel %vm4969_vm5, %v2640_v40, %v5350_v22  ;;  %v2673_v52 = vor.u32 %v2672_v43, %v2668_v42  ;;  %2208 = vrot.lane.b32.xlu1 %v4315_v10, %s4837_s5  ;;  %2387 = vrot.lane.b32.xlu0 %v4687_v21, %s4841_s9  ;;  %v2650_v56 = vrot.slane %v2649_v46, 4  ;;  %v584_v4 = vshrl.u32 %v364_v48, 16  ;;  %v367_v3 = vld [vmem:[%s4926_s30 + $0x6c] sm:$0xf]  ;;  %v368_v19 = vld [vmem:[%s4926_s30 + $0x70] sm:$0xf] }
  0xac   : > { %v2664_v1 = vrot.slane %v2663_v51, 4  ;;  %v587_v5 = vshll.u32 %v364_v48, 16  ;;  %v3126_v9 = vsel %vm4928_vm2, %v4490_v57, %v3125_v59  ;;  %v3127_v10 = vrot.slane %v3125_v59, 4  ;;  %v5393_v12 = vpop.permute.xlu1 %1875  ;;  %v369_v33 = vld [vmem:[%s4926_s30 + $0x74] sm:$0x1]  ;;  %1378 = vst.msk [vmem:[#allocation2 + $0x8] sm:$0xff] %vm1376_vm9, %v5280_v54 }
  0xad   : > { %v2674_v2 = vrot.slane %v2673_v52, 4  ;;  %v2655_v8 = vsel %vm4969_vm5, %v2650_v56, %v2654_v35  ;;  %v593_v11 = vshll.u32 %v365_v55, 16  ;;  %v586_v14 = vrot.slane %v584_v4, 4  ;;  %v912_v41 = vld [vmem:[%s4926_s30 + $0x60] sm:$0xe]  ;;  %1377 = vst.msk [vmem:[#allocation2] sm:$0xff] %vm1376_vm9, %v5285_v60 }
  0xae   : > { %v4426_v26 = vcombine.low %v2645_v50, %v2655_v8  ;;  %v2669_v13 = vsel %vm4969_vm5, %v2664_v1, %v2668_v42  ;;  %v3129_v16 = vsel %vm4928_vm2, %v3127_v10, %v3128_v61  ;;  %v589_v17 = vrot.slane %v587_v5, 5  ;;  %v913_v48 = vld [vmem:[%s4926_s30 + $0x64] sm:$0xf]  ;;  %v914_v52 = vld [vmem:[%s4926_s30 + $0x68] sm:$0x1]  ;;  %1923 = vst.msk [vmem:[#allocation2 + $0x8] sm:$0xff] %vm1921_vm10, %v5393_v12 }
  0xaf   : > { %v2679_v58 = vsel %vm4969_vm5, %v2674_v2, %v2678_v47  ;;  %2389 = vrot.lane.b32.xlu1 %v4688_v49, %s4841_s9  ;;  %v595_v18 = vrot.slane %v593_v11, 5  ;;  %v4506_v21 = vcombine.low %v3126_v9, %v3129_v16  ;;  %v597_v22 = vshrl.u32 %v365_v55, 16  ;;  %v915_v61 = vld [vmem:[%s4926_s30 + $0x6c] sm:$0xe]  ;;  %v917_v4 = vld [vmem:[%s4926_s30 + $0x74] sm:$0x1] }
  0xb0   : > { %v4427_v15 = vcombine.low %v2669_v13, %v2679_v58  ;;  %v1874_v20 = vpop.permute.xlu0 %1873  ;;  %2932 = vrot.lane.b32.xlu0 %v4426_v26, %s4842_s10  ;;  %v603_v23 = vshll.u32 %v366_v62, 16  ;;  %v4491_v24 = vrot.slane %v4457_v63, 9  ;;  %v590_v25 = vor.u32 %v589_v17, %v586_v14  ;;  %v5411_v43 = vpop.permute.xlu1 %2377  ;;  %v916_v62 = vld [vmem:[%s4926_s30 + $0x70] sm:$0xf]  ;;  %v4204_v26 = vld [vmem:[%s4926_s30 + $0x6c] sm:$0xf] }
  0xb1   : > { %v3132_v27 = vrot.slane %v4458_v6, 5  ;;  %v3135_v28 = vrot.slane %v4459_v7, 5  ;;  %v608_v29 = vshrl.u32 %v367_v3, 16  ;;  %v599_v30 = vrot.slane %v597_v22, 4  ;;  %1922 = vst.msk [vmem:[#allocation2] sm:$0xff] %vm1921_vm10, %v1874_v20  ;;  %v4714_v17 = vld [vmem:[%s4926_s30 + $0x60] sm:$0xff]  }
  0xb2   : > { %v605_v31 = vrot.slane %v603_v23, 5  ;;  %v611_v34 = vshll.u32 %v367_v3, 16  ;;  %v617_v35 = vshll.u32 %v368_v19, 16  ;;  %v591_v36 = vrot.slane %v590_v25, 4  ;;  %v4205_v13 = vld [vmem:[%s4926_s30 + $0x70] sm:$0xf] }
  0xb3   : > { %2934 = vrot.lane.b32.xlu1 %v4427_v15, %s4842_s10  ;;  %v3133_v37 = vsel %vm4928_vm2, %v4491_v24, %v3132_v27  ;;  %v3134_v38 = vrot.slane %v3132_v27, 4  ;;  %v610_v40 = vrot.slane %v608_v29, 4  ;;  %v600_v44 = vor.u32 %v599_v30, %v595_v18  ;;  %v4206_v12 = vld [vmem:[%s4926_s30 + $0x74] sm:$0x1]  ;;  %2243 = vst.msk [vmem:[#allocation2] sm:$0xff] %vm2242_vm11, %v5306_v32  ;;  %2244 = vst.msk [vmem:[#allocation2 + $0x8] sm:$0xff] %vm2242_vm11, %v5357_v39 }
  0xb4   : > { %v5409_v42 = vpop.permute.xlu0 %2375  ;;  %3253 = vrot.lane.b32.xlu0 %v4506_v21, %s4843_s11  ;;  %v613_v45 = vrot.slane %v611_v34, 5  ;;  %v619_v46 = vrot.slane %v617_v35, 5  ;;  %v621_v47 = vshrl.u32 %v368_v19, 16  ;;  %v596_v49 = vsel %vm4969_vm5, %v591_v36, %v595_v18  ;;  %v4207_v19 = vld [vmem:[%s4926_s30 + $0x78] sm:$0xf]  ;;  %332 = vst.msk [vmem:[#allocation2 + $0x40] sm:$0xff] %vm323_vm6, %v4714_v17 }
  0xb5   : > { %v3136_v50 = vsel %vm4928_vm2, %v3134_v38, %v3135_v28  ;;  %v627_v51 = vshll.u32 %v369_v33, 16  ;;  %v601_v55 = vrot.slane %v600_v44, 4  ;;  %v4108_v1 = vrot.slane %v912_v41, 9  ;;  %v4208_v25 = vld [vmem:[%s4926_s30 + $0x7c] sm:$0xf]  ;;  %2424 = vst.msk [vmem:[#allocation2] sm:$0xff] %vm2423_vm12, %v5409_v42 }
  0xb6   : > { %v4507_v56 = vcombine.low %v3133_v37, %v3136_v50  ;;  %v614_v57 = vor.u32 %v613_v45, %v610_v40  ;;  %v623_v59 = vrot.slane %v621_v47, 4  ;;  %v1045_v2 = vrot.slane %v913_v48, 5  ;;  %2425 = vst.msk [vmem:[#allocation2 + $0x8] sm:$0xff] %vm2423_vm12, %v5411_v43  ;;  %v4715_v33 = vld [vmem:[%s4926_s30 + $0x6c] sm:$0xff]   ;;  %v4270_v50 = vld [vmem:[%s4926_s30 + $0x74] sm:$0x1] }
  0xb7   : > { %v629_v63 = vrot.slane %v627_v51, 5  ;;  %v606_v6 = vsel %vm4969_vm5, %v601_v55, %v605_v31  ;;  %v1048_v60 = vrot.slane %v914_v52, 5  ;;  %v4109_v10 = vrot.slane %v915_v61, 9  ;;  %v4209_v31 = vld [vmem:[%s4926_s30 + $0x80] sm:$0x1]  ;;  %v4691_v39 = vld [vmem:[%s4926_s30 + $0x6c] sm:$0xff]  }
  0xb8   : > { %v2921_v5 = vpop.permute.xlu0 %2920  ;;  %3255 = vrot.lane.b32.xlu0 %v4507_v56, %s4843_s11  ;;  %v615_v7 = vrot.slane %v614_v57, 4  ;;  %v624_v54 = vor.u32 %v623_v59, %v619_v46  ;;  %v4092_v3 = vcombine.low %v596_v49, %v606_v6  ;;  %v1046_v8 = vsel %vm4928_vm2, %v4108_v1, %v1045_v2  ;;  %v4268_v38 = vld [vmem:[%s4926_s30 + $0x6c] sm:$0xe]  ;;  %v4269_v44 = vld [vmem:[%s4926_s30 + $0x70] sm:$0xf]  ;;  %333 = vst.msk [vmem:[#allocation2 + $0x48] sm:$0xff] %vm323_vm6, %v4715_v33 }
  0xb9   : > { %v1047_v9 = vrot.slane %v1045_v2, 4  ;;  %v2923_v11 = vpop.permute.xlu1 %2922  ;;  %v1052_v15 = vrot.slane %v916_v62, 5  ;;  %v1055_v16 = vrot.slane %v917_v4, 5  ;;  %v1634_v28 = vshrl.u32 %v4204_v26, 16  ;;  %2969 = vst.msk [vmem:[#allocation2] sm:$0xff] %vm2968_vm13, %v2921_v5  ;;  %v4692_v59 = vld [vmem:[%s4926_s30 + $0x78] sm:$0xff]  }
  0xba   : > { %v620_v58 = vsel %vm4969_vm5, %v615_v7, %v619_v46  ;;  %v625_v14 = vrot.slane %v624_v54, 4  ;;  %839 = vrot.lane.b32.xlu1 %v4092_v3, %s4839_s7  ;;  %v1637_v29 = vshll.u32 %v4204_v26, 16  ;;  %v1643_v30 = vshll.u32 %v4205_v13, 16  ;;  %2970 = vst.msk [vmem:[#allocation2 + $0x8] sm:$0xff] %vm2968_vm13, %v2923_v11  ;;  %v4271_v57 = vld [vmem:[%s4926_s30 + $0x78] sm:$0xe] }
  0xbb   : > { %v1049_v18 = vsel %vm4928_vm2, %v1047_v9, %v1048_v60  ;;  %v1053_v23 = vsel %vm4928_vm2, %v4109_v10, %v1052_v15  ;;  %v1054_v24 = vrot.slane %v1052_v15, 4  ;;  %v1647_v34 = vshrl.u32 %v4205_v13, 16  ;;  %v4272_v1 = vld [vmem:[%s4926_s30 + $0x7c] sm:$0xf]  ;;  %v4273_v7 = vld [vmem:[%s4926_s30 + $0x80] sm:$0x1] }
  0xbc   : > { %v3242_v20 = vpop.permute.xlu0 %3241  ;;  %v630_v21 = vsel %vm4969_vm5, %v625_v14, %v629_v63  ;;  %v4124_v22 = vcombine.low %v1046_v8, %v1049_v18  ;;  %v1653_v35 = vshll.u32 %v4206_v12, 16  ;;  %v1658_v36 = vshrl.u32 %v4207_v19, 16  ;;  %v4699_v54 = vld [vmem:[%s6225_s1 + $0x10] ss:$0 sps:$4 sm:$0x33]  }
  0xbd   : > { %v4093_v27 = vcombine.low %v620_v58, %v630_v21  ;;  %v1056_v32 = vsel %vm4928_vm2, %v1054_v24, %v1055_v16  ;;  %v1636_v41 = vrot.slane %v1634_v28, 4  ;;  %v1639_v42 = vrot.slane %v1637_v29, 5  ;;  %3290 = vst.msk [vmem:[#allocation2] sm:$0xff] %vm3289_vm14, %v3242_v20  ;;  %v4396_v18 = vld [vmem:[%s4926_s30 + $0x78] sm:$0xf]  ;;  %4602 = vmatprep.subr.msk.bf16.mxu0 %vm3391_vm15, %v4699_v54  ;;  %4603 = vmatprep.subr.msk.bf16.mxu1 %vm3391_vm15, %v4699_v54 }
  0xbe   : > { %1163 = vrot.lane.b32.xlu0 %v4124_v22, %s4838_s6  ;;  %v4125_v40 = vcombine.low %v1053_v23, %v1056_v32  ;;  %v1645_v43 = vrot.slane %v1643_v30, 5  ;;  %v1649_v46 = vrot.slane %v1647_v34, 4  ;;  %v1655_v47 = vrot.slane %v1653_v35, 5  ;;  %v4397_v23 = vld [vmem:[%s4926_s30 + $0x7c] sm:$0xf] }
  0xbf   : > { %v828_v37 = vpop.permute.xlu1 %827  ;;  %841 = vrot.lane.b32.xlu1 %v4093_v27, %s4839_s7  ;;  %v1660_v48 = vrot.slane %v1658_v36, 4  ;;  %v1661_v49 = vshll.u32 %v4207_v19, 16  ;;  %v1640_v51 = vor.u32 %v1639_v42, %v1636_v41  ;;  %v1667_v52 = vshll.u32 %v4208_v25, 16  ;;  %v4398_v24 = vld [vmem:[%s4926_s30 + $0x80] sm:$0x1] }
  0xc0   : > { %874 = vst.msk [vmem:[#allocation2 + $0x10] sm:$0xff] %vm871_vm7, %v828_v37  ;;  %v3244_v45 = vpop.permute.xlu0 %3243  ;;  %v1671_v55 = vshrl.u32 %v4208_v25, 16  ;;  %v1677_v56 = vshll.u32 %v4209_v31, 16  ;;  %v1650_v61 = vor.u32 %v1649_v46, %v1645_v43  ;;  %v4300_v63 = vrot.slane %v4268_v38, 9  ;;  %v4399_v30 = vld [vmem:[%s4926_s30 + $0x84] sm:$0xf] }
  0xc1   : > { %v1663_v62 = vrot.slane %v1661_v49, 5  ;;  %v1641_v2 = vrot.slane %v1640_v51, 4  ;;  %v1669_v4 = vrot.slane %v1667_v52, 5  ;;  %3291 = vst.msk [vmem:[#allocation2 + $0x8] sm:$0xff] %vm3289_vm14, %v3244_v45  ;;  %v2092_v8 = vrot.slane %v4269_v44, 5  ;;  %v4697_v44 = vld [vmem:[%s4926_s30 + $0x78] sm:$0xff]  }
  0xc2   : > { %1344 = vrot.lane.b32.xlu0 %v4691_v39, %s4836_s4  ;;  %v1673_v5 = vrot.slane %v1671_v55, 4  ;;  %v1679_v6 = vrot.slane %v1677_v56, 5  ;;  %v1651_v60 = vrot.slane %v1650_v61, 4  ;;  %v2095_v9 = vrot.slane %v4270_v50, 5  ;;  %v4400_v31 = vld [vmem:[%s4926_s30 + $0x88] sm:$0xf] }
  0xc3   : > { %1165 = vrot.lane.b32.xlu1 %v4125_v40, %s4838_s6  ;;  %v1664_v3 = vor.u32 %v1663_v62, %v1660_v48  ;;  %v1646_v26 = vsel %vm4969_vm5, %v1641_v2, %v1645_v43  ;;  %v4301_v58 = vrot.slane %v4271_v57, 9  ;;  %v2099_v14 = vrot.slane %v4272_v1, 5  ;;  %v4401_v41 = vld [vmem:[%s4926_s30 + $0x8c] sm:$0x1]  ;;  %v4460_v48 = vld [vmem:[%s4926_s30 + $0x78] sm:$0xe] }
  0xc4   : > { %v1152_v11 = vpop.permute.xlu0 %1151  ;;  %v1674_v13 = vor.u32 %v1673_v5, %v1669_v4  ;;  %v1656_v15 = vsel %vm4969_vm5, %v1651_v60, %v1655_v47  ;;  %v2093_v12 = vsel %vm4928_vm2, %v4300_v63, %v2092_v8  ;;  %v2094_v17 = vrot.slane %v2092_v8, 4  ;;  %v3306_v37 = vld [vmem:[#allocation2] sm:$0xff]  ;;  %v4461_v56 = vld [vmem:[%s4926_s30 + $0x7c] sm:$0xf] }
  0xc5   : > { %v830_v10 = vpop.permute.xlu1 %829  ;;  %1198 = vst.msk [vmem:[#allocation2 + $0x10] sm:$0xff] %vm1195_vm8, %v1152_v11  ;;  %v1665_v16 = vrot.slane %v1664_v3, 4  ;;  %v4236_v19 = vcombine.low %v1646_v26, %v1656_v15  ;;  %v5496_v21 = vsel %vm4928_vm2, %v4301_v58, %v2099_v14  ;;  %v2101_v22 = vrot.slane %v2099_v14, 4  ;;  %4564 = vmatprep.mubr.msk.bf16.mxu0 %vm3342_vm0, %v3306_v37  ;;  %v4462_v63 = vld [vmem:[%s4926_s30 + $0x80] sm:$0x1] }
  0xc6   : > { %875 = vst.msk [vmem:[#allocation2 + $0x18] sm:$0xff] %vm871_vm7, %v830_v10  ;;  %v1675_v20 = vrot.slane %v1674_v13, 4  ;;  %v2096_v27 = vsel %vm4928_vm2, %v2094_v17, %v2095_v9  ;;  %v2102_v28 = vrot.slane %v4273_v7, 5  ;;  %v3393_v34 = vsel %vm3391_vm15, %v4699_v54, 0  ;;  %v370_v7 = vld [vmem:[%s4926_s30 + $0x78] sm:$0xf] }
  0xc7   : > { %1346 = vrot.lane.b32.xlu1 %v4692_v59, %s4836_s4  ;;  %v1670_v25 = vsel %vm4969_vm5, %v1665_v16, %v1669_v4  ;;  %1889 = vrot.lane.b32.xlu0 %v4236_v19, %s4840_s8  ;;  %v4316_v39 = vcombine.low %v2093_v12, %v2096_v27  ;;  %v2681_v38 = vshrl.u32 %v4396_v18, 16  ;;  %v2684_v40 = vshll.u32 %v4396_v18, 16  ;;  %v371_v9 = vld [vmem:[%s4926_s30 + $0x7c] sm:$0xf]  ;;  %v4698_v10 = vld [vmem:[%s4926_s30 + $0x84] sm:$0xff]  }
  0xc8   : > { %v1333_v33 = vpop.permute.xlu0 %1332  ;;  %v1680_v32 = vsel %vm4969_vm5, %v1675_v20, %v1679_v6  ;;  %v2103_v36 = vsel %vm4928_vm2, %v2101_v22, %v2102_v28  ;;  %4563 = vmatpush3.bf16.msra.mxu0 %v3393_v34  ;;  %v3307_v42 = vld [vmem:[#allocation2 + $0x8] sm:$0xff]  ;;  %v2690_v45 = vshll.u32 %v4397_v23, 16  ;;  %v2694_v46 = vshrl.u32 %v4397_v23, 16  ;;  %4601 = vmatpush3.bf16.msra.mxu1 %v3393_v34  ;;  %v372_v14 = vld [vmem:[%s4926_s30 + $0x80] sm:$0x1] }
  0xc9   : > { %v1154_v29 = vpop.permute.xlu1 %1153  ;;  %1379 = vst.msk [vmem:[#allocation2 + $0x10] sm:$0xff] %vm1376_vm9, %v1333_v33  ;;  %v4237_v35 = vcombine.low %v1670_v25, %v1680_v32  ;;  %v4317_v43 = vcombine.low %v5496_v21, %v2103_v36  ;;  %v2700_v47 = vshll.u32 %v4398_v24, 16  ;;  %v2683_v49 = vrot.slane %v2681_v38, 4  ;;  %v4463_v19 = vld [vmem:[%s4926_s30 + $0x84] sm:$0xe]  ;;  %v4718_v25 = vld [vmem:[%s4926_s30 + $0x78] sm:$0xff]  }
  0xca   : > { %1199 = vst.msk [vmem:[#allocation2 + $0x18] sm:$0xff] %vm1195_vm8, %v1154_v29  ;;  %v2686_v50 = vrot.slane %v2684_v40, 5  ;;  %v2705_v51 = vshrl.u32 %v4399_v30, 16  ;;  %v2708_v52 = vshll.u32 %v4399_v30, 16  ;;  %v2692_v57 = vrot.slane %v2690_v45, 5 }
  0xcb   : > { %1891 = vrot.lane.b32.xlu1 %v4237_v35, %s4840_s8  ;;  %2210 = vrot.lane.b32.xlu0 %v4316_v39, %s4837_s5  ;;  %v2696_v59 = vrot.slane %v2694_v46, 4  ;;  %v2702_v61 = vrot.slane %v2700_v47, 5  ;;  %v2714_v62 = vshll.u32 %v4400_v31, 16  ;;  %v2718_v6 = vshrl.u32 %v4400_v31, 16  ;;  %v4464_v31 = vld [vmem:[%s4926_s30 + $0x88] sm:$0xf] }
  0xcc   : > { %4565 = vmatmul.mubr.msk.bf16.vlgmr.msra.gmra.mrb[0].mxu0 %vm3342_vm0, %v3307_v42  ;;  %v2687_v2 = vor.u32 %v2686_v50, %v2683_v49  ;;  %v2707_v4 = vrot.slane %v2705_v51, 4  ;;  %v2710_v5 = vrot.slane %v2708_v52, 5  ;;  %v2724_v3 = vshll.u32 %v4401_v41, 16  ;;  %v4465_v35 = vld [vmem:[%s4926_s30 + $0x8c] sm:$0x1]  ;;  %334 = vst.msk [vmem:[#allocation2 + $0x50] sm:$0xff] %vm323_vm6, %v4718_v25 }
  0xcd   : > { %v1335_v55 = vpop.permute.xlu1 %1334  ;;  %v2697_v54 = vor.u32 %v2696_v59, %v2692_v57  ;;  %v2716_v60 = vrot.slane %v2714_v62, 5  ;;  %v4492_v8 = vrot.slane %v4460_v48, 9  ;;  %v2720_v13 = vrot.slane %v2718_v6, 4  ;;  %v373_v42 = vld [vmem:[%s4926_s30 + $0x84] sm:$0xf] }
  0xce   : > { %1380 = vst.msk [vmem:[#allocation2 + $0x18] sm:$0xff] %vm1376_vm9, %v1335_v55  ;;  %v1878_v1 = vpop.permute.xlu0 %1877  ;;  %v2688_v11 = vrot.slane %v2687_v2, 4  ;;  %v2711_v26 = vor.u32 %v2710_v5, %v2707_v4  ;;  %v3139_v58 = vrot.slane %v4461_v56, 5  ;;  %v2726_v12 = vrot.slane %v2724_v3, 5  ;;  %v374_v48 = vld [vmem:[%s4926_s30 + $0x88] sm:$0xf] }
  0xcf   : > { %1924 = vst.msk [vmem:[#allocation2 + $0x10] sm:$0xff] %vm1921_vm10, %v1878_v1  ;;  %2212 = vrot.lane.b32.xlu1 %v4317_v43, %s4837_s5  ;;  %2391 = vrot.lane.b32.xlu0 %v4697_v44, %s4841_s9  ;;  %v2698_v16 = vrot.slane %v2697_v54, 4  ;;  %v3142_v17 = vrot.slane %v4462_v63, 5  ;;  %v632_v18 = vshrl.u32 %v370_v7, 16  ;;  %v2721_v23 = vor.u32 %v2720_v13, %v2716_v60  ;;  %v918_v5 = vld [vmem:[%s4926_s30 + $0x78] sm:$0xe] }
  0xd0   : > { %v2693_v21 = vsel %vm4969_vm5, %v2688_v11, %v2692_v57  ;;  %v2712_v22 = vrot.slane %v2711_v26, 4  ;;  %v3140_v24 = vsel %vm4928_vm2, %v4492_v8, %v3139_v58  ;;  %v3141_v28 = vrot.slane %v3139_v58, 4  ;;  %v375_v57 = vld [vmem:[%s4926_s30 + $0x8c] sm:$0x1]  ;;  %v4719_v6 = vld [vmem:[%s4926_s30 + $0x84] sm:$0xff]  }
  0xd1   : > { %v1880_v15 = vpop.permute.xlu1 %1879  ;;  %v2703_v27 = vsel %vm4969_vm5, %v2698_v16, %v2702_v61  ;;  %v634_v29 = vrot.slane %v632_v18, 4  ;;  %v635_v30 = vshll.u32 %v370_v7, 16  ;;  %v2722_v39 = vrot.slane %v2721_v23, 4  ;;  %v919_v8 = vld [vmem:[%s4926_s30 + $0x7c] sm:$0xf]  ;;  %335 = vst.msk [vmem:[#allocation2 + $0x58] sm:$0xff] %vm323_vm6, %v4719_v6 }
  0xd2   : > { %1925 = vst.msk [vmem:[#allocation2 + $0x18] sm:$0xff] %vm1921_vm10, %v1880_v15  ;;  %v2199_v20 = vpop.permute.xlu0 %2198  ;;  %v4428_v33 = vcombine.low %v2693_v21, %v2703_v27  ;;  %v2717_v32 = vsel %vm4969_vm5, %v2712_v22, %v2716_v60  ;;  %v641_v34 = vshll.u32 %v371_v9, 16  ;;  %v3143_v37 = vsel %vm4928_vm2, %v3141_v28, %v3142_v17  ;;  %v920_v58 = vld [vmem:[%s4926_s30 + $0x80] sm:$0x1]  ;;  %v921_v17 = vld [vmem:[%s4926_s30 + $0x84] sm:$0xe] }
  0xd3   : > { %2245 = vst.msk [vmem:[#allocation2 + $0x10] sm:$0xff] %vm2242_vm11, %v2199_v20  ;;  %2393 = vrot.lane.b32.xlu1 %v4698_v10, %s4841_s9  ;;  %v637_v38 = vrot.slane %v635_v30, 5  ;;  %v645_v40 = vshrl.u32 %v371_v9, 16  ;;  %v651_v41 = vshll.u32 %v372_v14, 16  ;;  %v2727_v44 = vsel %vm4969_vm5, %v2722_v39, %v2726_v12  ;;  %v922_v18 = vld [vmem:[%s4926_s30 + $0x88] sm:$0xf] }
  0xd4   : > { %2936 = vrot.lane.b32.xlu0 %v4428_v33, %s4842_s10  ;;  %v4508_v45 = vcombine.low %v3140_v24, %v3143_v37  ;;  %v643_v46 = vrot.slane %v641_v34, 5  ;;  %v4493_v47 = vrot.slane %v4463_v19, 9  ;;  %v4429_v49 = vcombine.low %v2717_v32, %v2727_v44  ;;  %v923_v24 = vld [vmem:[%s4926_s30 + $0x8c] sm:$0x1]  ;;  %v4210_v25 = vld [vmem:[%s4926_s30 + $0x84] sm:$0xf] }
  0xd5   : > { %v2201_v36 = vpop.permute.xlu1 %2200  ;;  %v638_v50 = vor.u32 %v637_v38, %v634_v29  ;;  %v647_v51 = vrot.slane %v645_v40, 4  ;;  %v653_v52 = vrot.slane %v651_v41, 5  ;;  %v3146_v55 = vrot.slane %v4464_v31, 5  ;;  %v4211_v31 = vld [vmem:[%s4926_s30 + $0x88] sm:$0xf] }
  0xd6   : > { %2246 = vst.msk [vmem:[#allocation2 + $0x18] sm:$0xff] %vm2242_vm11, %v2201_v36  ;;  %v2380_v43 = vpop.permute.xlu0 %2379  ;;  %v3149_v56 = vrot.slane %v4465_v35, 5  ;;  %v656_v59 = vshrl.u32 %v373_v42, 16  ;;  %v659_v61 = vshll.u32 %v373_v42, 16  ;;  %v665_v2 = vshll.u32 %v374_v48, 16 }
  0xd7   : > { %2426 = vst.msk [vmem:[#allocation2 + $0x10] sm:$0xff] %vm2423_vm12, %v2380_v43  ;;  %2938 = vrot.lane.b32.xlu1 %v4429_v49, %s4842_s10  ;;  %v639_v63 = vrot.slane %v638_v50, 4  ;;  %v648_v1 = vor.u32 %v647_v51, %v643_v46  ;;  %v669_v4 = vshrl.u32 %v374_v48, 16  ;;  %v3147_v7 = vsel %vm4928_vm2, %v4493_v47, %v3146_v55  ;;  %v4212_v43 = vld [vmem:[%s4926_s30 + $0x8c] sm:$0x1] }
  0xd8   : > { %3257 = vrot.lane.b32.xlu0 %v4508_v45, %s4843_s11  ;;  %v3148_v54 = vrot.slane %v3146_v55, 4  ;;  %v658_v60 = vrot.slane %v656_v59, 4  ;;  %v661_v3 = vrot.slane %v659_v61, 5  ;;  %v667_v26 = vrot.slane %v665_v2, 5  ;;  %v4214_v51 = vld [vmem:[%s4926_s30 + $0x94] sm:$0xf] }
  0xd9   : > { %v2382_v62 = vpop.permute.xlu1 %2381  ;;  %v644_v10 = vsel %vm4969_vm5, %v639_v63, %v643_v46  ;;  %v649_v11 = vrot.slane %v648_v1, 4  ;;  %v671_v13 = vrot.slane %v669_v4, 4  ;;  %v675_v16 = vshll.u32 %v375_v57, 16  ;;  %v4213_v46 = vld [vmem:[%s4926_s30 + $0x90] sm:$0xf]  ;;  %v4700_v2 = vld [vmem:[%s4926_s30 + $0x84] sm:$0xff]  }
  0xda   : > { %2427 = vst.msk [vmem:[#allocation2 + $0x18] sm:$0xff] %vm2423_vm12, %v2382_v62  ;;  %v2925_v9 = vpop.permute.xlu0 %2924  ;;  %v3150_v14 = vsel %vm4928_vm2, %v3148_v54, %v3149_v56  ;;  %v662_v15 = vor.u32 %v661_v3, %v658_v60  ;;  %v4110_v12 = vrot.slane %v918_v5, 9  ;;  %v1059_v23 = vrot.slane %v919_v8, 5  ;;  %v4274_v63 = vld [vmem:[%s4926_s30 + $0x84] sm:$0xe] }
  0xdb   : > { %2971 = vst.msk [vmem:[#allocation2 + $0x10] sm:$0xff] %vm2968_vm13, %v2925_v9  ;;  %v654_v20 = vsel %vm4969_vm5, %v649_v11, %v653_v52  ;;  %v4509_v21 = vcombine.low %v3147_v7, %v3150_v14  ;;  %v672_v22 = vor.u32 %v671_v13, %v667_v26  ;;  %v677_v29 = vrot.slane %v675_v16, 5  ;;  %v4215_v52 = vld [vmem:[%s4926_s30 + $0x98] sm:$0x1]  ;;  %v4275_v7 = vld [vmem:[%s4926_s30 + $0x88] sm:$0xf] }
  0xdc   : > { %v4094_v27 = vcombine.low %v644_v10, %v654_v20  ;;  %v663_v28 = vrot.slane %v662_v15, 4  ;;  %v1062_v30 = vrot.slane %v920_v58, 5  ;;  %v1060_v39 = vsel %vm4928_vm2, %v4110_v12, %v1059_v23  ;;  %v4276_v9 = vld [vmem:[%s4926_s30 + $0x8c] sm:$0x1]  ;;  %v4277_v58 = vld [vmem:[%s4926_s30 + $0x90] sm:$0xe] }
  0xdd   : > { %v2927_v19 = vpop.permute.xlu1 %2926  ;;  %3259 = vrot.lane.b32.xlu0 %v4509_v21, %s4843_s11  ;;  %v673_v32 = vrot.slane %v672_v22, 4  ;;  %v1061_v34 = vrot.slane %v1059_v23, 4  ;;  %v4111_v35 = vrot.slane %v921_v17, 9  ;;  %v1066_v37 = vrot.slane %v922_v18, 5  ;;  %v4278_v14 = vld [vmem:[%s4926_s30 + $0x94] sm:$0xf] }
  0xde   : > { %2972 = vst.msk [vmem:[#allocation2 + $0x18] sm:$0xff] %vm2968_vm13, %v2927_v19  ;;  %v3246_v33 = vpop.permute.xlu0 %3245  ;;  %843 = vrot.lane.b32.xlu1 %v4094_v27, %s4839_s7  ;;  %v668_v36 = vsel %vm4969_vm5, %v663_v28, %v667_v26  ;;  %v1069_v38 = vrot.slane %v923_v24, 5  ;;  %v1682_v40 = vshrl.u32 %v4210_v25, 16  ;;  %v1685_v44 = vshll.u32 %v4210_v25, 16  ;;  %v4279_v15 = vld [vmem:[%s4926_s30 + $0x98] sm:$0x1] }
  0xdf   : > { %3292 = vst.msk [vmem:[#allocation2 + $0x10] sm:$0xff] %vm3289_vm14, %v3246_v33  ;;  %v678_v41 = vsel %vm4969_vm5, %v673_v32, %v677_v29  ;;  %v1063_v42 = vsel %vm4928_vm2, %v1061_v34, %v1062_v30  ;;  %v1691_v45 = vshll.u32 %v4211_v31, 16  ;;  %v1067_v49 = vsel %vm4928_vm2, %v4111_v35, %v1066_v37  ;;  %v4701_v20 = vld [vmem:[%s4926_s30 + $0x90] sm:$0xff]  }
  0xe0   : > { %v4095_v47 = vcombine.low %v668_v36, %v678_v41  ;;  %v4126_v48 = vcombine.low %v1060_v39, %v1063_v42  ;;  %v1068_v50 = vrot.slane %v1066_v37, 4  ;;  %v1684_v57 = vrot.slane %v1682_v40, 4  ;;  %v4402_v35 = vld [vmem:[%s4926_s30 + $0x90] sm:$0xf]  ;;  %v4403_v42 = vld [vmem:[%s4926_s30 + $0x94] sm:$0xf] }
  0xe1   : > { %v1687_v59 = vrot.slane %v1685_v44, 5  ;;  %v1693_v61 = vrot.slane %v1691_v45, 5  ;;  %v1695_v62 = vshrl.u32 %v4211_v31, 16  ;;  %v1701_v4 = vshll.u32 %v4212_v43, 16 }
  0xe2   : > { %v3248_v56 = vpop.permute.xlu0 %3247  ;;  %845 = vrot.lane.b32.xlu1 %v4095_v47, %s4839_s7  ;;  %1167 = vrot.lane.b32.xlu0 %v4126_v48, %s4838_s6  ;;  %v1070_v1 = vsel %vm4928_vm2, %v1068_v50, %v1069_v38  ;;  %v1706_v5 = vshrl.u32 %v4213_v46, 16  ;;  %v1709_v6 = vshll.u32 %v4213_v46, 16  ;;  %v1715_v8 = vshll.u32 %v4214_v51, 16  ;;  %v4404_v47 = vld [vmem:[%s4926_s30 + $0x98] sm:$0x1] }
  0xe3   : > { %v832_v55 = vpop.permute.xlu1 %831  ;;  %3293 = vst.msk [vmem:[#allocation2 + $0x18] sm:$0xff] %vm3289_vm14, %v3248_v56  ;;  %v4127_v54 = vcombine.low %v1067_v49, %v1070_v1  ;;  %v1688_v60 = vor.u32 %v1687_v59, %v1684_v57  ;;  %v1697_v3 = vrot.slane %v1695_v62, 4  ;;  %v1703_v10 = vrot.slane %v1701_v4, 5  ;;  %v4405_v56 = vld [vmem:[%s4926_s30 + $0x9c] sm:$0xf] }
  0xe4   : > { %876 = vst.msk [vmem:[#allocation2 + $0x20] sm:$0xff] %vm871_vm7, %v832_v55  ;;  %v1708_v11 = vrot.slane %v1706_v5, 4  ;;  %v1711_v26 = vrot.slane %v1709_v6, 5  ;;  %v1719_v13 = vshrl.u32 %v4214_v51, 16  ;;  %v1717_v18 = vrot.slane %v1715_v8, 5 }
  0xe5   : > { %v1689_v12 = vrot.slane %v1688_v60, 4  ;;  %v1698_v17 = vor.u32 %v1697_v3, %v1693_v61  ;;  %v1725_v19 = vshll.u32 %v4215_v52, 16  ;;  %v4302_v23 = vrot.slane %v4274_v63, 9  ;;  %v4406_v57 = vld [vmem:[%s4926_s30 + $0xa0] sm:$0xf] }
  0xe6   : > { %v3308_v16 = vld [vmem:[#allocation2 + $0x10] sm:$0xff]  ;;  %1169 = vrot.lane.b32.xlu1 %v4127_v54, %s4838_s6  ;;  %1348 = vrot.lane.b32.xlu0 %v4700_v2, %s4836_s4  ;;  %v1712_v21 = vor.u32 %v1711_v26, %v1708_v11  ;;  %v1721_v22 = vrot.slane %v1719_v13, 4  ;;  %v2106_v24 = vrot.slane %v4275_v7, 5  ;;  %v2109_v30 = vrot.slane %v4276_v9, 5  ;;  %v4407_v6 = vld [vmem:[%s4926_s30 + $0xa4] sm:$0x1] }
  0xe7   : > { %4568 = vmatprep.mubr.msk.bf16.mxu0 %vm3342_vm0, %v3308_v16  ;;  %v1694_v27 = vsel %vm4969_vm5, %v1689_v12, %v1693_v61  ;;  %v1699_v28 = vrot.slane %v1698_v17, 4  ;;  %v1727_v29 = vrot.slane %v1725_v19, 5  ;;  %v4303_v38 = vrot.slane %v4277_v58, 9  ;;  %v4704_v54 = vld [vmem:[%s4926_s30 + $0x90] sm:$0xff]   ;;  %v4468_v19 = vld [vmem:[%s4926_s30 + $0x98] sm:$0x1] }
  0xe8   : > { %v1156_v25 = vpop.permute.xlu0 %1155  ;;  %v1713_v33 = vrot.slane %v1712_v21, 4  ;;  %v1722_v32 = vor.u32 %v1721_v22, %v1717_v18  ;;  %v2107_v39 = vsel %vm4928_vm2, %v4302_v23, %v2106_v24  ;;  %v2108_v34 = vrot.slane %v2106_v24, 4  ;;  %v4466_v9 = vld [vmem:[%s4926_s30 + $0x90] sm:$0xe] }
  0xe9   : > { %v834_v31 = vpop.permute.xlu1 %833  ;;  %1200 = vst.msk [vmem:[#allocation2 + $0x20] sm:$0xff] %vm1195_vm8, %v1156_v25  ;;  %v1704_v37 = vsel %vm4969_vm5, %v1699_v28, %v1703_v10  ;;  %v2113_v40 = vrot.slane %v4278_v14, 5  ;;  %v2116_v41 = vrot.slane %v4279_v15, 5  ;;  %v2729_v55 = vshrl.u32 %v4402_v35, 16  ;;  %v4467_v14 = vld [vmem:[%s4926_s30 + $0x94] sm:$0xf] }
  0xea   : > { %877 = vst.msk [vmem:[#allocation2 + $0x28] sm:$0xff] %vm871_vm7, %v834_v31  ;;  %v3309_v36 = vld [vmem:[#allocation2 + $0x18] sm:$0xff]  ;;  %1350 = vrot.lane.b32.xlu1 %v4701_v20, %s4836_s4  ;;  %v4238_v43 = vcombine.low %v1694_v27, %v1704_v37  ;;  %v1718_v44 = vsel %vm4969_vm5, %v1713_v33, %v1717_v18  ;;  %v1723_v45 = vrot.slane %v1722_v32, 4  ;;  %v2110_v46 = vsel %vm4928_vm2, %v2108_v34, %v2109_v30  ;;  %v376_v20 = vld [vmem:[%s4926_s30 + $0x90] sm:$0xf] }
  0xeb   : > { %4569 = vmatmul.mubr.msk.bf16.gmra.mrb[4].mxu0 %vm3342_vm0, %v3309_v36  ;;  %v4318_v49 = vcombine.low %v2107_v39, %v2110_v46  ;;  %v2114_v50 = vsel %vm4928_vm2, %v4303_v38, %v2113_v40  ;;  %v2115_v51 = vrot.slane %v2113_v40, 4  ;;  %v2732_v61 = vshll.u32 %v4402_v35, 16  ;;  %v377_v25 = vld [vmem:[%s4926_s30 + $0x94] sm:$0xf]  ;;  %v378_v31 = vld [vmem:[%s4926_s30 + $0x98] sm:$0x1] }
  0xec   : > { %v1337_v48 = vpop.permute.xlu0 %1336  ;;  %1893 = vrot.lane.b32.xlu0 %v4238_v43, %s4840_s8  ;;  %v1728_v59 = vsel %vm4969_vm5, %v1723_v45, %v1727_v29  ;;  %v2738_v62 = vshll.u32 %v4403_v42, 16  ;;  %v2742_v63 = vshrl.u32 %v4403_v42, 16  ;;  %v2731_v4 = vrot.slane %v2729_v55, 4  ;;  %v4705_v33 = vld [vmem:[%s4926_s30 + $0x9c] sm:$0xff]  }
  0xed   : > { %v1158_v52 = vpop.permute.xlu1 %1157  ;;  %1381 = vst.msk [vmem:[#allocation2 + $0x20] sm:$0xff] %vm1376_vm9, %v1337_v48  ;;  %v4239_v1 = vcombine.low %v1718_v44, %v1728_v59  ;;  %v2117_v2 = vsel %vm4928_vm2, %v2115_v51, %v2116_v41  ;;  %v2748_v5 = vshll.u32 %v4404_v47, 16  ;;  %v2734_v60 = vrot.slane %v2732_v61, 5  ;;  %v4469_v43 = vld [vmem:[%s4926_s30 + $0x9c] sm:$0xe]  ;;  %v4720_v44 = vld [vmem:[%s4926_s30 + $0x90] sm:$0xff]  }
  0xee   : > { %1201 = vst.msk [vmem:[#allocation2 + $0x28] sm:$0xff] %vm1195_vm8, %v1158_v52  ;;  %v4319_v7 = vcombine.low %v2114_v50, %v2117_v2  ;;  %v2740_v3 = vrot.slane %v2738_v62, 5  ;;  %v2744_v8 = vrot.slane %v2742_v63, 4  ;;  %v2753_v11 = vshrl.u32 %v4405_v56, 16  ;;  %v4470_v55 = vld [vmem:[%s4926_s30 + $0xa0] sm:$0xf] }
  0xef   : > { %1895 = vrot.lane.b32.xlu1 %v4239_v1, %s4840_s8  ;;  %v2750_v10 = vrot.slane %v2748_v5, 5  ;;  %v2756_v26 = vshll.u32 %v4405_v56, 16  ;;  %v2762_v13 = vshll.u32 %v4406_v57, 16  ;;  %v2735_v16 = vor.u32 %v2734_v60, %v2731_v4  ;;  %336 = vst.msk [vmem:[#allocation2 + $0x60] sm:$0xff] %vm323_vm6, %v4720_v44  ;;  %v4471_v62 = vld [vmem:[%s4926_s30 + $0xa4] sm:$0x1] }
  0xf0   : > { %2214 = vrot.lane.b32.xlu0 %v4318_v49, %s4837_s5  ;;  %v2745_v12 = vor.u32 %v2744_v8, %v2740_v3  ;;  %v2766_v17 = vshrl.u32 %v4406_v57, 16  ;;  %v2772_v18 = vshll.u32 %v4407_v6, 16  ;;  %v2755_v21 = vrot.slane %v2753_v11, 4  ;;  %v379_v63 = vld [vmem:[%s4926_s30 + $0x9c] sm:$0xf] }
  0xf1   : > { %v1339_v58 = vpop.permute.xlu1 %1338  ;;  %v1882_v15 = vpop.permute.xlu0 %1881  ;;  %v2758_v22 = vrot.slane %v2756_v26, 5  ;;  %v2764_v23 = vrot.slane %v2762_v13, 5  ;;  %v4494_v24 = vrot.slane %v4466_v9, 9  ;;  %v2736_v27 = vrot.slane %v2735_v16, 4  ;;  %v4721_v60 = vld [vmem:[%s4926_s30 + $0x9c] sm:$0xff]  }
  0xf2   : > { %1382 = vst.msk [vmem:[#allocation2 + $0x28] sm:$0xff] %vm1376_vm9, %v1339_v58  ;;  %v2746_v28 = vrot.slane %v2745_v12, 4  ;;  %v2768_v29 = vrot.slane %v2766_v17, 4  ;;  %v2774_v30 = vrot.slane %v2772_v18, 5  ;;  %v3153_v39 = vrot.slane %v4467_v14, 5 }
  0xf3   : > { %1926 = vst.msk [vmem:[#allocation2 + $0x20] sm:$0xff] %vm1921_vm10, %v1882_v15  ;;  %2216 = vrot.lane.b32.xlu1 %v4319_v7, %s4837_s5  ;;  %v2759_v32 = vor.u32 %v2758_v22, %v2755_v21  ;;  %v3156_v34 = vrot.slane %v4468_v19, 5  ;;  %v680_v35 = vshrl.u32 %v376_v20, 16  ;;  %v2741_v38 = vsel %vm4969_vm5, %v2736_v27, %v2740_v3  ;;  %v381_v11 = vld [vmem:[%s4926_s30 + $0xa4] sm:$0x1] }
  0xf4   : > { %2395 = vrot.lane.b32.xlu0 %v4704_v54, %s4841_s9  ;;  %v2751_v40 = vsel %vm4969_vm5, %v2746_v28, %v2750_v10  ;;  %v2769_v41 = vor.u32 %v2768_v29, %v2764_v23  ;;  %v683_v42 = vshll.u32 %v376_v20, 16  ;;  %v3154_v47 = vsel %vm4928_vm2, %v4494_v24, %v3153_v39  ;;  %v380_v54 = vld [vmem:[%s4926_s30 + $0xa0] sm:$0xf]  ;;  %v924_v15 = vld [vmem:[%s4926_s30 + $0x90] sm:$0xe]  ;;  %337 = vst.msk [vmem:[#allocation2 + $0x68] sm:$0xff] %vm323_vm6, %v4721_v60 }
  0xf5   : > { %v1884_v36 = vpop.permute.xlu1 %1883  ;;  %v2203_v37 = vpop.permute.xlu0 %2202  ;;  %v4430_v45 = vcombine.low %v2741_v38, %v2751_v40  ;;  %v2760_v46 = vrot.slane %v2759_v32, 4  ;;  %v3155_v48 = vrot.slane %v3153_v39, 4  ;;  %v682_v50 = vrot.slane %v680_v35, 4  ;;  %v925_v19 = vld [vmem:[%s4926_s30 + $0x94] sm:$0xf] }
  0xf6   : > { %1927 = vst.msk [vmem:[#allocation2 + $0x28] sm:$0xff] %vm1921_vm10, %v1884_v36  ;;  %v2770_v49 = vrot.slane %v2769_v41, 4  ;;  %v685_v51 = vrot.slane %v683_v42, 5  ;;  %v689_v52 = vshll.u32 %v377_v25, 16  ;;  %v693_v59 = vshrl.u32 %v377_v25, 16 }
  0xf7   : > { %2247 = vst.msk [vmem:[#allocation2 + $0x20] sm:$0xff] %vm2242_vm11, %v2203_v37  ;;  %2397 = vrot.lane.b32.xlu1 %v4705_v33, %s4841_s9  ;;  %v2765_v56 = vsel %vm4969_vm5, %v2760_v46, %v2764_v23  ;;  %v3157_v57 = vsel %vm4928_vm2, %v3155_v48, %v3156_v34  ;;  %v699_v61 = vshll.u32 %v378_v31, 16  ;;  %v4495_v10 = vrot.slane %v4469_v43, 9  ;;  %v926_v31 = vld [vmem:[%s4926_s30 + $0x98] sm:$0x1] }
  0xf8   : > { %2940 = vrot.lane.b32.xlu0 %v4430_v45, %s4842_s10  ;;  %v2775_v4 = vsel %vm4969_vm5, %v2770_v49, %v2774_v30  ;;  %v4510_v5 = vcombine.low %v3154_v47, %v3157_v57  ;;  %v686_v6 = vor.u32 %v685_v51, %v682_v50  ;;  %v691_v7 = vrot.slane %v689_v52, 5  ;;  %v927_v35 = vld [vmem:[%s4926_s30 + $0x9c] sm:$0xe]  ;;  %v928_v41 = vld [vmem:[%s4926_s30 + $0xa0] sm:$0xf] }
  0xf9   : > { %v2205_v1 = vpop.permute.xlu1 %2204  ;;  %v2384_v2 = vpop.permute.xlu0 %2383  ;;  %v4431_v3 = vcombine.low %v2765_v56, %v2775_v4  ;;  %v695_v8 = vrot.slane %v693_v59, 4  ;;  %v701_v9 = vrot.slane %v699_v61, 5  ;;  %v3160_v13 = vrot.slane %v4470_v55, 5  ;;  %v929_v42 = vld [vmem:[%s4926_s30 + $0xa4] sm:$0x1] }
  0xfa   : > { %2248 = vst.msk [vmem:[#allocation2 + $0x28] sm:$0xff] %vm2242_vm11, %v2205_v1  ;;  %v687_v26 = vrot.slane %v686_v6, 4  ;;  %v3163_v58 = vrot.slane %v4471_v62, 5  ;;  %v704_v14 = vshrl.u32 %v379_v63, 16  ;;  %v707_v12 = vshll.u32 %v379_v63, 16 }
  0xfb   : > { %2428 = vst.msk [vmem:[#allocation2 + $0x20] sm:$0xff] %vm2423_vm12, %v2384_v2  ;;  %2942 = vrot.lane.b32.xlu1 %v4431_v3, %s4842_s10  ;;  %v696_v16 = vor.u32 %v695_v8, %v691_v7  ;;  %v713_v17 = vshll.u32 %v380_v54, 16  ;;  %v717_v18 = vshrl.u32 %v380_v54, 16  ;;  %v3161_v22 = vsel %vm4928_vm2, %v4495_v10, %v3160_v13  ;;  %v4216_v44 = vld [vmem:[%s4926_s30 + $0x9c] sm:$0xf] }
  0xfc   : > { %3261 = vrot.lane.b32.xlu0 %v4510_v5, %s4843_s11  ;;  %v692_v21 = vsel %vm4969_vm5, %v687_v26, %v691_v7  ;;  %v3162_v23 = vrot.slane %v3160_v13, 4  ;;  %v706_v24 = vrot.slane %v704_v14, 4  ;;  %v709_v28 = vrot.slane %v707_v12, 5  ;;  %v4217_v49 = vld [vmem:[%s4926_s30 + $0xa0] sm:$0xf] }
  0xfd   : > { %v2386_v20 = vpop.permute.xlu1 %2385  ;;  %v697_v27 = vrot.slane %v696_v16, 4  ;;  %v715_v29 = vrot.slane %v713_v17, 5  ;;  %v719_v30 = vrot.slane %v717_v18, 4  ;;  %v723_v32 = vshll.u32 %v381_v11, 16  ;;  %v4218_v4 = vld [vmem:[%s4926_s30 + $0xa4] sm:$0x1] }
  0xfe   : > { %2429 = vst.msk [vmem:[#allocation2 + $0x28] sm:$0xff] %vm2423_vm12, %v2386_v20  ;;  %v2929_v25 = vpop.permute.xlu0 %2928  ;;  %v3164_v33 = vsel %vm4928_vm2, %v3162_v23, %v3163_v58  ;;  %v4112_v39 = vrot.slane %v924_v15, 9  ;;  %v1073_v34 = vrot.slane %v925_v19, 5  ;;  %v710_v38 = vor.u32 %v709_v28, %v706_v24  ;;  %v4219_v6 = vld [vmem:[%s4926_s30 + $0xa8] sm:$0xf]  ;;  %v4706_v17 = vld [vmem:[%s4926_s30 + $0x9c] sm:$0xff]  }
  0xff   : > { %2973 = vst.msk [vmem:[#allocation2 + $0x20] sm:$0xff] %vm2968_vm13, %v2929_v25  ;;  %v702_v36 = vsel %vm4969_vm5, %v697_v27, %v701_v9  ;;  %v4511_v37 = vcombine.low %v3161_v22, %v3164_v33  ;;  %v720_v40 = vor.u32 %v719_v30, %v715_v29  ;;  %v725_v46 = vrot.slane %v723_v32, 5  ;;  %v4220_v8 = vld [vmem:[%s4926_s30 + $0xac] sm:$0xf]  ;;  %v4221_v9 = vld [vmem:[%s4926_s30 + $0xb0] sm:$0x1] }
 0x100   : > { %v4096_v45 = vcombine.low %v692_v21, %v702_v36  ;;  %v1074_v47 = vsel %vm4928_vm2, %v4112_v39, %v1073_v34  ;;  %v1075_v48 = vrot.slane %v1073_v34, 4  ;;  %v711_v51 = vrot.slane %v710_v38, 4  ;;  %v4280_v15 = vld [vmem:[%s4926_s30 + $0x9c] sm:$0xe]  ;;  %v4281_v16 = vld [vmem:[%s4926_s30 + $0xa0] sm:$0xf] }
 0x101   : > { %v2931_v43 = vpop.permute.xlu1 %2930  ;;  %3263 = vrot.lane.b32.xlu0 %v4511_v37, %s4843_s11  ;;  %v721_v52 = vrot.slane %v720_v40, 4  ;;  %v1076_v55 = vrot.slane %v926_v31, 5  ;;  %v4113_v56 = vrot.slane %v927_v35, 9  ;;  %v1080_v57 = vrot.slane %v928_v41, 5  ;;  %v4282_v21 = vld [vmem:[%s4926_s30 + $0xa4] sm:$0x1] }
 0x102   : > { %2974 = vst.msk [vmem:[#allocation2 + $0x28] sm:$0xff] %vm2968_vm13, %v2931_v43  ;;  %v3250_v50 = vpop.permute.xlu0 %3249  ;;  %847 = vrot.lane.b32.xlu1 %v4096_v45, %s4839_s7  ;;  %v1083_v59 = vrot.slane %v929_v42, 5  ;;  %v1730_v61 = vshrl.u32 %v4216_v44, 16  ;;  %v1733_v62 = vshll.u32 %v4216_v44, 16  ;;  %v716_v63 = vsel %vm4969_vm5, %v711_v51, %v715_v29  ;;  %v4283_v31 = vld [vmem:[%s4926_s30 + $0xa8] sm:$0xe] }
 0x103   : > { %3294 = vst.msk [vmem:[#allocation2 + $0x20] sm:$0xff] %vm3289_vm14, %v3250_v50  ;;  %v726_v1 = vsel %vm4969_vm5, %v721_v52, %v725_v46  ;;  %v1077_v2 = vsel %vm4928_vm2, %v1075_v48, %v1076_v55  ;;  %v1739_v5 = vshll.u32 %v4217_v49, 16  ;;  %v1081_v60 = vsel %vm4928_vm2, %v4113_v56, %v1080_v57  ;;  %v4284_v33 = vld [vmem:[%s4926_s30 + $0xac] sm:$0xf]  ;;  %v4285_v43 = vld [vmem:[%s4926_s30 + $0xb0] sm:$0x1] }
 0x104   : > { %v4097_v7 = vcombine.low %v716_v63, %v726_v1  ;;  %v4128_v54 = vcombine.low %v1074_v47, %v1077_v2  ;;  %v1082_v3 = vrot.slane %v1080_v57, 4  ;;  %v1732_v26 = vrot.slane %v1730_v61, 4  ;;  %v4707_v37 = vld [vmem:[%s4926_s30 + $0xa8] sm:$0xff]  }
 0x105   : > { %v1735_v13 = vrot.slane %v1733_v62, 5  ;;  %v1741_v58 = vrot.slane %v1739_v5, 5  ;;  %v1743_v14 = vshrl.u32 %v4217_v49, 16  ;;  %v1749_v18 = vshll.u32 %v4218_v4, 16  ;;  %v4408_v56 = vld [vmem:[%s4926_s30 + $0xa8] sm:$0xf] }
 0x106   : > { %v3252_v11 = vpop.permute.xlu0 %3251  ;;  %849 = vrot.lane.b32.xlu1 %v4097_v7, %s4839_s7  ;;  %1171 = vrot.lane.b32.xlu0 %v4128_v54, %s4838_s6  ;;  %v1084_v12 = vsel %vm4928_vm2, %v1082_v3, %v1083_v59  ;;  %v1754_v19 = vshrl.u32 %v4219_v6, 16  ;;  %v1757_v20 = vshll.u32 %v4219_v6, 16  ;;  %v1763_v25 = vshll.u32 %v4220_v8, 16  ;;  %v4409_v1 = vld [vmem:[%s4926_s30 + $0xac] sm:$0xf] }
 0x107   : > { %v836_v10 = vpop.permute.xlu1 %835  ;;  %3295 = vst.msk [vmem:[#allocation2 + $0x28] sm:$0xff] %vm3289_vm14, %v3252_v11  ;;  %v4129_v22 = vcombine.low %v1081_v60, %v1084_v12  ;;  %v1736_v23 = vor.u32 %v1735_v13, %v1732_v26  ;;  %v1745_v24 = vrot.slane %v1743_v14, 4  ;;  %v1751_v27 = vrot.slane %v1749_v18, 5  ;;  %v4410_v7 = vld [vmem:[%s4926_s30 + $0xb0] sm:$0x1] }
 0x108   : > { %878 = vst.msk [vmem:[#allocation2 + $0x30] sm:$0xff] %vm871_vm7, %v836_v10  ;;  %v1756_v28 = vrot.slane %v1754_v19, 4  ;;  %v1759_v29 = vrot.slane %v1757_v20, 5  ;;  %v1767_v30 = vshrl.u32 %v4220_v8, 16  ;;  %v1765_v35 = vrot.slane %v1763_v25, 5 }
 0x109   : > { %v1737_v39 = vrot.slane %v1736_v23, 4  ;;  %v1746_v34 = vor.u32 %v1745_v24, %v1741_v58  ;;  %v1773_v36 = vshll.u32 %v4221_v9, 16  ;;  %v4304_v41 = vrot.slane %v4280_v15, 9  ;;  %v4411_v54 = vld [vmem:[%s4926_s30 + $0xb4] sm:$0xf] }
 0x10a   : > { %v3310_v32 = vld [vmem:[#allocation2 + $0x20] sm:$0xff]  ;;  %1173 = vrot.lane.b32.xlu1 %v4129_v22, %s4838_s6  ;;  %1352 = vrot.lane.b32.xlu0 %v4706_v17, %s4836_s4  ;;  %v1760_v38 = vor.u32 %v1759_v29, %v1756_v28  ;;  %v1769_v40 = vrot.slane %v1767_v30, 4  ;;  %v2120_v42 = vrot.slane %v4281_v16, 5  ;;  %v2123_v48 = vrot.slane %v4282_v21, 5  ;;  %v4412_v15 = vld [vmem:[%s4926_s30 + $0xb8] sm:$0xf] }
 0x10b   : > { %4572 = vmatprep.mubr.msk.bf16.mxu0 %vm3342_vm0, %v3310_v32  ;;  %v1742_v45 = vsel %vm4969_vm5, %v1737_v39, %v1741_v58  ;;  %v1747_v46 = vrot.slane %v1746_v34, 4  ;;  %v1775_v47 = vrot.slane %v1773_v36, 5  ;;  %v4305_v61 = vrot.slane %v4283_v31, 9  ;;  %v4413_v19 = vld [vmem:[%s4926_s30 + $0xbc] sm:$0x1]  ;;  %v4710_v22 = vld [vmem:[%s4926_s30 + $0xa8] sm:$0xff]  }
 0x10c   : > { %v1160_v44 = vpop.permute.xlu0 %1159  ;;  %v1761_v50 = vrot.slane %v1760_v38, 4  ;;  %v1770_v51 = vor.u32 %v1769_v40, %v1765_v35  ;;  %v2121_v52 = vsel %vm4928_vm2, %v4304_v41, %v2120_v42  ;;  %v2122_v55 = vrot.slane %v2120_v42, 4  ;;  %v4472_v20 = vld [vmem:[%s4926_s30 + $0xa8] sm:$0xe]  ;;  %v4474_v32 = vld [vmem:[%s4926_s30 + $0xb0] sm:$0x1] }
 0x10d   : > { %v838_v49 = vpop.permute.xlu1 %837  ;;  %1202 = vst.msk [vmem:[#allocation2 + $0x30] sm:$0xff] %vm1195_vm8, %v1160_v44  ;;  %v1752_v59 = vsel %vm4969_vm5, %v1747_v46, %v1751_v27  ;;  %v2127_v62 = vrot.slane %v4284_v33, 5  ;;  %v2130_v63 = vrot.slane %v4285_v43, 5  ;;  %v2777_v11 = vshrl.u32 %v4408_v56, 16  ;;  %v4473_v27 = vld [vmem:[%s4926_s30 + $0xac] sm:$0xf] }
 0x10e   : > { %879 = vst.msk [vmem:[#allocation2 + $0x38] sm:$0xff] %vm871_vm7, %v838_v49  ;;  %v3311_v57 = vld [vmem:[#allocation2 + $0x28] sm:$0xff]  ;;  %1354 = vrot.lane.b32.xlu1 %v4707_v37, %s4836_s4  ;;  %v4240_v2 = vcombine.low %v1742_v45, %v1752_v59  ;;  %v1766_v4 = vsel %vm4969_vm5, %v1761_v50, %v1765_v35  ;;  %v1771_v5 = vrot.slane %v1770_v51, 4  ;;  %v2124_v6 = vsel %vm4928_vm2, %v2122_v55, %v2123_v48  ;;  %v4711_v40 = vld [vmem:[%s4926_s30 + $0xb4] sm:$0xff]   ;;  %v384_v50 = vld [vmem:[%s4926_s30 + $0xb0] sm:$0x1] }
 0x10f   : > { %4573 = vmatmul.mubr.msk.bf16.gmra.mrb[8].mxu0 %vm3342_vm0, %v3311_v57  ;;  %v4320_v3 = vcombine.low %v2121_v52, %v2124_v6  ;;  %v2128_v8 = vsel %vm4928_vm2, %v4305_v61, %v2127_v62  ;;  %v2129_v9 = vrot.slane %v2127_v62, 4  ;;  %v2780_v13 = vshll.u32 %v4408_v56, 16  ;;  %v382_v38 = vld [vmem:[%s4926_s30 + $0xa8] sm:$0xf]  ;;  %v383_v45 = vld [vmem:[%s4926_s30 + $0xac] sm:$0xf] }
 0x110   : > { %v1341_v60 = vpop.permute.xlu0 %1340  ;;  %1897 = vrot.lane.b32.xlu0 %v4240_v2, %s4840_s8  ;;  %v1776_v26 = vsel %vm4969_vm5, %v1771_v5, %v1775_v47  ;;  %v2786_v58 = vshll.u32 %v4409_v1, 16  ;;  %v2790_v14 = vshrl.u32 %v4409_v1, 16  ;;  %v2779_v17 = vrot.slane %v2777_v11, 4  ;;  %v4722_v61 = vld [vmem:[%s4926_s30 + $0xa8] sm:$0xff]  }
 0x111   : > { %v1162_v10 = vpop.permute.xlu1 %1161  ;;  %1383 = vst.msk [vmem:[#allocation2 + $0x30] sm:$0xff] %vm1376_vm9, %v1341_v60  ;;  %v4241_v16 = vcombine.low %v1766_v4, %v1776_v26  ;;  %v2131_v12 = vsel %vm4928_vm2, %v2129_v9, %v2130_v63  ;;  %v2796_v18 = vshll.u32 %v4410_v7, 16  ;;  %v2782_v23 = vrot.slane %v2780_v13, 5 }
 0x112   : > { %1203 = vst.msk [vmem:[#allocation2 + $0x38] sm:$0xff] %vm1195_vm8, %v1162_v10  ;;  %v4321_v21 = vcombine.low %v2128_v8, %v2131_v12  ;;  %v2788_v24 = vrot.slane %v2786_v58, 5  ;;  %v2792_v25 = vrot.slane %v2790_v14, 4  ;;  %v2801_v29 = vshrl.u32 %v4411_v54, 16  ;;  %v4476_v10 = vld [vmem:[%s4926_s30 + $0xb8] sm:$0xf] }
 0x113   : > { %1899 = vrot.lane.b32.xlu1 %v4241_v16, %s4840_s8  ;;  %v2798_v28 = vrot.slane %v2796_v18, 5  ;;  %v2804_v30 = vshll.u32 %v4411_v54, 16  ;;  %v2810_v31 = vshll.u32 %v4412_v15, 16  ;;  %v2783_v34 = vor.u32 %v2782_v23, %v2779_v17  ;;  %v4475_v54 = vld [vmem:[%s4926_s30 + $0xb4] sm:$0xe]  ;;  %338 = vst.msk [vmem:[#allocation2 + $0x70] sm:$0xff] %vm323_vm6, %v4722_v61 }
 0x114   : > { %2218 = vrot.lane.b32.xlu0 %v4320_v3, %s4837_s5  ;;  %v2793_v35 = vor.u32 %v2792_v25, %v2788_v24  ;;  %v2814_v36 = vshrl.u32 %v4412_v15, 16  ;;  %v2820_v37 = vshll.u32 %v4413_v19, 16  ;;  %v2803_v41 = vrot.slane %v2801_v29, 4  ;;  %v4477_v14 = vld [vmem:[%s4926_s30 + $0xbc] sm:$0x1] }
 0x115   : > { %v1343_v33 = vpop.permute.xlu1 %1342  ;;  %v1886_v39 = vpop.permute.xlu0 %1885  ;;  %v2806_v42 = vrot.slane %v2804_v30, 5  ;;  %v2812_v43 = vrot.slane %v2810_v31, 5  ;;  %v4496_v44 = vrot.slane %v4472_v20, 9  ;;  %v2784_v46 = vrot.slane %v2783_v34, 4  ;;  %v385_v15 = vld [vmem:[%s4926_s30 + $0xb4] sm:$0xf] }
 0x116   : > { %1384 = vst.msk [vmem:[#allocation2 + $0x38] sm:$0xff] %vm1376_vm9, %v1343_v33  ;;  %v2794_v47 = vrot.slane %v2793_v35, 4  ;;  %v2816_v48 = vrot.slane %v2814_v36, 4  ;;  %v2822_v49 = vrot.slane %v2820_v37, 5  ;;  %v3167_v52 = vrot.slane %v4473_v27, 5 }
 0x117   : > { %1928 = vst.msk [vmem:[#allocation2 + $0x30] sm:$0xff] %vm1921_vm10, %v1886_v39  ;;  %2220 = vrot.lane.b32.xlu1 %v4321_v21, %s4837_s5  ;;  %v2807_v51 = vor.u32 %v2806_v42, %v2803_v41  ;;  %v3170_v55 = vrot.slane %v4474_v32, 5  ;;  %v728_v56 = vshrl.u32 %v382_v38, 16  ;;  %v2789_v62 = vsel %vm4969_vm5, %v2784_v46, %v2788_v24  ;;  %v386_v21 = vld [vmem:[%s4926_s30 + $0xb8] sm:$0xf] }
 0x118   : > { %2399 = vrot.lane.b32.xlu0 %v4710_v22, %s4841_s9  ;;  %v2799_v63 = vsel %vm4969_vm5, %v2794_v47, %v2798_v28  ;;  %v2817_v1 = vor.u32 %v2816_v48, %v2812_v43  ;;  %v731_v2 = vshll.u32 %v382_v38, 16  ;;  %v3168_v6 = vsel %vm4928_vm2, %v4496_v44, %v3167_v52  ;;  %v4723_v22 = vld [vmem:[%s4926_s30 + $0xb4] sm:$0xff]   ;;  %v387_v28 = vld [vmem:[%s4926_s30 + $0xbc] sm:$0x1]  ;;  %v930_v32 = vld [vmem:[%s4926_s30 + $0xa8] sm:$0xe] }
 0x119   : > { %v1888_v57 = vpop.permute.xlu1 %1887  ;;  %v2207_v59 = vpop.permute.xlu0 %2206  ;;  %v4432_v4 = vcombine.low %v2789_v62, %v2799_v63  ;;  %v2808_v5 = vrot.slane %v2807_v51, 4  ;;  %v3169_v7 = vrot.slane %v3167_v52, 4  ;;  %v730_v3 = vrot.slane %v728_v56, 4  ;;  %339 = vst.msk [vmem:[#allocation2 + $0x78] sm:$0xff] %vm323_vm6, %v4723_v22  ;;  %v931_v37 = vld [vmem:[%s4926_s30 + $0xac] sm:$0xf] }
 0x11a   : > { %1929 = vst.msk [vmem:[#allocation2 + $0x38] sm:$0xff] %vm1921_vm10, %v1888_v57  ;;  %v2818_v60 = vrot.slane %v2817_v1, 4  ;;  %v733_v8 = vrot.slane %v731_v2, 5  ;;  %v737_v9 = vshll.u32 %v383_v45, 16  ;;  %v741_v13 = vshrl.u32 %v383_v45, 16 }
 0x11b   : > { %2249 = vst.msk [vmem:[#allocation2 + $0x30] sm:$0xff] %vm2242_vm11, %v2207_v59  ;;  %2401 = vrot.lane.b32.xlu1 %v4711_v40, %s4841_s9  ;;  %v2813_v11 = vsel %vm4969_vm5, %v2808_v5, %v2812_v43  ;;  %v3171_v26 = vsel %vm4928_vm2, %v3169_v7, %v3170_v55  ;;  %v747_v58 = vshll.u32 %v384_v50, 16  ;;  %v4497_v27 = vrot.slane %v4475_v54, 9  ;;  %v932_v44 = vld [vmem:[%s4926_s30 + $0xb0] sm:$0x1] }
 0x11c   : > { %2944 = vrot.lane.b32.xlu0 %v4432_v4, %s4842_s10  ;;  %v2823_v17 = vsel %vm4969_vm5, %v2818_v60, %v2822_v49  ;;  %v4512_v18 = vcombine.low %v3168_v6, %v3171_v26  ;;  %v734_v19 = vor.u32 %v733_v8, %v730_v3  ;;  %v739_v20 = vrot.slane %v737_v9, 5  ;;  %v933_v45 = vld [vmem:[%s4926_s30 + $0xb4] sm:$0xe]  ;;  %v934_v51 = vld [vmem:[%s4926_s30 + $0xb8] sm:$0xf] }
 0x11d   : > { %v2209_v16 = vpop.permute.xlu1 %2208  ;;  %v2388_v12 = vpop.permute.xlu0 %2387  ;;  %v4433_v23 = vcombine.low %v2813_v11, %v2823_v17  ;;  %v743_v24 = vrot.slane %v741_v13, 4  ;;  %v749_v25 = vrot.slane %v747_v58, 5  ;;  %v3174_v30 = vrot.slane %v4476_v10, 5  ;;  %v935_v52 = vld [vmem:[%s4926_s30 + $0xbc] sm:$0x1] }
 0x11e   : > { %2250 = vst.msk [vmem:[#allocation2 + $0x38] sm:$0xff] %vm2242_vm11, %v2209_v16  ;;  %v735_v29 = vrot.slane %v734_v19, 4  ;;  %v3177_v31 = vrot.slane %v4477_v14, 5  ;;  %v752_v33 = vshrl.u32 %v385_v15, 16  ;;  %v755_v34 = vshll.u32 %v385_v15, 16 }
 0x11f   : > { %2430 = vst.msk [vmem:[#allocation2 + $0x30] sm:$0xff] %vm2423_vm12, %v2388_v12  ;;  %2946 = vrot.lane.b32.xlu1 %v4433_v23, %s4842_s10  ;;  %v744_v39 = vor.u32 %v743_v24, %v739_v20  ;;  %v761_v35 = vshll.u32 %v386_v21, 16  ;;  %v765_v36 = vshrl.u32 %v386_v21, 16  ;;  %v3175_v41 = vsel %vm4928_vm2, %v4497_v27, %v3174_v30  ;;  %v4222_v55 = vld [vmem:[%s4926_s30 + $0xb4] sm:$0xf] }
 0x120   : > { %3265 = vrot.lane.b32.xlu0 %v4512_v18, %s4843_s11  ;;  %v740_v40 = vsel %vm4969_vm5, %v735_v29, %v739_v20  ;;  %v3176_v42 = vrot.slane %v3174_v30, 4  ;;  %v754_v43 = vrot.slane %v752_v33, 4  ;;  %v757_v48 = vrot.slane %v755_v34, 5  ;;  %v4223_v62 = vld [vmem:[%s4926_s30 + $0xb8] sm:$0xf] }
 0x121   : > { %v2390_v38 = vpop.permute.xlu1 %2389  ;;  %v745_v47 = vrot.slane %v744_v39, 4  ;;  %v763_v49 = vrot.slane %v761_v35, 5  ;;  %v767_v50 = vrot.slane %v765_v36, 4  ;;  %v771_v57 = vshll.u32 %v387_v28, 16  ;;  %v4224_v26 = vld [vmem:[%s4926_s30 + $0xbc] sm:$0x1] }
 0x122   : > { %2431 = vst.msk [vmem:[#allocation2 + $0x38] sm:$0xff] %vm2423_vm12, %v2390_v38  ;;  %v2933_v46 = vpop.permute.xlu0 %2932  ;;  %v3178_v56 = vsel %vm4928_vm2, %v3176_v42, %v3177_v31  ;;  %v4114_v59 = vrot.slane %v930_v32, 9  ;;  %v1087_v61 = vrot.slane %v931_v37, 5  ;;  %v758_v2 = vor.u32 %v757_v48, %v754_v43  ;;  %v4225_v13 = vld [vmem:[%s4926_s30 + $0xc0] sm:$0xf]  ;;  %v4712_v32 = vld [vmem:[%s4926_s30 + $0xb4] sm:$0xff]  }
 0x123   : > { %2975 = vst.msk [vmem:[#allocation2 + $0x30] sm:$0xff] %vm2968_vm13, %v2933_v46  ;;  %v750_v63 = vsel %vm4969_vm5, %v745_v47, %v749_v25  ;;  %v4513_v1 = vcombine.low %v3175_v41, %v3178_v56  ;;  %v768_v4 = vor.u32 %v767_v50, %v763_v49  ;;  %v773_v7 = vrot.slane %v771_v57, 5  ;;  %v4226_v24 = vld [vmem:[%s4926_s30 + $0xc4] sm:$0xf]  ;;  %v4227_v31 = vld [vmem:[%s4926_s30 + $0xc8] sm:$0x1] }
 0x124   : > { %v4098_v6 = vcombine.low %v740_v40, %v750_v63  ;;  %v1088_v54 = vsel %vm4928_vm2, %v4114_v59, %v1087_v61  ;;  %v1089_v60 = vrot.slane %v1087_v61, 4  ;;  %v759_v8 = vrot.slane %v758_v2, 4  ;;  %v4286_v36 = vld [vmem:[%s4926_s30 + $0xb4] sm:$0xe]  ;;  %v4287_v43 = vld [vmem:[%s4926_s30 + $0xb8] sm:$0xf] }
 0x125   : > { %v2935_v5 = vpop.permute.xlu1 %2934  ;;  %3267 = vrot.lane.b32.xlu0 %v4513_v1, %s4843_s11  ;;  %v769_v9 = vrot.slane %v768_v4, 4  ;;  %v1090_v10 = vrot.slane %v932_v44, 5  ;;  %v4115_v11 = vrot.slane %v933_v45, 9  ;;  %v1094_v58 = vrot.slane %v934_v51, 5  ;;  %v4288_v44 = vld [vmem:[%s4926_s30 + $0xbc] sm:$0x1] }
 0x126   : > { %2976 = vst.msk [vmem:[#allocation2 + $0x38] sm:$0xff] %vm2968_vm13, %v2935_v5  ;;  %v3254_v3 = vpop.permute.xlu0 %3253  ;;  %851 = vrot.lane.b32.xlu1 %v4098_v6, %s4839_s7  ;;  %v1097_v14 = vrot.slane %v935_v52, 5  ;;  %v1778_v15 = vshrl.u32 %v4222_v55, 16  ;;  %v1781_v16 = vshll.u32 %v4222_v55, 16  ;;  %v764_v12 = vsel %vm4969_vm5, %v759_v8, %v763_v49  ;;  %v4289_v49 = vld [vmem:[%s4926_s30 + $0xc0] sm:$0xe] }
 0x127   : > { %3296 = vst.msk [vmem:[#allocation2 + $0x30] sm:$0xff] %vm3289_vm14, %v3254_v3  ;;  %v774_v17 = vsel %vm4969_vm5, %v769_v9, %v773_v7  ;;  %v1091_v18 = vsel %vm4928_vm2, %v1089_v60, %v1090_v10  ;;  %v1787_v19 = vshll.u32 %v4223_v62, 16  ;;  %v1095_v22 = vsel %vm4928_vm2, %v4115_v11, %v1094_v58  ;;  %v4290_v57 = vld [vmem:[%s4926_s30 + $0xc4] sm:$0xf]  ;;  %v4291_v2 = vld [vmem:[%s4926_s30 + $0xc8] sm:$0x1] }
 0x128   : > { %v4099_v20 = vcombine.low %v764_v12, %v774_v17  ;;  %v4130_v21 = vcombine.low %v1088_v54, %v1091_v18  ;;  %v1096_v23 = vrot.slane %v1094_v58, 4  ;;  %v1780_v27 = vrot.slane %v1778_v15, 4  ;;  %v4713_v59 = vld [vmem:[%s4926_s30 + $0xc0] sm:$0xff]  }
 0x129   : > { %v1783_v28 = vrot.slane %v1781_v16, 5  ;;  %v1789_v29 = vrot.slane %v1787_v19, 5  ;;  %v1791_v30 = vshrl.u32 %v4223_v62, 16  ;;  %v1797_v39 = vshll.u32 %v4224_v26, 16  ;;  %v4414_v11 = vld [vmem:[%s4926_s30 + $0xc0] sm:$0xf] }
 0x12a   : > { %v3256_v25 = vpop.permute.xlu0 %3255  ;;  %853 = vrot.lane.b32.xlu1 %v4099_v20, %s4839_s7  ;;  %1175 = vrot.lane.b32.xlu0 %v4130_v21, %s4838_s6  ;;  %v1098_v33 = vsel %vm4928_vm2, %v1096_v23, %v1097_v14  ;;  %v1802_v34 = vshrl.u32 %v4225_v13, 16  ;;  %v1805_v35 = vshll.u32 %v4225_v13, 16  ;;  %v1811_v41 = vshll.u32 %v4226_v24, 16  ;;  %v4415_v16 = vld [vmem:[%s4926_s30 + $0xc4] sm:$0xf]  ;;  %s6104_s7 = scalar_lea.hbm %s6226_s2, %s4535_s29 }
 0x12b   : > { %3297 = vst.msk [vmem:[#allocation2 + $0x38] sm:$0xff] %vm3289_vm14, %v3256_v25  ;;  %v4131_v37 = vcombine.low %v1095_v22, %v1098_v33  ;;  %v1784_v38 = vor.u32 %v1783_v28, %v1780_v27  ;;  %v1793_v40 = vrot.slane %v1791_v30, 4  ;;  %v1799_v45 = vrot.slane %v1797_v39, 5  ;;  %v4416_v20 = vld [vmem:[%s4926_s30 + $0xc8] sm:$0x1] }
 0x12c   : > { %v840_v42 = vpop.permute.xlu1 %839  ;;  %v1804_v46 = vrot.slane %v1802_v34, 4  ;;  %v1807_v47 = vrot.slane %v1805_v35, 5  ;;  %v1815_v48 = vshrl.u32 %v4226_v24, 16  ;;  %v1813_v55 = vrot.slane %v1811_v41, 5  ;;  %v4417_v28 = vld [vmem:[%s4926_s30 + $0xcc] sm:$0xf] }
 0x12d   : > { %880 = vst.msk [vmem:[#allocation2 + $0x40] sm:$0xff] %vm871_vm7, %v840_v42  ;;  %v1785_v51 = vrot.slane %v1784_v38, 4  ;;  %v1794_v52 = vor.u32 %v1793_v40, %v1789_v29  ;;  %v1821_v56 = vshll.u32 %v4227_v31, 16  ;;  %v4306_v63 = vrot.slane %v4286_v36, 9  ;;  %v4716_v40 = vld [vmem:[%s4926_s30 + $0xc0] sm:$0xff]  }
 0x12e   : > { %v3312_v50 = vld [vmem:[#allocation2 + $0x30] sm:$0xff]  ;;  %1177 = vrot.lane.b32.xlu1 %v4131_v37, %s4838_s6  ;;  %1356 = vrot.lane.b32.xlu0 %v4712_v32, %s4836_s4  ;;  %v1808_v61 = vor.u32 %v1807_v47, %v1804_v46  ;;  %v1817_v62 = vrot.slane %v1815_v48, 4  ;;  %v2134_v1 = vrot.slane %v4287_v43, 5  ;;  %v2137_v54 = vrot.slane %v4288_v44, 5  ;;  %v4478_v44 = vld [vmem:[%s4926_s30 + $0xc0] sm:$0xe] }
 0x12f   : > { %4576 = vmatprep.mubr.msk.bf16.mxu0 %vm3342_vm0, %v3312_v50  ;;  %v1790_v5 = vsel %vm4969_vm5, %v1785_v51, %v1789_v29  ;;  %v1795_v6 = vrot.slane %v1794_v52, 4  ;;  %v1823_v7 = vrot.slane %v1821_v56, 5  ;;  %v4307_v58 = vrot.slane %v4289_v49, 9  ;;  %v4418_v32 = vld [vmem:[%s4926_s30 + $0xd0] sm:$0xf] }
 0x130   : > { %v1164_v4 = vpop.permute.xlu0 %1163  ;;  %v1809_v3 = vrot.slane %v1808_v61, 4  ;;  %v1818_v8 = vor.u32 %v1817_v62, %v1813_v55  ;;  %v2135_v9 = vsel %vm4928_vm2, %v4306_v63, %v2134_v1  ;;  %v2136_v10 = vrot.slane %v2134_v1, 4  ;;  %v4419_v37 = vld [vmem:[%s4926_s30 + $0xd4] sm:$0x1]  ;;  %v4479_v50 = vld [vmem:[%s4926_s30 + $0xc4] sm:$0xf] }
 0x131   : > { %v842_v60 = vpop.permute.xlu1 %841  ;;  %1204 = vst.msk [vmem:[#allocation2 + $0x40] sm:$0xff] %vm1195_vm8, %v1164_v4  ;;  %v1800_v13 = vsel %vm4969_vm5, %v1795_v6, %v1799_v45  ;;  %v2141_v14 = vrot.slane %v4290_v57, 5  ;;  %v2144_v15 = vrot.slane %v4291_v2, 5  ;;  %v2825_v27 = vshrl.u32 %v4414_v11, 16  ;;  %v4480_v57 = vld [vmem:[%s4926_s30 + $0xc8] sm:$0x1] }
 0x132   : > { %881 = vst.msk [vmem:[#allocation2 + $0x48] sm:$0xff] %vm871_vm7, %v842_v60  ;;  %v3313_v26 = vld [vmem:[#allocation2 + $0x38] sm:$0xff]  ;;  %1358 = vrot.lane.b32.xlu1 %v4713_v59, %s4836_s4  ;;  %v4242_v12 = vcombine.low %v1790_v5, %v1800_v13  ;;  %v1814_v17 = vsel %vm4969_vm5, %v1809_v3, %v1813_v55  ;;  %v1819_v18 = vrot.slane %v1818_v8, 4  ;;  %v2138_v19 = vsel %vm4928_vm2, %v2136_v10, %v2137_v54  ;;  %v4481_v59 = vld [vmem:[%s4926_s30 + $0xcc] sm:$0xe] }
 0x133   : > { %4577 = vmatmul.mubr.msk.bf16.gmra.mrb[12].mxu0 %vm3342_vm0, %v3313_v26  ;;  %v4322_v22 = vcombine.low %v2135_v9, %v2138_v19  ;;  %v2142_v23 = vsel %vm4928_vm2, %v4307_v58, %v2141_v14  ;;  %v2143_v24 = vrot.slane %v2141_v14, 4  ;;  %v2828_v30 = vshll.u32 %v4414_v11, 16  ;;  %v4482_v2 = vld [vmem:[%s4926_s30 + $0xd0] sm:$0xf]  ;;  %v4483_v10 = vld [vmem:[%s4926_s30 + $0xd4] sm:$0x1] }
 0x134   : > { %v1345_v21 = vpop.permute.xlu0 %1344  ;;  %1901 = vrot.lane.b32.xlu0 %v4242_v12, %s4840_s8  ;;  %v1824_v29 = vsel %vm4969_vm5, %v1819_v18, %v1823_v7  ;;  %v2834_v31 = vshll.u32 %v4415_v16, 16  ;;  %v2838_v33 = vshrl.u32 %v4415_v16, 16  ;;  %v2827_v35 = vrot.slane %v2825_v27, 4  ;;  %v4717_v60 = vld [vmem:[%s4926_s30 + $0xcc] sm:$0xff]   ;;  %s178_s30 = scalar_lea.vmem [#allocation3], %s6095_s28 }
 0x135   : > { %v1166_v25 = vpop.permute.xlu1 %1165  ;;  %1385 = vst.msk [vmem:[#allocation2 + $0x40] sm:$0xff] %vm1376_vm9, %v1345_v21  ;;  %v4243_v39 = vcombine.low %v1814_v17, %v1824_v29  ;;  %v2145_v34 = vsel %vm4928_vm2, %v2143_v24, %v2144_v15  ;;  %v2844_v36 = vshll.u32 %v4416_v20, 16  ;;  %v2830_v41 = vrot.slane %v2828_v30, 5  ;;  %s3948_s4 = sshll.u32 %s178_s30, 4  ;;  %s6106_s4 = int_to_ptr.vmem [resolvable:$true] %s3948_s4 }
 0x136   : > { %1205 = vst.msk [vmem:[#allocation2 + $0x48] sm:$0xff] %vm1195_vm8, %v1166_v25  ;;  %v4323_v38 = vcombine.low %v2142_v23, %v2145_v34  ;;  %v2836_v42 = vrot.slane %v2834_v31, 5  ;;  %v2840_v43 = vrot.slane %v2838_v33, 4  ;;  %v2849_v46 = vshrl.u32 %v4417_v28, 16 }
 0x137   : > { %1903 = vrot.lane.b32.xlu1 %v4243_v39, %s4840_s8  ;;  %v2846_v45 = vrot.slane %v2844_v36, 5  ;;  %v2852_v47 = vshll.u32 %v4417_v28, 16  ;;  %v2858_v48 = vshll.u32 %v4418_v32, 16  ;;  %v2831_v51 = vor.u32 %v2830_v41, %v2827_v35  ;;  %s3932_s8 = scalar_lea.sflag [#allocation4], %s6095_s28 }
 0x138   : > { %2222 = vrot.lane.b32.xlu0 %v4322_v22, %s4837_s5  ;;  %v2841_v52 = vor.u32 %v2840_v43, %v2836_v42  ;;  %v2862_v55 = vshrl.u32 %v4418_v32, 16  ;;  %v2868_v56 = vshll.u32 %v4419_v37, 16  ;;  %v2851_v61 = vrot.slane %v2849_v46, 4 }
 0x139   : > { %v1347_v49 = vpop.permute.xlu1 %1346  ;;  %v2854_v62 = vrot.slane %v2852_v47, 5  ;;  %v2860_v63 = vrot.slane %v2858_v48, 5  ;;  %v4498_v1 = vrot.slane %v4478_v44, 9  ;;  %v1890_v4 = vpop.permute.xlu0 %1889  ;;  %v2832_v5 = vrot.slane %v2831_v51, 4 }
 0x13a   : > { %1386 = vst.msk [vmem:[#allocation2 + $0x48] sm:$0xff] %vm1376_vm9, %v1347_v49  ;;  %v2842_v6 = vrot.slane %v2841_v52, 4  ;;  %v2864_v7 = vrot.slane %v2862_v55, 4  ;;  %v2870_v54 = vrot.slane %v2868_v56, 5  ;;  %v3181_v8 = vrot.slane %v4479_v50, 5 }
 0x13b   : > { %1930 = vst.msk [vmem:[#allocation2 + $0x40] sm:$0xff] %vm1921_vm10, %v1890_v4  ;;  %2224 = vrot.lane.b32.xlu1 %v4323_v38, %s4837_s5  ;;  %v2855_v3 = vor.u32 %v2854_v62, %v2851_v61  ;;  %v3184_v9 = vrot.slane %v4480_v57, 5  ;;  %v4499_v11 = vrot.slane %v4481_v59, 9  ;;  %v2837_v26 = vsel %vm4969_vm5, %v2832_v5, %v2836_v42 }
 0x13c   : > { %2403 = vrot.lane.b32.xlu0 %v4716_v40, %s4841_s9  ;;  %v2847_v13 = vsel %vm4969_vm5, %v2842_v6, %v2846_v45  ;;  %v2865_v58 = vor.u32 %v2864_v7, %v2860_v63  ;;  %v3188_v14 = vrot.slane %v4482_v2, 5  ;;  %v3182_v17 = vsel %vm4928_vm2, %v4498_v1, %v3181_v8 }
 0x13d   : > { %v1892_v15 = vpop.permute.xlu1 %1891  ;;  %v4434_v16 = vcombine.low %v2837_v26, %v2847_v13  ;;  %v2856_v12 = vrot.slane %v2855_v3, 4  ;;  %v3183_v18 = vrot.slane %v3181_v8, 4  ;;  %v2211_v19 = vpop.permute.xlu0 %2210  ;;  %v3191_v22 = vrot.slane %v4483_v10, 5 }
 0x13e   : > { %1931 = vst.msk [vmem:[#allocation2 + $0x48] sm:$0xff] %vm1921_vm10, %v1892_v15  ;;  %v2866_v20 = vrot.slane %v2865_v58, 4  ;;  %v3190_v21 = vrot.slane %v3188_v14, 4  ;;  %v3189_v28 = vsel %vm4928_vm2, %v4499_v11, %v3188_v14 }
 0x13f   : > { %2251 = vst.msk [vmem:[#allocation2 + $0x40] sm:$0xff] %vm2242_vm11, %v2211_v19  ;;  %2405 = vrot.lane.b32.xlu1 %v4717_v60, %s4841_s9  ;;  %v2861_v23 = vsel %vm4969_vm5, %v2856_v12, %v2860_v63  ;;  %v3185_v24 = vsel %vm4928_vm2, %v3183_v18, %v3184_v9  ;;  %s4724_s9 = scalar_lea.vmem %s6106_s4, 16 }
 0x140   : > { %2948 = vrot.lane.b32.xlu0 %v4434_v16, %s4842_s10  ;;  %v2871_v25 = vsel %vm4969_vm5, %v2866_v20, %v2870_v54  ;;  %v4514_v27 = vcombine.low %v3182_v17, %v3185_v24  ;;  %v3192_v29 = vsel %vm4928_vm2, %v3190_v21, %v3191_v22  ;;  %p4725_p12 = scmp.ne.s32.totalorder %s6106_s4, %s4724_s9 }
 0x141   : > { %v2213_v30 = vpop.permute.xlu1 %2212  ;;  %v4435_v31 = vcombine.low %v2861_v23, %v2871_v25  ;;  %v2392_v33 = vpop.permute.xlu0 %2391  ;;  %v4515_v32 = vcombine.low %v3189_v28, %v3192_v29 }
 0x142   : > { %2252 = vst.msk [vmem:[#allocation2 + $0x48] sm:$0xff] %vm2242_vm11, %v2213_v30  ;;  %p4726_p13 = pnand %p4725_p12, %p4906_p4 }
 0x143   : > { %2432 = vst.msk [vmem:[#allocation2 + $0x40] sm:$0xff] %vm2423_vm12, %v2392_v33  ;;  %2950 = vrot.lane.b32.xlu1 %v4435_v31, %s4842_s10  ;;  %s4844_s10 = smov [#allocation3]  }
 0x144   : > { %3269 = vrot.lane.b32.xlu0 %v4514_v27, %s4843_s11  ;;  %p4727_p0 = pneg %p4726_p13 }
 0x145   : > { %v2394_v53 = vpop.permute.xlu1 %2393 }
 0x146   : > { %2433 = vst.msk [vmem:[#allocation2 + $0x48] sm:$0xff] %vm2423_vm12, %v2394_v53  ;;  %v2937_v39 = vpop.permute.xlu0 %2936 }
 0x147   : > { %3271 = vrot.lane.b32.xlu1 %v4515_v32, %s4843_s11  ;;  %2977 = vst.msk [vmem:[#allocation2 + $0x40] sm:$0xff] %vm2968_vm13, %v2937_v39  ;;  %s4728_s11 = sshll.u32 %s4844_s10, 4  ;;  %s4729_s11 = int_to_ptr.vmem [resolvable:$false] %s4728_s11 }
 0x148   : > { %s4730_s18 = scalar_lea.vmem %s4729_s11, 32  ;;  %p4731_p1 = scmp.lt.s32.totalorder %s6106_s4, %s4729_s11 }
 0x149   : > { %v2939_v0 = vpop.permute.xlu1 %2938  ;;  %p4732_p2 = scmp.lt.s32.totalorder %s4730_s18, %s4724_s9 }
 0x14a   : > { %2978 = vst.msk [vmem:[#allocation2 + $0x48] sm:$0xff] %vm2968_vm13, %v2939_v0  ;;  %v3258_v34 = vpop.permute.xlu0 %3257 }
 0x14b   : > { %3298 = vst.msk [vmem:[#allocation2 + $0x40] sm:$0xff] %vm3289_vm14, %v3258_v34  ;;  %p4733_p3 = por %p4732_p2, %p4731_p1 }
 0x14d   : > { %p4734_p5 = pnand %p4733_p3, %p4727_p0 }
 0x14f   : > { %v3260_v35 = vpop.permute.xlu0 %3259 }
 0x150   : > { %v844_v36 = vpop.permute.xlu1 %843  ;;  %3299 = vst.msk [vmem:[#allocation2 + $0x48] sm:$0xff] %vm3289_vm14, %v3260_v35 }
 0x151   : > { %882 = vst.msk [vmem:[#allocation2 + $0x50] sm:$0xff] %vm871_vm7, %v844_v36 }
 0x152   : > { %v3314_v37 = vld [vmem:[#allocation2 + $0x40] sm:$0xff] }
 0x153   : > { %4580 = vmatprep.mubr.msk.bf16.mxu1 %vm3342_vm0, %v3314_v37 }
 0x154   : > { %v846_v38 = vpop.permute.xlu1 %845  ;;  %v1168_v40 = vpop.permute.xlu0 %1167 }
 0x155   : > { %883 = vst.msk [vmem:[#allocation2 + $0x58] sm:$0xff] %vm871_vm7, %v846_v38 }
 0x156   : > { %1206 = vst.msk [vmem:[#allocation2 + $0x50] sm:$0xff] %vm1195_vm8, %v1168_v40 }
 0x157   : > { %v3315_v41 = vld [vmem:[#allocation2 + $0x48] sm:$0xff] }
 0x158   : > { %v1170_v42 = vpop.permute.xlu1 %1169  ;;  %v1349_v43 = vpop.permute.xlu0 %1348  ;;  %4581 = vmatmul.mubr.msk.bf16.vlgmr.msra.gmra.mrb[0].mxu1 %vm3342_vm0, %v3315_v41 }
 0x159   : > { %1207 = vst.msk [vmem:[#allocation2 + $0x58] sm:$0xff] %vm1195_vm8, %v1170_v42 }
 0x15a   : > { %1387 = vst.msk [vmem:[#allocation2 + $0x50] sm:$0xff] %vm1376_vm9, %v1349_v43 }
 0x15c   : > { %v1351_v44 = vpop.permute.xlu1 %1350 }
 0x15d   : > { %1388 = vst.msk [vmem:[#allocation2 + $0x58] sm:$0xff] %vm1376_vm9, %v1351_v44 }
 0x15e   : > { %v1894_v45 = vpop.permute.xlu0 %1893 }
 0x15f   : > { %1932 = vst.msk [vmem:[#allocation2 + $0x50] sm:$0xff] %vm1921_vm10, %v1894_v45 }
 0x161   : > { %v1896_v46 = vpop.permute.xlu1 %1895 }
 0x162   : > { %1933 = vst.msk [vmem:[#allocation2 + $0x58] sm:$0xff] %vm1921_vm10, %v1896_v46  ;;  %v2215_v47 = vpop.permute.xlu0 %2214 }
 0x163   : > { %2253 = vst.msk [vmem:[#allocation2 + $0x50] sm:$0xff] %vm2242_vm11, %v2215_v47 }
 0x165   : > { %v2217_v48 = vpop.permute.xlu1 %2216 }
 0x166   : > { %2254 = vst.msk [vmem:[#allocation2 + $0x58] sm:$0xff] %vm2242_vm11, %v2217_v48  ;;  %v2396_v49 = vpop.permute.xlu0 %2395 }
 0x167   : > { %2434 = vst.msk [vmem:[#allocation2 + $0x50] sm:$0xff] %vm2423_vm12, %v2396_v49 }
 0x169   : > { %v2398_v50 = vpop.permute.xlu1 %2397 }
 0x16a   : > { %2435 = vst.msk [vmem:[#allocation2 + $0x58] sm:$0xff] %vm2423_vm12, %v2398_v50  ;;  %v2941_v51 = vpop.permute.xlu0 %2940 }
 0x16b   : > { %2979 = vst.msk [vmem:[#allocation2 + $0x50] sm:$0xff] %vm2968_vm13, %v2941_v51 }
 0x16d   : > { %v2943_v52 = vpop.permute.xlu1 %2942 }
 0x16e   : > { %2980 = vst.msk [vmem:[#allocation2 + $0x58] sm:$0xff] %vm2968_vm13, %v2943_v52  ;;  %v3262_v55 = vpop.permute.xlu0 %3261 }
 0x16f   : > { %3300 = vst.msk [vmem:[#allocation2 + $0x50] sm:$0xff] %vm3289_vm14, %v3262_v55 }
 0x173   : > { %v3264_v56 = vpop.permute.xlu0 %3263 }
 0x174   : > { %v848_v57 = vpop.permute.xlu1 %847  ;;  %3301 = vst.msk [vmem:[#allocation2 + $0x58] sm:$0xff] %vm3289_vm14, %v3264_v56 }
 0x175   : > { %884 = vst.msk [vmem:[#allocation2 + $0x60] sm:$0xff] %vm871_vm7, %v848_v57 }
 0x176   : > { %v3316_v59 = vld [vmem:[#allocation2 + $0x50] sm:$0xff] }
 0x177   : > { %4584 = vmatprep.mubr.msk.bf16.mxu1 %vm3342_vm0, %v3316_v59 }
 0x178   : > { %v850_v61 = vpop.permute.xlu1 %849  ;;  %v1172_v62 = vpop.permute.xlu0 %1171 }
 0x179   : > { %885 = vst.msk [vmem:[#allocation2 + $0x68] sm:$0xff] %vm871_vm7, %v850_v61 }
 0x17a   : > { %1208 = vst.msk [vmem:[#allocation2 + $0x60] sm:$0xff] %vm1195_vm8, %v1172_v62 }
 0x17b   : > { %v3317_v63 = vld [vmem:[#allocation2 + $0x58] sm:$0xff] }
 0x17c   : > { %v1174_v1 = vpop.permute.xlu1 %1173  ;;  %v1353_v2 = vpop.permute.xlu0 %1352  ;;  %4585 = vmatmul.mubr.msk.bf16.gmra.mrb[4].mxu1 %vm3342_vm0, %v3317_v63 }
 0x17d   : > { %1209 = vst.msk [vmem:[#allocation2 + $0x68] sm:$0xff] %vm1195_vm8, %v1174_v1 }
 0x17e   : > { %1389 = vst.msk [vmem:[#allocation2 + $0x60] sm:$0xff] %vm1376_vm9, %v1353_v2 }
 0x180   : > { %v1355_v4 = vpop.permute.xlu1 %1354 }
 0x181   : > { %1390 = vst.msk [vmem:[#allocation2 + $0x68] sm:$0xff] %vm1376_vm9, %v1355_v4 }
 0x182   : > { %v1898_v5 = vpop.permute.xlu0 %1897 }
 0x183   : > { %1934 = vst.msk [vmem:[#allocation2 + $0x60] sm:$0xff] %vm1921_vm10, %v1898_v5 }
 0x185   : > { %v1900_v6 = vpop.permute.xlu1 %1899 }
 0x186   : > { %1935 = vst.msk [vmem:[#allocation2 + $0x68] sm:$0xff] %vm1921_vm10, %v1900_v6  ;;  %v2219_v7 = vpop.permute.xlu0 %2218 }
 0x187   : > { %2255 = vst.msk [vmem:[#allocation2 + $0x60] sm:$0xff] %vm2242_vm11, %v2219_v7 }
 0x189   : > { %v2221_v54 = vpop.permute.xlu1 %2220 }
 0x18a   : > { %2256 = vst.msk [vmem:[#allocation2 + $0x68] sm:$0xff] %vm2242_vm11, %v2221_v54  ;;  %v2400_v60 = vpop.permute.xlu0 %2399 }
 0x18b   : > { %2436 = vst.msk [vmem:[#allocation2 + $0x60] sm:$0xff] %vm2423_vm12, %v2400_v60 }
 0x18d   : > { %v2402_v3 = vpop.permute.xlu1 %2401 }
 0x18e   : > { %2437 = vst.msk [vmem:[#allocation2 + $0x68] sm:$0xff] %vm2423_vm12, %v2402_v3  ;;  %v2945_v8 = vpop.permute.xlu0 %2944 }
 0x18f   : > { %2981 = vst.msk [vmem:[#allocation2 + $0x60] sm:$0xff] %vm2968_vm13, %v2945_v8 }
 0x191   : > { %v2947_v9 = vpop.permute.xlu1 %2946 }
 0x192   : > { %2982 = vst.msk [vmem:[#allocation2 + $0x68] sm:$0xff] %vm2968_vm13, %v2947_v9  ;;  %v3266_v10 = vpop.permute.xlu0 %3265 }
 0x193   : > { %3302 = vst.msk [vmem:[#allocation2 + $0x60] sm:$0xff] %vm3289_vm14, %v3266_v10 }
 0x197   : > { %v3268_v11 = vpop.permute.xlu0 %3267 }
 0x198   : > { %v852_v26 = vpop.permute.xlu1 %851  ;;  %3303 = vst.msk [vmem:[#allocation2 + $0x68] sm:$0xff] %vm3289_vm14, %v3268_v11 }
 0x199   : > { %886 = vst.msk [vmem:[#allocation2 + $0x70] sm:$0xff] %vm871_vm7, %v852_v26 }
 0x19a   : > { %v3318_v13 = vld [vmem:[#allocation2 + $0x60] sm:$0xff] }
 0x19b   : > { %4588 = vmatprep.mubr.msk.bf16.mxu1 %vm3342_vm0, %v3318_v13 }
 0x19c   : > { %v854_v58 = vpop.permute.xlu1 %853  ;;  %v1176_v14 = vpop.permute.xlu0 %1175 }
 0x19d   : > { %887 = vst.msk [vmem:[#allocation2 + $0x78] sm:$0xff] %vm871_vm7, %v854_v58 }
 0x19e   : > { %1210 = vst.msk [vmem:[#allocation2 + $0x70] sm:$0xff] %vm1195_vm8, %v1176_v14 }
 0x19f   : > { %v5982_v15 = vpop.f32.mrb[0].mxu0  ;;  %v3319_v16 = vld [vmem:[#allocation2 + $0x68] sm:$0xff] }
 0x1a0   : > { %v5984_v12 = vpop.f32.mrb[1].mxu0  ;;  %v1178_v17 = vpop.permute.xlu1 %1177  ;;  %4589 = vmatmul.mubr.msk.bf16.gmra.mrb[8].mxu1 %vm3342_vm0, %v3319_v16 }
 0x1a1   : > { %v1357_v18 = vpop.permute.xlu0 %1356  ;;  %1211 = vst.msk [vmem:[#allocation2 + $0x78] sm:$0xff] %vm1195_vm8, %v1178_v17  ;;  %v5989_v19 = vpop.f32.mrb[2].mxu0 }
 0x1a2   : > { %1391 = vst.msk [vmem:[#allocation2 + $0x70] sm:$0xff] %vm1376_vm9, %v1357_v18  ;;  %v5991_v20 = vpop.f32.mrb[3].mxu0 }
 0x1a3   : > { %v3723_v21 = vadd.f32 %v5991_v20, %v5984_v12 }
 0x1a4   : > { %v1359_v22 = vpop.permute.xlu1 %1358 }
 0x1a5   : > { %1392 = vst.msk [vmem:[#allocation2 + $0x78] sm:$0xff] %vm1376_vm9, %v1359_v22  ;;  %v3724_v23 = vadd.f32 %v5982_v15, %v3723_v21 }
 0x1a6   : > { %v1902_v24 = vpop.permute.xlu0 %1901 }
 0x1a7   : > { %1936 = vst.msk [vmem:[#allocation2 + $0x70] sm:$0xff] %vm1921_vm10, %v1902_v24  ;;  %v3725_v25 = vadd.f32 %v5989_v19, %v3724_v23 }
 0x1a9   : > { %v1904_v27 = vpop.permute.xlu1 %1903 }
 0x1aa   : > { %1937 = vst.msk [vmem:[#allocation2 + $0x78] sm:$0xff] %vm1921_vm10, %v1904_v27  ;;  %v2223_v28 = vpop.permute.xlu0 %2222 }
 0x1ab   : > { %2257 = vst.msk [vmem:[#allocation2 + $0x70] sm:$0xff] %vm2242_vm11, %v2223_v28 }
 0x1ad   : > { %v2225_v29 = vpop.permute.xlu1 %2224 }
 0x1ae   : > { %2258 = vst.msk [vmem:[#allocation2 + $0x78] sm:$0xff] %vm2242_vm11, %v2225_v29  ;;  %v2404_v30 = vpop.permute.xlu0 %2403 }
 0x1af   : > { %2438 = vst.msk [vmem:[#allocation2 + $0x70] sm:$0xff] %vm2423_vm12, %v2404_v30 }
 0x1b1   : > { %v2406_v31 = vpop.permute.xlu1 %2405 }
 0x1b2   : > { %2439 = vst.msk [vmem:[#allocation2 + $0x78] sm:$0xff] %vm2423_vm12, %v2406_v31  ;;  %v2949_v33 = vpop.permute.xlu0 %2948 }
 0x1b3   : > { %2983 = vst.msk [vmem:[#allocation2 + $0x70] sm:$0xff] %vm2968_vm13, %v2949_v33 }
 0x1b5   : > { %v2951_v32 = vpop.permute.xlu1 %2950 }
 0x1b6   : > { %2984 = vst.msk [vmem:[#allocation2 + $0x78] sm:$0xff] %vm2968_vm13, %v2951_v32  ;;  %v3270_v53 = vpop.permute.xlu0 %3269 }
 0x1b7   : > { %3304 = vst.msk [vmem:[#allocation2 + $0x70] sm:$0xff] %vm3289_vm14, %v3270_v53 }
 0x1b9   : > { %v3272_v39 = vpop.permute.xlu1 %3271 }
 0x1ba   : > { %3305 = vst.msk [vmem:[#allocation2 + $0x78] sm:$0xff] %vm3289_vm14, %v3272_v39 }
 0x1be   : > { %v6008_v0 = vpop.f32.mrb[4].mxu0  ;;  %v3320_v35 = vld [vmem:[#allocation2 + $0x70] sm:$0xff] }
 0x1bf   : > { %v6010_v34 = vpop.f32.mrb[5].mxu0  ;;  %4592 = vmatprep.mubr.msk.bf16.mxu1 %vm3342_vm0, %v3320_v35 }
 0x1c0   : > { %v3726_v36 = vadd.f32 %v3725_v25, %v6010_v34  ;;  %v6013_v37 = vpop.f32.mrb[6].mxu0 }
 0x1c1   : > { %v6016_v38 = vpop.f32.mrb[7].mxu0  ;;  %v3321_v41 = vld [vmem:[#allocation2 + $0x78] sm:$0xff] }
 0x1c2   : > { %v3727_v40 = vadd.f32 %v3726_v36, %v6016_v38  ;;  %4593 = vmatmul.mubr.msk.bf16.gmra.mrb[12].mxu1 %vm3342_vm0, %v3321_v41 }
 0x1c4   : > { %v3728_v42 = vadd.f32 %v6008_v0, %v3727_v40 }
 0x1c6   : > { %v3729_v43 = vadd.f32 %v6013_v37, %v3728_v42 }
 0x1e2   : > { %v6022_v44 = vpop.f32.mrb[8].mxu0 }
 0x1e3   : > { %v6024_v45 = vpop.f32.mrb[9].mxu0 }
 0x1e4   : > { %v3730_v46 = vadd.f32 %v3729_v43, %v6024_v45  ;;  %v6027_v47 = vpop.f32.mrb[10].mxu0 }
 0x1e5   : > { %v6029_v48 = vpop.f32.mrb[11].mxu0 }
 0x1e6   : > { %v3731_v49 = vadd.f32 %v3730_v46, %v6029_v48 }
 0x1e8   : > { %v3732_v50 = vadd.f32 %v6022_v44, %v3731_v49 }
 0x1ea   : > { %v3733_v51 = vadd.f32 %v6027_v47, %v3732_v50 }
 0x206   : > { %v6034_v52 = vpop.f32.mrb[12].mxu0 }
 0x207   : > { %v6036_v55 = vpop.f32.mrb[13].mxu0 }
 0x208   : > { %v3734_v56 = vadd.f32 %v3733_v51, %v6036_v55  ;;  %v6039_v57 = vpop.f32.mrb[14].mxu0 }
 0x209   : > { %v6041_v59 = vpop.f32.mrb[15].mxu0 }
 0x20a   : > { %v3735_v61 = vadd.f32 %v3734_v56, %v6041_v59 }
 0x20c   : > { %v3736_v62 = vadd.f32 %v6034_v52, %v3735_v61 }
 0x20e   : > { %v3737_v63 = vadd.f32 %v6039_v57, %v3736_v62 }
 0x22b   : > { %v6046_v1 = vpop.f32.mrb[0].mxu1 }
 0x22c   : > { %v6048_v2 = vpop.f32.mrb[1].mxu1 }
 0x22d   : > { %v3738_v4 = vadd.f32 %v3737_v63, %v6048_v2  ;;  %v6051_v5 = vpop.f32.mrb[2].mxu1 }
 0x22e   : > { %v6053_v6 = vpop.f32.mrb[3].mxu1 }
 0x22f   : > { %v3739_v7 = vadd.f32 %v3738_v4, %v6053_v6 }
 0x231   : > { %v3740_v54 = vadd.f32 %v6046_v1, %v3739_v7 }
 0x233   : > { %v3741_v60 = vadd.f32 %v6051_v5, %v3740_v54 }
 0x24f   : > { %v6058_v3 = vpop.f32.mrb[4].mxu1 }
 0x250   : > { %v6060_v8 = vpop.f32.mrb[5].mxu1 }
 0x251   : > { %v3742_v9 = vadd.f32 %v3741_v60, %v6060_v8  ;;  %v6063_v10 = vpop.f32.mrb[6].mxu1 }
 0x252   : > { %v6065_v11 = vpop.f32.mrb[7].mxu1 }
 0x253   : > { %v3743_v26 = vadd.f32 %v3742_v9, %v6065_v11 }
 0x255   : > { %v3744_v13 = vadd.f32 %v6058_v3, %v3743_v26 }
 0x257   : > { %v3745_v58 = vadd.f32 %v6063_v10, %v3744_v13 }
 0x273   : > { %v6070_v14 = vpop.f32.mrb[8].mxu1 }
 0x274   : > { %v6072_v16 = vpop.f32.mrb[9].mxu1 }
 0x275   : > { %v3746_v17 = vadd.f32 %v3745_v58, %v6072_v16  ;;  %v6075_v18 = vpop.f32.mrb[10].mxu1 }
 0x276   : > { %v6077_v21 = vpop.f32.mrb[11].mxu1 }
 0x277   : > { %v3747_v22 = vadd.f32 %v3746_v17, %v6077_v21 }
 0x279   : > { %v3748_v23 = vadd.f32 %v6070_v14, %v3747_v22 }
 0x27b   : > { %v3749_v24 = vadd.f32 %v6075_v18, %v3748_v23 }
 0x295   : > { %v6082_v25 = vpop.f32.mrb[12].mxu1 }
 0x296   : > { %v6084_v27 = vpop.f32.mrb[13].mxu1 }
 0x297   : > { %v3750_v28 = vadd.f32 %v3749_v24, %v6084_v27  ;;  %v6087_v29 = vpop.f32.mrb[14].mxu1 }
 0x298   : > { %v6089_v30 = vpop.f32.mrb[15].mxu1 }
 0x299   : > { %v3751_v31 = vadd.f32 %v3750_v28, %v6089_v30 }
 0x29b   : > { %v3752_v33 = vadd.f32 %v6082_v25, %v3751_v31 }
 0x29d   : > { %v3753_v32 = vadd.f32 %v6087_v29, %v3752_v33 }
 0x29f   : > { %v3754_v53 = vrot.slane %v3753_v32, 4 }
 0x2a1   : > { %v3755_v39 = vadd.f32 %v3754_v53, %v3753_v32 }
 0x2a3   : > { %v3756_v35 = vrot.slane %v3755_v39, 2 }
 0x2a5   : > { %v3757_v36 = vadd.f32 %v3756_v35, %v3755_v39 }
 0x2a7   : > { %v3758_v40 = vrot.slane %v3757_v36, 1 }
 0x2a9   : > { %v3759_v41 = vadd.f32 %v3758_v40, %v3757_v36 }
 0x2ab   : > { %v3762_v42 = vmul.f32 0.00390625, %v3759_v41 }
 0x2ad   : > { %v3763_v43 = vsub.f32 %v5984_v12, %v3762_v42  ;;  %v3764_v46 = vsub.f32 %v5991_v20, %v3762_v42  ;;  %v3765_v49 = vsub.f32 %v5982_v15, %v3762_v42  ;;  %v3766_v50 = vsub.f32 %v5989_v19, %v3762_v42  ;;  %3900 = vst [vmem:[%s178_s30] sm:$0x1] %v3762_v42 }
 0x2ae   : > { %v3767_v51 = vsub.f32 %v6010_v34, %v3762_v42  ;;  %v3768_v56 = vsub.f32 %v6016_v38, %v3762_v42  ;;  %v6115_v61 = vsub.f32 %v6008_v0, %v3762_v42  ;;  %v6118_v62 = vsub.f32 %v6013_v37, %v3762_v42 }
 0x2af   : > { %4737 = shalt.err (!%p4734_p5)
}
 0x2b0   : > { %s4738_s19 = scalar_lea.hbm %s6104_s7, 16  ;;  %s4742_s26 = scalar_lea.hbm %s6226_s2, 32 }
 0x2b1   : > { %p4739_p6 = scmp.ne.s32.totalorder %s6104_s7, %s4738_s19  ;;  %p4743_p10 = scmp.lt.u32.totalorder %s6104_s7, %s6226_s2 }
 0x2b2   : > { %p4744_p11 = scmp.lt.u32.totalorder %s4742_s26, %s4738_s19  ;;  %p4746_p13 = scmp.lt.u32.totalorder %s4738_s19, %s6104_s7 }
 0x2b3   : > { %p4740_p7 = pnand %p4739_p6, %p4906_p4 }
 0x2b4   : > { %p4745_p12 = por %p4744_p11, %p4743_p10 }
 0x2b5   : > { %p4741_p9 = pneg %p4740_p7 }
 0x2b6   : > { %p4747_p0 = por %p4746_p13, %p4745_p12 }
 0x2b8   : > { %p4748_p1 = pnand %p4747_p0, %p4741_p9 }
 0x2ba   : > { %4751 = shalt.err (!%p4748_p1)
}
 0x2bb   : > { %4605 = dma.vmem_to_hbm [thread:$0]  (%p4906_p4), %s6106_s4, 16, %s6104_s7, %s3932_s8   ;;  %v3771_v15 = vsub.f32 %v6024_v45, %v3762_v42  ;;  %v3772_v12 = vsub.f32 %v6029_v48, %v3762_v42  ;;  %v3773_v19 = vsub.f32 %v6022_v44, %v3762_v42  ;;  %v3774_v20 = vsub.f32 %v6027_v47, %v3762_v42 }
 0x2bc   : > { %v3775_v0 = vsub.f32 %v6036_v55, %v3762_v42  ;;  %v3776_v34 = vsub.f32 %v6041_v59, %v3762_v42  ;;  %v3777_v37 = vsub.f32 %v6034_v52, %v3762_v42  ;;  %v3778_v38 = vsub.f32 %v6039_v57, %v3762_v42  ;;  %s184_s4 = scalar_lea.vmem [#allocation5], %s6095_s28  ;;  %s6176_s8 = scalar_lea.hbm %s6227_s3, %s4535_s29 }
 0x2bd   : > { %v3779_v63 = vsub.f32 %v6048_v2, %v3762_v42  ;;  %v3780_v4 = vsub.f32 %v6053_v6, %v3762_v42  ;;  %v3781_v45 = vsub.f32 %v6046_v1, %v3762_v42  ;;  %v3782_v48 = vsub.f32 %v6051_v5, %v3762_v42  ;;  %s3961_s5 = sshll.u32 %s184_s4, 4  ;;  %s3936_s9 = scalar_lea.sflag [#allocation6], %s6095_s28  ;;  %s6178_s5 = int_to_ptr.vmem [resolvable:$true] %s3961_s5 }
 0x2be   : > { %v3783_v44 = vsub.f32 %v6060_v8, %v3762_v42  ;;  %v3784_v47 = vsub.f32 %v6065_v11, %v3762_v42  ;;  %v3785_v55 = vsub.f32 %v6058_v3, %v3762_v42  ;;  %v3786_v59 = vsub.f32 %v6063_v10, %v3762_v42  ;;  %s4752_s10 = scalar_lea.vmem %s6178_s5, 16  ;;  %s4845_s11 = smov [#allocation5]  }
 0x2bf   : > { %v3787_v52 = vsub.f32 %v6072_v16, %v3762_v42  ;;  %v3788_v57 = vsub.f32 %v6077_v21, %v3762_v42  ;;  %v3789_v2 = vsub.f32 %v6070_v14, %v3762_v42  ;;  %v3790_v6 = vsub.f32 %v6075_v18, %v3762_v42  ;;  %p4753_p2 = scmp.ne.s32.totalorder %s6178_s5, %s4752_s10  ;;  %s4756_s18 = sshll.u32 %s4845_s11, 4  ;;  %s4757_s18 = int_to_ptr.vmem [resolvable:$false] %s4756_s18 }
 0x2c0   : > { %v3791_v1 = vsub.f32 %v6084_v27, %v3762_v42  ;;  %v3792_v5 = vsub.f32 %v6089_v30, %v3762_v42  ;;  %v3793_v7 = vsub.f32 %v6082_v25, %v3762_v42  ;;  %v3794_v54 = vsub.f32 %v6087_v29, %v3762_v42  ;;  %s4758_s15 = scalar_lea.vmem %s4757_s18, 32  ;;  %p4759_p6 = scmp.lt.s32.totalorder %s6178_s5, %s4757_s18 }
 0x2c1   : > { %v3827_v60 = vmul.f32 %v3763_v43, %v3763_v43  ;;  %v3828_v3 = vmul.f32 %v3764_v46, %v3764_v46  ;;  %v3829_v8 = vmul.f32 %v3765_v49, %v3765_v49  ;;  %v3830_v10 = vmul.f32 %v3766_v50, %v3766_v50  ;;  %p4754_p3 = pnand %p4753_p2, %p4906_p4  ;;  %p4760_p7 = scmp.lt.s32.totalorder %s4758_s15, %s4752_s10 }
 0x2c2   : > { %v3831_v26 = vmul.f32 %v3767_v51, %v3767_v51  ;;  %v3832_v58 = vmul.f32 %v3768_v56, %v3768_v56  ;;  %v3833_v16 = vmul.f32 %v6115_v61, %v6115_v61  ;;  %v3834_v18 = vmul.f32 %v6118_v62, %v6118_v62 }
 0x2c3   : > { %v3859_v9 = vadd.f32 %v3828_v3, %v3827_v60  ;;  %v3835_v22 = vmul.f32 %v3771_v15, %v3771_v15  ;;  %v3836_v24 = vmul.f32 %v3772_v12, %v3772_v12  ;;  %v3837_v27 = vmul.f32 %v3773_v19, %v3773_v19  ;;  %p4755_p5 = pneg %p4754_p3  ;;  %p4761_p9 = por %p4760_p7, %p4759_p6 }
 0x2c4   : > { %v3838_v29 = vmul.f32 %v3774_v20, %v3774_v20  ;;  %v3839_v31 = vmul.f32 %v3775_v0, %v3775_v0  ;;  %v3840_v32 = vmul.f32 %v3776_v34, %v3776_v34  ;;  %v3841_v39 = vmul.f32 %v3777_v37, %v3777_v37 }
 0x2c5   : > { %v3860_v11 = vadd.f32 %v3859_v9, %v3829_v8  ;;  %v3842_v36 = vmul.f32 %v3778_v38, %v3778_v38  ;;  %v3843_v41 = vmul.f32 %v3779_v63, %v3779_v63  ;;  %v3844_v43 = vmul.f32 %v3780_v4, %v3780_v4  ;;  %p4762_p10 = pnand %p4761_p9, %p4755_p5 }
 0x2c6   : > { %v3845_v49 = vmul.f32 %v3781_v45, %v3781_v45  ;;  %v3846_v51 = vmul.f32 %v3782_v48, %v3782_v48  ;;  %v3847_v61 = vmul.f32 %v3783_v44, %v3783_v44  ;;  %v3848_v15 = vmul.f32 %v3784_v47, %v3784_v47 }
 0x2c7   : > { %v3861_v13 = vadd.f32 %v3860_v11, %v3830_v10  ;;  %v3849_v19 = vmul.f32 %v3785_v55, %v3785_v55  ;;  %v3850_v0 = vmul.f32 %v3786_v59, %v3786_v59  ;;  %v3851_v37 = vmul.f32 %v3787_v52, %v3787_v52 }
 0x2c8   : > { %v3852_v38 = vmul.f32 %v3788_v57, %v3788_v57  ;;  %v3853_v63 = vmul.f32 %v3789_v2, %v3789_v2  ;;  %v3854_v4 = vmul.f32 %v3790_v6, %v3790_v6  ;;  %v3855_v9 = vmul.f32 %v3791_v1, %v3791_v1 }
 0x2c9   : > { %v3862_v14 = vadd.f32 %v3861_v13, %v3831_v26  ;;  %v3856_v44 = vmul.f32 %v3792_v5, %v3792_v5  ;;  %v3857_v47 = vmul.f32 %v3793_v7, %v3793_v7  ;;  %v3858_v11 = vmul.f32 %v3794_v54, %v3794_v54 }
 0x2cb   : > { %v3863_v17 = vadd.f32 %v3862_v14, %v3832_v58 }
 0x2cd   : > { %v3864_v21 = vadd.f32 %v3863_v17, %v3833_v16 }
 0x2cf   : > { %v3865_v23 = vadd.f32 %v3864_v21, %v3834_v18 }
 0x2d1   : > { %v3866_v25 = vadd.f32 %v3865_v23, %v3835_v22 }
 0x2d3   : > { %v3867_v28 = vadd.f32 %v3866_v25, %v3836_v24 }
 0x2d5   : > { %v3868_v30 = vadd.f32 %v3867_v28, %v3837_v27 }
 0x2d7   : > { %v3869_v33 = vadd.f32 %v3868_v30, %v3838_v29 }
 0x2d9   : > { %v3870_v53 = vadd.f32 %v3869_v33, %v3839_v31 }
 0x2db   : > { %v3871_v35 = vadd.f32 %v3870_v53, %v3840_v32 }
 0x2dd   : > { %v3872_v40 = vadd.f32 %v3871_v35, %v3841_v39 }
 0x2df   : > { %v3873_v42 = vadd.f32 %v3872_v40, %v3842_v36 }
 0x2e1   : > { %v3874_v46 = vadd.f32 %v3873_v42, %v3843_v41 }
 0x2e3   : > { %v3875_v50 = vadd.f32 %v3874_v46, %v3844_v43 }
 0x2e5   : > { %v3876_v56 = vadd.f32 %v3875_v50, %v3845_v49 }
 0x2e7   : > { %v3877_v62 = vadd.f32 %v3876_v56, %v3846_v51 }
 0x2e9   : > { %v3878_v12 = vadd.f32 %v3877_v62, %v3847_v61 }
 0x2eb   : > { %v3879_v20 = vadd.f32 %v3878_v12, %v3848_v15 }
 0x2ed   : > { %v3880_v34 = vadd.f32 %v3879_v20, %v3849_v19 }
 0x2ef   : > { %v3881_v60 = vadd.f32 %v3880_v34, %v3850_v0 }
 0x2f1   : > { %v3882_v3 = vadd.f32 %v3881_v60, %v3851_v37 }
 0x2f3   : > { %v3883_v8 = vadd.f32 %v3882_v3, %v3852_v38 }
 0x2f5   : > { %v3884_v45 = vadd.f32 %v3883_v8, %v3853_v63 }
 0x2f7   : > { %v3885_v48 = vadd.f32 %v3884_v45, %v3854_v4 }
 0x2f9   : > { %v3886_v10 = vadd.f32 %v3885_v48, %v3855_v9 }
 0x2fb   : > { %v3887_v55 = vadd.f32 %v3886_v10, %v3856_v44 }
 0x2fd   : > { %v3888_v59 = vadd.f32 %v3887_v55, %v3857_v47 }
 0x2ff   : > { %v3889_v52 = vadd.f32 %v3888_v59, %v3858_v11 }
 0x301   : > { %v3890_v26 = vrot.slane %v3889_v52, 4 }
 0x303   : > { %v3891_v57 = vadd.f32 %v3890_v26, %v3889_v52 }
 0x305   : > { %v3892_v13 = vrot.slane %v3891_v57, 2 }
 0x307   : > { %v3893_v2 = vadd.f32 %v3892_v13, %v3891_v57 }
 0x309   : > { %v3894_v6 = vrot.slane %v3893_v2, 1 }
 0x30b   : > { %v3895_v58 = vadd.f32 %v3894_v6, %v3893_v2 }
 0x30d   : > { %3901 = vst [vmem:[%s184_s4] sm:$0x1] %v3895_v58 }
 0x30e   : > { %4765 = shalt.err (!%p4762_p10)
}
 0x30f   : > { %s4766_s28 = scalar_lea.hbm %s6176_s8, 16  ;;  %s4770_s21 = scalar_lea.hbm %s6227_s3, 32 }
 0x310   : > { %p4767_p11 = scmp.ne.s32.totalorder %s6176_s8, %s4766_s28  ;;  %p4771_p0 = scmp.lt.u32.totalorder %s6176_s8, %s6227_s3 }
 0x311   : > { %p4772_p1 = scmp.lt.u32.totalorder %s4770_s21, %s4766_s28  ;;  %p4774_p3 = scmp.lt.u32.totalorder %s4766_s28, %s6176_s8 }
 0x312   : > { %p4768_p12 = pnand %p4767_p11, %p4906_p4 }
 0x313   : > { %p4773_p2 = por %p4772_p1, %p4771_p0 }
 0x314   : > { %p4769_p13 = pneg %p4768_p12 }
 0x315   : > { %p4775_p5 = por %p4774_p3, %p4773_p2 }
 0x317   : > { %p4776_p6 = pnand %p4775_p5, %p4769_p13 }
 0x319   : > { %4779 = shalt.err (!%p4776_p6)
}
 0x31a   : > { %4606 = dma.vmem_to_hbm [thread:$0]  (%p4906_p4), %s6178_s5, 16, %s6176_s8, %s3936_s9  }
 0x31b PF: > { %p4616_p7 = scmp.ge.s32.totalorder %s4834_s17, 2  ;;  %s3973_s27 = sand.u32 1, %s4814_s12  }
 0x31c   : > { %s3974_s30 = scalar_lea.sflag [#allocation4], %s3973_s27 }
 0x31d   : > { %p4610_p9 = pnand %p4616_p7, %p4913_p8 }
 0x31f   : > { %4805 = dma.done.wait (!%p4610_p9), %s3974_s30, 16  }
 0x320   : > { %4807 = vsyncadd (!%p4610_p9), %s3974_s30, 4294967280  ;;  %s3982_s4 = scalar_lea.sflag [#allocation6], %s3973_s27 }
 0x321   : > { %4809 = dma.done.wait (!%p4610_p9), %s3982_s4, 16  }
 0x322   : > { %4811 = vsyncadd (!%p4610_p9), %s3982_s4, 4294967280  ;;  %s20_s17 = sadd.s32 1, %s4834_s17   ;;  %s6234_s12 = smov %s4818_s13 }
 0x323   : > { %p17_p10 = scmp.ge.s32.totalorder %s20_s17, 4   ;;  %s6235_s13 = smov %s4822_s14 }
 0x324   : > { %s6236_s14 = smov %s4919_s25  ;;  %s6237_s15 = smov %s4830_s16 }
 0x325   : > { %s6238_s16 = smov %s6240_s20  ;;  %19 = sbr.rel (!%p17_p10) target bundleno = 6 (0x6), region = 91 }
 0x32c   :  { %3986 = vsyncpa [#allocation4], 1 }
 0x32d   :  { %3988 = vsyncpa [#allocation4 + $0x1], 1 }
 0x32e   :  { %3989 = vsyncpa [#allocation6], 1 }
 0x32f   :  { %3991 = vsyncpa [#allocation6 + $0x1], 1 }

</bundles_post_ra>
